<compile_context>
chip_gen: v6e
topology: v6e:2x2x1
jax: 0.10.0
libtpu: 0.0.40
codegen_flags: <defaults>
</compile_context>

<pallas_src>
import jax
import jax.numpy as jnp
from jax import lax
from jax.experimental import pallas as pl
from jax.experimental.pallas import tpu as pltpu


# ---------------------------------------------------------------------------
# Fused kernel: layer0 (dense 3x3) -> layer1 (dw 3x3 + 1x1) -> layer2 (same)
#
#   xp/xc/xn_ref : (1, TH, W, C)  previous / current / next H-tile of the input
#   w0_ref  : (9, C, C)   dense weight[tap, cin, cout],  b0_ref : (1, C)
#   dwK_ref : (9, C)      depthwise weight[tap, c],      dbK_ref: (1, C)
#   pwK_ref : (C, C)      pointwise weight[cin, cout],   pbK_ref: (1, C)
#   o_ref   : (1, TH, W, C)
#   pad_ref : (TH+6, W+2, C) f32 VMEM scratch, reused as the zero-padded input
#             of every layer.
# ---------------------------------------------------------------------------
def deephead_fused_kernel(xp_ref, xc_ref, xn_ref,
                          w0_ref, b0_ref,
                          dw1_ref, db1_ref, pw1_ref, pb1_ref,
                          dw2_ref, db2_ref, pw2_ref, pb2_ref,
                          o_ref, pad_ref):
    _, TH, W, C = o_ref.shape
    h = pl.program_id(1)
    nh = pl.num_programs(1)
    f32 = jnp.float32

    # ---- stage 0: zero-padded layer-0 input --------------------------------
    # pad_ref row r  <-> image row  h*TH - 3 + r     (rows 0..TH+5)
    # pad_ref col c  <-> image col  c - 1            (cols 0..W+1)
    pad_ref[...] = jnp.zeros_like(pad_ref)
    pad_ref[3:TH + 3, 1:W + 1, :] = xc_ref[0].astype(f32)

    @pl.when(h > 0)
    def _():  # bottom 3 rows of the tile above
        pad_ref[0:3, 1:W + 1, :] = xp_ref[0, TH - 3:TH, :, :].astype(f32)

    @pl.when(h < nh - 1)
    def _():  # top 3 rows of the tile below
        pad_ref[TH + 3:TH + 6, 1:W + 1, :] = xn_ref[0, 0:3, :, :].astype(f32)

    # ---- conv helpers: dx (sublane) shift hoisted out of the tap loop ------
    def conv3x3_dense(xpad, w9, nrows):
        # xpad: (nrows+2, W+2, C), w9: (9, C, C)
        acc = jnp.zeros((nrows, W, C), f32)
        for dx in range(3):
            xs = xpad[:, dx:dx + W, :]                     # 1 W-shift per dx
            for dy in range(3):
                acc = acc + lax.dot_general(
                    xs[dy:dy + nrows, :, :], w9[dy * 3 + dx],
                    dimension_numbers=(((2,), (0,)), ((), ())),
                    preferred_element_type=f32)
        return acc

    def conv3x3_depthwise(xpad, dw9, nrows):
        # xpad: (nrows+2, W+2, C), dw9: (9, C)
        acc = jnp.zeros((nrows, W, C), f32)
        for dx in range(3):
            xs = xpad[:, dx:dx + W, :]
            for dy in range(3):
                acc = acc + xs[dy:dy + nrows, :, :] * dw9[dy * 3 + dx][None, None, :]
        return acc

    def sep_layer(xpad, dw_ref, db_ref, pw_ref, pb_ref, nrows):
        dw = dw_ref[...].astype(f32)
        y = conv3x3_depthwise(xpad, dw, nrows)
        y = y + db_ref[0].astype(f32)[None, None, :]
        y = lax.dot_general(y, pw_ref[...].astype(f32),
                            dimension_numbers=(((2,), (0,)), ((), ())),
                            preferred_element_type=f32)
        return jnp.maximum(y + pb_ref[0].astype(f32)[None, None, :], 0.0)

    # ---- layer 0: dense 3x3 + bias + ReLU  (valid rows R0-2 .. R0+TH+1) ----
    x0 = pad_ref[...]
    w0 = w0_ref[...].astype(f32)
    y0 = conv3x3_dense(x0, w0, TH + 4) + b0_ref[0].astype(f32)[None, None, :]
    y0 = jnp.maximum(y0, 0.0)

    # Write back into the (still W-zero-padded) scratch.  Rows that fall
    # outside the real image must be ZERO (the next conv pads with zeros, not
    # with relu(bias) of a fictitious row).
    pad_ref[0:TH + 4, 1:W + 1, :] = y0

    @pl.when(h == 0)
    def _():
        pad_ref[0:2, 1:W + 1, :] = jnp.zeros((2, W, C), f32)

    @pl.when(h == nh - 1)
    def _():
        pad_ref[TH + 2:TH + 4, 1:W + 1, :] = jnp.zeros((2, W, C), f32)

    # ---- layer 1: dw 3x3 + 1x1 + ReLU   (valid rows R0-1 .. R0+TH) ---------
    y1 = sep_layer(pad_ref[0:TH + 4, :, :], dw1_ref, db1_ref, pw1_ref, pb1_ref,
                   TH + 2)
    pad_ref[0:TH + 2, 1:W + 1, :] = y1

    @pl.when(h == 0)
    def _():
        pad_ref[0:1, 1:W + 1, :] = jnp.zeros((1, W, C), f32)

    @pl.when(h == nh - 1)
    def _():
        pad_ref[TH + 1:TH + 2, 1:W + 1, :] = jnp.zeros((1, W, C), f32)

    # ---- layer 2: dw 3x3 + 1x1 + ReLU   (exactly the TH output rows) -------
    y2 = sep_layer(pad_ref[0:TH + 2, :, :], dw2_ref, db2_ref, pw2_ref, pb2_ref,
                   TH)
    o_ref[0] = y2.astype(o_ref.dtype)


# ---------------------------------------------------------------------------
# Wrapper: one fused pallas_call over grid (N, H/TH), NHWC end-to-end.
# ---------------------------------------------------------------------------
def deephead_forward_nhwc(x, params, tile_h=8):
    """x: (N, H, W, C) NHWC.  params: init_deephead_params(...) with 3 layers."""
    assert len(params) == 3 and params[0][0] == "dense" and params[1][0] == "sep"
    N, H, W, C = x.shape

    # Tile height: needs TH >= 3 (3-row fused halo) and H % TH == 0, otherwise
    # fall back to whole-image tiles.  VMEM per step ~ (TH+6)*(W+2)*C*4B scratch
    # + double-buffered (TH,W,C) in/out blocks: size TH so this stays well under
    # the 64 MiB v7x budget when W/C grow.
    TH = tile_h if (tile_h >= 3 and H % tile_h == 0) else H
    nh = H // TH

    w0, b0 = params[0][1]
    dw1, db1, pw1, pb1 = params[1][1]
    dw2, db2, pw2, pb2 = params[2][1]

    x_blk = (1, TH, W, C)
    x_prev = pl.BlockSpec(x_blk, lambda n, h: (n, jnp.maximum(h - 1, 0), 0, 0))
    x_cur = pl.BlockSpec(x_blk, lambda n, h: (n, h, 0, 0))
    x_next = pl.BlockSpec(x_blk, lambda n, h: (n, jnp.minimum(h + 1, nh - 1), 0, 0))

    # Grid-invariant parameter blocks: block index never changes, so Pallas
    # fetches them once (a few hundred bytes each).
    w9_spec = pl.BlockSpec((9, C, C), lambda n, h: (0, 0, 0))
    vec_spec = pl.BlockSpec((1, C), lambda n, h: (0, 0))
    dw_spec = pl.BlockSpec((9, C), lambda n, h: (0, 0))
    pw_spec = pl.BlockSpec((C, C), lambda n, h: (0, 0))

    return pl.pallas_call(
        deephead_fused_kernel,
        out_shape=jax.ShapeDtypeStruct((N, H, W, C), x.dtype),
        grid_spec=pltpu.PrefetchScalarGridSpec(
            num_scalar_prefetch=0,
            grid=(N, nh),
            in_specs=[x_prev, x_cur, x_next,
                      w9_spec, vec_spec,
                      dw_spec, vec_spec, pw_spec, vec_spec,
                      dw_spec, vec_spec, pw_spec, vec_spec],
            out_specs=pl.BlockSpec(x_blk, lambda n, h: (n, h, 0, 0)),
            scratch_shapes=[pltpu.VMEM((TH + 6, W + 2, C), jnp.float32)],
        ),
        compiler_params=pltpu.CompilerParams(
            dimension_semantics=("parallel", "parallel"),
            vmem_limit_bytes=32 * 1024 * 1024),
    )(x, x, x, w0, b0, dw1, db1, pw1, pb1, dw2, db2, pw2, pb2)


def deephead_forward(x_nchw, params, tile_h=8):
    """PyTorch-interface wrapper: (N, C, H, W) -> (N, C, H, W).

    Prefer deephead_forward_nhwc end-to-end; these two transposes exist only to
    match the original NCHW module interface.
    """
    x = jnp.transpose(x_nchw, (0, 2, 3, 1))          # NCHW -> NHWC
    y = deephead_forward_nhwc(x, params, tile_h=tile_h)
    return jnp.transpose(y, (0, 3, 1, 2))            # NHWC -> NCHW


# ---------------------------------------------------------------------------
# Parameters (deterministic synthetic init, PyTorch-like small uniform)
# ---------------------------------------------------------------------------
def init_deephead_params(key, channels, stack_convs=3):
    params = []
    for i in range(stack_convs):
        key, k1, k2, k3, k4 = jax.random.split(key, 5)
        if i == 0:
            fan_in = channels * 9
            bound = 1.0 / jnp.sqrt(fan_in)
            w = jax.random.uniform(k1, (9, channels, channels), jnp.float32,
                                   -bound, bound)
            b = jax.random.uniform(k2, (1, channels), jnp.float32, -bound, bound)
            params.append(("dense", (w, b)))
        else:
            bound_dw = 1.0 / jnp.sqrt(9.0)
            dw = jax.random.uniform(k1, (9, channels), jnp.float32,
                                    -bound_dw, bound_dw)
            db = jax.random.uniform(k2, (1, channels), jnp.float32,
                                    -bound_dw, bound_dw)
            bound_pw = 1.0 / jnp.sqrt(float(channels))
            pw = jax.random.uniform(k3, (channels, channels), jnp.float32,
                                    -bound_pw, bound_pw)
            pb = jax.random.uniform(k4, (1, channels), jnp.float32,
                                    -bound_pw, bound_pw)
            params.append(("sep", (dw, db, pw, pb)))
    return params


# ---------------------------------------------------------------------------
# Pure-JAX reference (lax.conv) for correctness check
# ---------------------------------------------------------------------------
def deephead_reference(x_nchw, params):
    x = jnp.transpose(x_nchw, (0, 2, 3, 1)).astype(jnp.float32)  # NHWC
    C = x.shape[-1]
    dn = lax.conv_dimension_numbers(x.shape, (3, 3, C, C),
                                    ("NHWC", "HWIO", "NHWC"))
    for kind, p in params:
        if kind == "dense":
            w, b = p
            w_hwio = w.reshape(3, 3, C, C)
            x = lax.conv_general_dilated(x, w_hwio, (1, 1), ((1, 1), (1, 1)),
                                         dimension_numbers=dn)
            x = jax.nn.relu(x + b[0][None, None, None, :])
        else:
            dw, db, pw, pb = p
            dw_hwio = dw.reshape(3, 3, C)[:, :, None, :]   # (3,3,1,C)
            y = lax.conv_general_dilated(x, dw_hwio, (1, 1), ((1, 1), (1, 1)),
                                         dimension_numbers=dn,
                                         feature_group_count=C)
            y = y + db[0][None, None, None, :]
            y = jnp.einsum("nhwc,cd->nhwd", y, pw) + pb[0][None, None, None, :]
            x = jax.nn.relu(y)
    return jnp.transpose(x, (0, 3, 1, 2))


if __name__ == "__main__":
    key = jax.random.PRNGKey(0)
    k_x, k_p = jax.random.split(key)

    N, C, H, W = 2, 4, 16, 16          # small, NCHW as in the PyTorch module
    x = jax.random.normal(k_x, (N, C, H, W), jnp.float32)
    params = init_deephead_params(k_p, C, stack_convs=3)

    # tile_h=8 -> two H-tiles per image, so the fused halo path is exercised.
    out = jax.block_until_ready(deephead_forward(x, params, tile_h=8))

    ref = jax.block_until_ready(deephead_reference(x, params))
    assert out.shape == (N, C, H, W)
    err = jnp.max(jnp.abs(out - ref))
    assert jnp.allclose(out, ref, atol=1e-4, rtol=1e-4), f"max abs err {err}"

    print("KERNEL_OK")
</pallas_src>

<mosaic_0001>
module attributes {stable_mosaic.version = 11 : i64} {
  func.func @deephead_fused_kernel(%arg0: i32, %arg1: i32, %arg2: memref<1x8x16x4xf32, #tpu.memory_space<vmem>>, %arg3: memref<1x8x16x4xf32, #tpu.memory_space<vmem>>, %arg4: memref<1x8x16x4xf32, #tpu.memory_space<vmem>>, %arg5: memref<9x4x4xf32, #tpu.memory_space<vmem>>, %arg6: memref<1x4xf32, #tpu.memory_space<vmem>>, %arg7: memref<9x4xf32, #tpu.memory_space<vmem>>, %arg8: memref<1x4xf32, #tpu.memory_space<vmem>>, %arg9: memref<4x4xf32, #tpu.memory_space<vmem>>, %arg10: memref<1x4xf32, #tpu.memory_space<vmem>>, %arg11: memref<9x4xf32, #tpu.memory_space<vmem>>, %arg12: memref<1x4xf32, #tpu.memory_space<vmem>>, %arg13: memref<4x4xf32, #tpu.memory_space<vmem>>, %arg14: memref<1x4xf32, #tpu.memory_space<vmem>>, %arg15: memref<1x8x16x4xf32, #tpu.memory_space<vmem>>, %arg16: memref<14x18x4xf32, #tpu.memory_space<vmem>>) attributes {dimension_semantics = [#tpu.dimension_semantics<parallel>, #tpu.dimension_semantics<parallel>], iteration_bounds = array<i64: 2, 2>, scalar_prefetch = 0 : i64, scratch_operands = 1 : i64, tpu.core_type = #tpu.core_type<tc>, window_params = [{transform_indices = @transform_0, window_bounds = array<i64: 1, 8, 16, 4>}, {transform_indices = @transform_1, window_bounds = array<i64: 1, 8, 16, 4>}, {transform_indices = @transform_2, window_bounds = array<i64: 1, 8, 16, 4>}, {pipeline_mode = #tpu.pipeline_mode<synchronous>, transform_indices = @transform_3, window_bounds = array<i64: 9, 4, 4>}, {pipeline_mode = #tpu.pipeline_mode<synchronous>, transform_indices = @transform_4, window_bounds = array<i64: 1, 4>}, {pipeline_mode = #tpu.pipeline_mode<synchronous>, transform_indices = @transform_5, window_bounds = array<i64: 9, 4>}, {pipeline_mode = #tpu.pipeline_mode<synchronous>, transform_indices = @transform_6, window_bounds = array<i64: 1, 4>}, {pipeline_mode = #tpu.pipeline_mode<synchronous>, transform_indices = @transform_7, window_bounds = array<i64: 4, 4>}, {pipeline_mode = #tpu.pipeline_mode<synchronous>, transform_indices = @transform_8, window_bounds = array<i64: 1, 4>}, {pipeline_mode = #tpu.pipeline_mode<synchronous>, transform_indices = @transform_9, window_bounds = array<i64: 9, 4>}, {pipeline_mode = #tpu.pipeline_mode<synchronous>, transform_indices = @transform_10, window_bounds = array<i64: 1, 4>}, {pipeline_mode = #tpu.pipeline_mode<synchronous>, transform_indices = @transform_11, window_bounds = array<i64: 4, 4>}, {pipeline_mode = #tpu.pipeline_mode<synchronous>, transform_indices = @transform_12, window_bounds = array<i64: 1, 4>}, {transform_indices = @transform_13, window_bounds = array<i64: 1, 8, 16, 4>}]} {
    %cst = arith.constant 0.000000e+00 : f32
    %0 = vector.broadcast %cst : f32 to vector<14x18x4xf32>
    %c0 = arith.constant 0 : index
    %c0_0 = arith.constant 0 : index
    %c0_1 = arith.constant 0 : index
    %1 = vector.load %arg16[%c0, %c0_0, %c0_1] : memref<14x18x4xf32, #tpu.memory_space<vmem>>, vector<14x18x4xf32>
    tpu.vector_store %arg16[%c0, %c0_0, %c0_1], %0 {strides = array<i32>} : memref<14x18x4xf32, #tpu.memory_space<vmem>>, vector<14x18x4xf32>,
    %c0_2 = arith.constant 0 : index
    %c0_3 = arith.constant 0 : index
    %c0_4 = arith.constant 0 : index
    %c0_5 = arith.constant 0 : index
    %2 = vector.load %arg3[%c0_2, %c0_3, %c0_4, %c0_5] : memref<1x8x16x4xf32, #tpu.memory_space<vmem>>, vector<1x8x16x4xf32>
    %3 = vector.shape_cast %2 : vector<1x8x16x4xf32> to vector<8x16x4xf32>
    %c3 = arith.constant 3 : index
    %c1 = arith.constant 1 : index
    %c0_6 = arith.constant 0 : index
    %4 = vector.load %arg16[%c3, %c1, %c0_6] : memref<14x18x4xf32, #tpu.memory_space<vmem>>, vector<8x16x4xf32>
    tpu.vector_store %arg16[%c3, %c1, %c0_6], %3 {strides = array<i32>} : memref<14x18x4xf32, #tpu.memory_space<vmem>>, vector<8x16x4xf32>,
    %c0_i32 = arith.constant 0 : i32
    %5 = arith.cmpi sgt, %arg1, %c0_i32 : i32
    %6 = arith.extui %5 : i1 to i32
    %c0_i32_7 = arith.constant 0 : i32
    %7 = arith.cmpi ne, %6, %c0_i32_7 : i32
    scf.if %7 {
      %c0_74 = arith.constant 0 : index
      %c5 = arith.constant 5 : index
      %c0_75 = arith.constant 0 : index
      %c0_76 = arith.constant 0 : index
      %252 = vector.load %arg2[%c0_74, %c5, %c0_75, %c0_76] : memref<1x8x16x4xf32, #tpu.memory_space<vmem>>, vector<1x3x16x4xf32>
      %253 = vector.shape_cast %252 : vector<1x3x16x4xf32> to vector<3x16x4xf32>
      %c0_77 = arith.constant 0 : index
      %c1_78 = arith.constant 1 : index
      %c0_79 = arith.constant 0 : index
      %254 = vector.load %arg16[%c0_77, %c1_78, %c0_79] : memref<14x18x4xf32, #tpu.memory_space<vmem>>, vector<3x16x4xf32>
      tpu.vector_store %arg16[%c0_77, %c1_78, %c0_79], %253 {strides = array<i32>} : memref<14x18x4xf32, #tpu.memory_space<vmem>>, vector<3x16x4xf32>,
    } else {
    }
    %c1_i32 = arith.constant 1 : i32
    %8 = arith.cmpi slt, %arg1, %c1_i32 : i32
    %9 = arith.extui %8 : i1 to i32
    %c0_i32_8 = arith.constant 0 : i32
    %10 = arith.cmpi ne, %9, %c0_i32_8 : i32
    scf.if %10 {
      %c0_74 = arith.constant 0 : index
      %c0_75 = arith.constant 0 : index
      %c0_76 = arith.constant 0 : index
      %c0_77 = arith.constant 0 : index
      %252 = vector.load %arg4[%c0_74, %c0_75, %c0_76, %c0_77] : memref<1x8x16x4xf32, #tpu.memory_space<vmem>>, vector<1x3x16x4xf32>
      %253 = vector.shape_cast %252 : vector<1x3x16x4xf32> to vector<3x16x4xf32>
      %c11 = arith.constant 11 : index
      %c1_78 = arith.constant 1 : index
      %c0_79 = arith.constant 0 : index
      %254 = vector.load %arg16[%c11, %c1_78, %c0_79] : memref<14x18x4xf32, #tpu.memory_space<vmem>>, vector<3x16x4xf32>
      tpu.vector_store %arg16[%c11, %c1_78, %c0_79], %253 {strides = array<i32>} : memref<14x18x4xf32, #tpu.memory_space<vmem>>, vector<3x16x4xf32>,
    } else {
    }
    %c0_9 = arith.constant 0 : index
    %c0_10 = arith.constant 0 : index
    %c0_11 = arith.constant 0 : index
    %11 = vector.load %arg16[%c0_9, %c0_10, %c0_11] : memref<14x18x4xf32, #tpu.memory_space<vmem>>, vector<14x18x4xf32>
    %c0_12 = arith.constant 0 : index
    %c0_13 = arith.constant 0 : index
    %c0_14 = arith.constant 0 : index
    %12 = vector.load %arg5[%c0_12, %c0_13, %c0_14] : memref<9x4x4xf32, #tpu.memory_space<vmem>>, vector<9x4x4xf32>
    %cst_15 = arith.constant 0.000000e+00 : f32
    %13 = vector.broadcast %cst_15 : f32 to vector<12x16x4xf32>
    %14 = vector.extract_strided_slice %11 {offsets = [0, 0, 0], sizes = [14, 16, 4], strides = [1, 1, 1]} : vector<14x18x4xf32> to vector<14x16x4xf32>
    %15 = vector.extract_strided_slice %14 {offsets = [0, 0, 0], sizes = [12, 16, 4], strides = [1, 1, 1]} : vector<14x16x4xf32> to vector<12x16x4xf32>
    %16 = vector.extract_strided_slice %12 {offsets = [0, 0, 0], sizes = [1, 4, 4], strides = [1, 1, 1]} : vector<9x4x4xf32> to vector<1x4x4xf32>
    %17 = vector.shape_cast %16 : vector<1x4x4xf32> to vector<4x4xf32>
    %cst_16 = arith.constant dense<0.000000e+00> : vector<12x16x4xf32>
    %18 = tpu.matmul %15, %17, %cst_16 {dimension_numbers = #tpu.dot_dimension_numbers<[2], [0], [0, 1], [1], [0, 0, 0, 1, 1, 1], [], []>} : vector<12x16x4xf32>, vector<4x4xf32>, vector<12x16x4xf32> -> vector<12x16x4xf32>
    %19 = arith.addf %13, %18 : vector<12x16x4xf32>
    %20 = vector.extract_strided_slice %14 {offsets = [1, 0, 0], sizes = [12, 16, 4], strides = [1, 1, 1]} : vector<14x16x4xf32> to vector<12x16x4xf32>
    %21 = vector.extract_strided_slice %12 {offsets = [3, 0, 0], sizes = [1, 4, 4], strides = [1, 1, 1]} : vector<9x4x4xf32> to vector<1x4x4xf32>
    %22 = vector.shape_cast %21 : vector<1x4x4xf32> to vector<4x4xf32>
    %cst_17 = arith.constant dense<0.000000e+00> : vector<12x16x4xf32>
    %23 = tpu.matmul %20, %22, %cst_17 {dimension_numbers = #tpu.dot_dimension_numbers<[2], [0], [0, 1], [1], [0, 0, 0, 1, 1, 1], [], []>} : vector<12x16x4xf32>, vector<4x4xf32>, vector<12x16x4xf32> -> vector<12x16x4xf32>
    %24 = arith.addf %19, %23 : vector<12x16x4xf32>
    %25 = vector.extract_strided_slice %14 {offsets = [2, 0, 0], sizes = [12, 16, 4], strides = [1, 1, 1]} : vector<14x16x4xf32> to vector<12x16x4xf32>
    %26 = vector.extract_strided_slice %12 {offsets = [6, 0, 0], sizes = [1, 4, 4], strides = [1, 1, 1]} : vector<9x4x4xf32> to vector<1x4x4xf32>
    %27 = vector.shape_cast %26 : vector<1x4x4xf32> to vector<4x4xf32>
    %cst_18 = arith.constant dense<0.000000e+00> : vector<12x16x4xf32>
    %28 = tpu.matmul %25, %27, %cst_18 {dimension_numbers = #tpu.dot_dimension_numbers<[2], [0], [0, 1], [1], [0, 0, 0, 1, 1, 1], [], []>} : vector<12x16x4xf32>, vector<4x4xf32>, vector<12x16x4xf32> -> vector<12x16x4xf32>
    %29 = arith.addf %24, %28 : vector<12x16x4xf32>
    %30 = vector.extract_strided_slice %11 {offsets = [0, 1, 0], sizes = [14, 16, 4], strides = [1, 1, 1]} : vector<14x18x4xf32> to vector<14x16x4xf32>
    %31 = vector.extract_strided_slice %30 {offsets = [0, 0, 0], sizes = [12, 16, 4], strides = [1, 1, 1]} : vector<14x16x4xf32> to vector<12x16x4xf32>
    %32 = vector.extract_strided_slice %12 {offsets = [1, 0, 0], sizes = [1, 4, 4], strides = [1, 1, 1]} : vector<9x4x4xf32> to vector<1x4x4xf32>
    %33 = vector.shape_cast %32 : vector<1x4x4xf32> to vector<4x4xf32>
    %cst_19 = arith.constant dense<0.000000e+00> : vector<12x16x4xf32>
    %34 = tpu.matmul %31, %33, %cst_19 {dimension_numbers = #tpu.dot_dimension_numbers<[2], [0], [0, 1], [1], [0, 0, 0, 1, 1, 1], [], []>} : vector<12x16x4xf32>, vector<4x4xf32>, vector<12x16x4xf32> -> vector<12x16x4xf32>
    %35 = arith.addf %29, %34 : vector<12x16x4xf32>
    %36 = vector.extract_strided_slice %30 {offsets = [1, 0, 0], sizes = [12, 16, 4], strides = [1, 1, 1]} : vector<14x16x4xf32> to vector<12x16x4xf32>
    %37 = vector.extract_strided_slice %12 {offsets = [4, 0, 0], sizes = [1, 4, 4], strides = [1, 1, 1]} : vector<9x4x4xf32> to vector<1x4x4xf32>
    %38 = vector.shape_cast %37 : vector<1x4x4xf32> to vector<4x4xf32>
    %cst_20 = arith.constant dense<0.000000e+00> : vector<12x16x4xf32>
    %39 = tpu.matmul %36, %38, %cst_20 {dimension_numbers = #tpu.dot_dimension_numbers<[2], [0], [0, 1], [1], [0, 0, 0, 1, 1, 1], [], []>} : vector<12x16x4xf32>, vector<4x4xf32>, vector<12x16x4xf32> -> vector<12x16x4xf32>
    %40 = arith.addf %35, %39 : vector<12x16x4xf32>
    %41 = vector.extract_strided_slice %30 {offsets = [2, 0, 0], sizes = [12, 16, 4], strides = [1, 1, 1]} : vector<14x16x4xf32> to vector<12x16x4xf32>
    %42 = vector.extract_strided_slice %12 {offsets = [7, 0, 0], sizes = [1, 4, 4], strides = [1, 1, 1]} : vector<9x4x4xf32> to vector<1x4x4xf32>
    %43 = vector.shape_cast %42 : vector<1x4x4xf32> to vector<4x4xf32>
    %cst_21 = arith.constant dense<0.000000e+00> : vector<12x16x4xf32>
    %44 = tpu.matmul %41, %43, %cst_21 {dimension_numbers = #tpu.dot_dimension_numbers<[2], [0], [0, 1], [1], [0, 0, 0, 1, 1, 1], [], []>} : vector<12x16x4xf32>, vector<4x4xf32>, vector<12x16x4xf32> -> vector<12x16x4xf32>
    %45 = arith.addf %40, %44 : vector<12x16x4xf32>
    %46 = vector.extract_strided_slice %11 {offsets = [0, 2, 0], sizes = [14, 16, 4], strides = [1, 1, 1]} : vector<14x18x4xf32> to vector<14x16x4xf32>
    %47 = vector.extract_strided_slice %46 {offsets = [0, 0, 0], sizes = [12, 16, 4], strides = [1, 1, 1]} : vector<14x16x4xf32> to vector<12x16x4xf32>
    %48 = vector.extract_strided_slice %12 {offsets = [2, 0, 0], sizes = [1, 4, 4], strides = [1, 1, 1]} : vector<9x4x4xf32> to vector<1x4x4xf32>
    %49 = vector.shape_cast %48 : vector<1x4x4xf32> to vector<4x4xf32>
    %cst_22 = arith.constant dense<0.000000e+00> : vector<12x16x4xf32>
    %50 = tpu.matmul %47, %49, %cst_22 {dimension_numbers = #tpu.dot_dimension_numbers<[2], [0], [0, 1], [1], [0, 0, 0, 1, 1, 1], [], []>} : vector<12x16x4xf32>, vector<4x4xf32>, vector<12x16x4xf32> -> vector<12x16x4xf32>
    %51 = arith.addf %45, %50 : vector<12x16x4xf32>
    %52 = vector.extract_strided_slice %46 {offsets = [1, 0, 0], sizes = [12, 16, 4], strides = [1, 1, 1]} : vector<14x16x4xf32> to vector<12x16x4xf32>
    %53 = vector.extract_strided_slice %12 {offsets = [5, 0, 0], sizes = [1, 4, 4], strides = [1, 1, 1]} : vector<9x4x4xf32> to vector<1x4x4xf32>
    %54 = vector.shape_cast %53 : vector<1x4x4xf32> to vector<4x4xf32>
    %cst_23 = arith.constant dense<0.000000e+00> : vector<12x16x4xf32>
    %55 = tpu.matmul %52, %54, %cst_23 {dimension_numbers = #tpu.dot_dimension_numbers<[2], [0], [0, 1], [1], [0, 0, 0, 1, 1, 1], [], []>} : vector<12x16x4xf32>, vector<4x4xf32>, vector<12x16x4xf32> -> vector<12x16x4xf32>
    %56 = arith.addf %51, %55 : vector<12x16x4xf32>
    %57 = vector.extract_strided_slice %46 {offsets = [2, 0, 0], sizes = [12, 16, 4], strides = [1, 1, 1]} : vector<14x16x4xf32> to vector<12x16x4xf32>
    %58 = vector.extract_strided_slice %12 {offsets = [8, 0, 0], sizes = [1, 4, 4], strides = [1, 1, 1]} : vector<9x4x4xf32> to vector<1x4x4xf32>
    %59 = vector.shape_cast %58 : vector<1x4x4xf32> to vector<4x4xf32>
    %cst_24 = arith.constant dense<0.000000e+00> : vector<12x16x4xf32>
    %60 = tpu.matmul %57, %59, %cst_24 {dimension_numbers = #tpu.dot_dimension_numbers<[2], [0], [0, 1], [1], [0, 0, 0, 1, 1, 1], [], []>} : vector<12x16x4xf32>, vector<4x4xf32>, vector<12x16x4xf32> -> vector<12x16x4xf32>
    %61 = arith.addf %56, %60 : vector<12x16x4xf32>
    %c0_25 = arith.constant 0 : index
    %c0_26 = arith.constant 0 : index
    %62 = vector.load %arg6[%c0_25, %c0_26] : memref<1x4xf32, #tpu.memory_space<vmem>>, vector<1x4xf32>
    %63 = vector.shape_cast %62 : vector<1x4xf32> to vector<4xf32>
    %64 = vector.shape_cast %63 : vector<4xf32> to vector<1x1x4xf32>
    %65 = vector.broadcast %64 : vector<1x1x4xf32> to vector<12x16x4xf32>
    %66 = arith.addf %61, %65 : vector<12x16x4xf32>
    %cst_27 = arith.constant 0.000000e+00 : f32
    %67 = vector.broadcast %cst_27 : f32 to vector<12x16x4xf32>
    %68 = arith.maximumf %66, %67 : vector<12x16x4xf32>
    %c0_28 = arith.constant 0 : index
    %c1_29 = arith.constant 1 : index
    %c0_30 = arith.constant 0 : index
    %69 = vector.load %arg16[%c0_28, %c1_29, %c0_30] : memref<14x18x4xf32, #tpu.memory_space<vmem>>, vector<12x16x4xf32>
    tpu.vector_store %arg16[%c0_28, %c1_29, %c0_30], %68 {strides = array<i32>} : memref<14x18x4xf32, #tpu.memory_space<vmem>>, vector<12x16x4xf32>,
    %c0_i32_31 = arith.constant 0 : i32
    %70 = arith.cmpi eq, %arg1, %c0_i32_31 : i32
    %71 = arith.extui %70 : i1 to i32
    %c0_i32_32 = arith.constant 0 : i32
    %72 = arith.cmpi ne, %71, %c0_i32_32 : i32
    scf.if %72 {
      %cst_74 = arith.constant 0.000000e+00 : f32
      %252 = vector.broadcast %cst_74 : f32 to vector<2x16x4xf32>
      %c0_75 = arith.constant 0 : index
      %c1_76 = arith.constant 1 : index
      %c0_77 = arith.constant 0 : index
      %253 = vector.load %arg16[%c0_75, %c1_76, %c0_77] : memref<14x18x4xf32, #tpu.memory_space<vmem>>, vector<2x16x4xf32>
      tpu.vector_store %arg16[%c0_75, %c1_76, %c0_77], %252 {strides = array<i32>} : memref<14x18x4xf32, #tpu.memory_space<vmem>>, vector<2x16x4xf32>,
    } else {
    }
    %c1_i32_33 = arith.constant 1 : i32
    %73 = arith.cmpi eq, %arg1, %c1_i32_33 : i32
    %74 = arith.extui %73 : i1 to i32
    %c0_i32_34 = arith.constant 0 : i32
    %75 = arith.cmpi ne, %74, %c0_i32_34 : i32
    scf.if %75 {
      %cst_74 = arith.constant 0.000000e+00 : f32
      %252 = vector.broadcast %cst_74 : f32 to vector<2x16x4xf32>
      %c10 = arith.constant 10 : index
      %c1_75 = arith.constant 1 : index
      %c0_76 = arith.constant 0 : index
      %253 = vector.load %arg16[%c10, %c1_75, %c0_76] : memref<14x18x4xf32, #tpu.memory_space<vmem>>, vector<2x16x4xf32>
      tpu.vector_store %arg16[%c10, %c1_75, %c0_76], %252 {strides = array<i32>} : memref<14x18x4xf32, #tpu.memory_space<vmem>>, vector<2x16x4xf32>,
    } else {
    }
    %c0_35 = arith.constant 0 : index
    %c0_36 = arith.constant 0 : index
    %c0_37 = arith.constant 0 : index
    %76 = vector.load %arg16[%c0_35, %c0_36, %c0_37] : memref<14x18x4xf32, #tpu.memory_space<vmem>>, vector<12x18x4xf32>
    %c0_38 = arith.constant 0 : index
    %c0_39 = arith.constant 0 : index
    %77 = vector.load %arg7[%c0_38, %c0_39] : memref<9x4xf32, #tpu.memory_space<vmem>>, vector<9x4xf32>
    %cst_40 = arith.constant 0.000000e+00 : f32
    %78 = vector.broadcast %cst_40 : f32 to vector<10x16x4xf32>
    %79 = vector.extract_strided_slice %76 {offsets = [0, 0, 0], sizes = [12, 16, 4], strides = [1, 1, 1]} : vector<12x18x4xf32> to vector<12x16x4xf32>
    %80 = vector.extract_strided_slice %79 {offsets = [0, 0, 0], sizes = [10, 16, 4], strides = [1, 1, 1]} : vector<12x16x4xf32> to vector<10x16x4xf32>
    %81 = vector.extract_strided_slice %77 {offsets = [0, 0], sizes = [1, 4], strides = [1, 1]} : vector<9x4xf32> to vector<1x4xf32>
    %82 = vector.shape_cast %81 : vector<1x4xf32> to vector<4xf32>
    %83 = vector.shape_cast %82 : vector<4xf32> to vector<1x1x4xf32>
    %84 = vector.broadcast %83 : vector<1x1x4xf32> to vector<10x16x4xf32>
    %85 = arith.mulf %80, %84 : vector<10x16x4xf32>
    %86 = arith.addf %78, %85 : vector<10x16x4xf32>
    %87 = vector.extract_strided_slice %79 {offsets = [1, 0, 0], sizes = [10, 16, 4], strides = [1, 1, 1]} : vector<12x16x4xf32> to vector<10x16x4xf32>
    %88 = vector.extract_strided_slice %77 {offsets = [3, 0], sizes = [1, 4], strides = [1, 1]} : vector<9x4xf32> to vector<1x4xf32>
    %89 = vector.shape_cast %88 : vector<1x4xf32> to vector<4xf32>
    %90 = vector.shape_cast %89 : vector<4xf32> to vector<1x1x4xf32>
    %91 = vector.broadcast %90 : vector<1x1x4xf32> to vector<10x16x4xf32>
    %92 = arith.mulf %87, %91 : vector<10x16x4xf32>
    %93 = arith.addf %86, %92 : vector<10x16x4xf32>
    %94 = vector.extract_strided_slice %79 {offsets = [2, 0, 0], sizes = [10, 16, 4], strides = [1, 1, 1]} : vector<12x16x4xf32> to vector<10x16x4xf32>
    %95 = vector.extract_strided_slice %77 {offsets = [6, 0], sizes = [1, 4], strides = [1, 1]} : vector<9x4xf32> to vector<1x4xf32>
    %96 = vector.shape_cast %95 : vector<1x4xf32> to vector<4xf32>
    %97 = vector.shape_cast %96 : vector<4xf32> to vector<1x1x4xf32>
    %98 = vector.broadcast %97 : vector<1x1x4xf32> to vector<10x16x4xf32>
    %99 = arith.mulf %94, %98 : vector<10x16x4xf32>
    %100 = arith.addf %93, %99 : vector<10x16x4xf32>
    %101 = vector.extract_strided_slice %76 {offsets = [0, 1, 0], sizes = [12, 16, 4], strides = [1, 1, 1]} : vector<12x18x4xf32> to vector<12x16x4xf32>
    %102 = vector.extract_strided_slice %101 {offsets = [0, 0, 0], sizes = [10, 16, 4], strides = [1, 1, 1]} : vector<12x16x4xf32> to vector<10x16x4xf32>
    %103 = vector.extract_strided_slice %77 {offsets = [1, 0], sizes = [1, 4], strides = [1, 1]} : vector<9x4xf32> to vector<1x4xf32>
    %104 = vector.shape_cast %103 : vector<1x4xf32> to vector<4xf32>
    %105 = vector.shape_cast %104 : vector<4xf32> to vector<1x1x4xf32>
    %106 = vector.broadcast %105 : vector<1x1x4xf32> to vector<10x16x4xf32>
    %107 = arith.mulf %102, %106 : vector<10x16x4xf32>
    %108 = arith.addf %100, %107 : vector<10x16x4xf32>
    %109 = vector.extract_strided_slice %101 {offsets = [1, 0, 0], sizes = [10, 16, 4], strides = [1, 1, 1]} : vector<12x16x4xf32> to vector<10x16x4xf32>
    %110 = vector.extract_strided_slice %77 {offsets = [4, 0], sizes = [1, 4], strides = [1, 1]} : vector<9x4xf32> to vector<1x4xf32>
    %111 = vector.shape_cast %110 : vector<1x4xf32> to vector<4xf32>
    %112 = vector.shape_cast %111 : vector<4xf32> to vector<1x1x4xf32>
    %113 = vector.broadcast %112 : vector<1x1x4xf32> to vector<10x16x4xf32>
    %114 = arith.mulf %109, %113 : vector<10x16x4xf32>
    %115 = arith.addf %108, %114 : vector<10x16x4xf32>
    %116 = vector.extract_strided_slice %101 {offsets = [2, 0, 0], sizes = [10, 16, 4], strides = [1, 1, 1]} : vector<12x16x4xf32> to vector<10x16x4xf32>
    %117 = vector.extract_strided_slice %77 {offsets = [7, 0], sizes = [1, 4], strides = [1, 1]} : vector<9x4xf32> to vector<1x4xf32>
    %118 = vector.shape_cast %117 : vector<1x4xf32> to vector<4xf32>
    %119 = vector.shape_cast %118 : vector<4xf32> to vector<1x1x4xf32>
    %120 = vector.broadcast %119 : vector<1x1x4xf32> to vector<10x16x4xf32>
    %121 = arith.mulf %116, %120 : vector<10x16x4xf32>
    %122 = arith.addf %115, %121 : vector<10x16x4xf32>
    %123 = vector.extract_strided_slice %76 {offsets = [0, 2, 0], sizes = [12, 16, 4], strides = [1, 1, 1]} : vector<12x18x4xf32> to vector<12x16x4xf32>
    %124 = vector.extract_strided_slice %123 {offsets = [0, 0, 0], sizes = [10, 16, 4], strides = [1, 1, 1]} : vector<12x16x4xf32> to vector<10x16x4xf32>
    %125 = vector.extract_strided_slice %77 {offsets = [2, 0], sizes = [1, 4], strides = [1, 1]} : vector<9x4xf32> to vector<1x4xf32>
    %126 = vector.shape_cast %125 : vector<1x4xf32> to vector<4xf32>
    %127 = vector.shape_cast %126 : vector<4xf32> to vector<1x1x4xf32>
    %128 = vector.broadcast %127 : vector<1x1x4xf32> to vector<10x16x4xf32>
    %129 = arith.mulf %124, %128 : vector<10x16x4xf32>
    %130 = arith.addf %122, %129 : vector<10x16x4xf32>
    %131 = vector.extract_strided_slice %123 {offsets = [1, 0, 0], sizes = [10, 16, 4], strides = [1, 1, 1]} : vector<12x16x4xf32> to vector<10x16x4xf32>
    %132 = vector.extract_strided_slice %77 {offsets = [5, 0], sizes = [1, 4], strides = [1, 1]} : vector<9x4xf32> to vector<1x4xf32>
    %133 = vector.shape_cast %132 : vector<1x4xf32> to vector<4xf32>
    %134 = vector.shape_cast %133 : vector<4xf32> to vector<1x1x4xf32>
    %135 = vector.broadcast %134 : vector<1x1x4xf32> to vector<10x16x4xf32>
    %136 = arith.mulf %131, %135 : vector<10x16x4xf32>
    %137 = arith.addf %130, %136 : vector<10x16x4xf32>
    %138 = vector.extract_strided_slice %123 {offsets = [2, 0, 0], sizes = [10, 16, 4], strides = [1, 1, 1]} : vector<12x16x4xf32> to vector<10x16x4xf32>
    %139 = vector.extract_strided_slice %77 {offsets = [8, 0], sizes = [1, 4], strides = [1, 1]} : vector<9x4xf32> to vector<1x4xf32>
    %140 = vector.shape_cast %139 : vector<1x4xf32> to vector<4xf32>
    %141 = vector.shape_cast %140 : vector<4xf32> to vector<1x1x4xf32>
    %142 = vector.broadcast %141 : vector<1x1x4xf32> to vector<10x16x4xf32>
    %143 = arith.mulf %138, %142 : vector<10x16x4xf32>
    %144 = arith.addf %137, %143 : vector<10x16x4xf32>
    %c0_41 = arith.constant 0 : index
    %c0_42 = arith.constant 0 : index
    %145 = vector.load %arg8[%c0_41, %c0_42] : memref<1x4xf32, #tpu.memory_space<vmem>>, vector<1x4xf32>
    %146 = vector.shape_cast %145 : vector<1x4xf32> to vector<4xf32>
    %147 = vector.shape_cast %146 : vector<4xf32> to vector<1x1x4xf32>
    %148 = vector.broadcast %147 : vector<1x1x4xf32> to vector<10x16x4xf32>
    %149 = arith.addf %144, %148 : vector<10x16x4xf32>
    %c0_43 = arith.constant 0 : index
    %c0_44 = arith.constant 0 : index
    %150 = vector.load %arg9[%c0_43, %c0_44] : memref<4x4xf32, #tpu.memory_space<vmem>>, vector<4x4xf32>
    %cst_45 = arith.constant dense<0.000000e+00> : vector<10x16x4xf32>
    %151 = tpu.matmul %149, %150, %cst_45 {dimension_numbers = #tpu.dot_dimension_numbers<[2], [0], [0, 1], [1], [0, 0, 0, 1, 1, 1], [], []>} : vector<10x16x4xf32>, vector<4x4xf32>, vector<10x16x4xf32> -> vector<10x16x4xf32>
    %c0_46 = arith.constant 0 : index
    %c0_47 = arith.constant 0 : index
    %152 = vector.load %arg10[%c0_46, %c0_47] : memref<1x4xf32, #tpu.memory_space<vmem>>, vector<1x4xf32>
    %153 = vector.shape_cast %152 : vector<1x4xf32> to vector<4xf32>
    %154 = vector.shape_cast %153 : vector<4xf32> to vector<1x1x4xf32>
    %155 = vector.broadcast %154 : vector<1x1x4xf32> to vector<10x16x4xf32>
    %156 = arith.addf %151, %155 : vector<10x16x4xf32>
    %cst_48 = arith.constant 0.000000e+00 : f32
    %157 = vector.broadcast %cst_48 : f32 to vector<10x16x4xf32>
    %158 = arith.maximumf %156, %157 : vector<10x16x4xf32>
    %c0_49 = arith.constant 0 : index
    %c1_50 = arith.constant 1 : index
    %c0_51 = arith.constant 0 : index
    %159 = vector.load %arg16[%c0_49, %c1_50, %c0_51] : memref<14x18x4xf32, #tpu.memory_space<vmem>>, vector<10x16x4xf32>
    tpu.vector_store %arg16[%c0_49, %c1_50, %c0_51], %158 {strides = array<i32>} : memref<14x18x4xf32, #tpu.memory_space<vmem>>, vector<10x16x4xf32>,
    %c0_i32_52 = arith.constant 0 : i32
    %160 = arith.cmpi eq, %arg1, %c0_i32_52 : i32
    %161 = arith.extui %160 : i1 to i32
    %c0_i32_53 = arith.constant 0 : i32
    %162 = arith.cmpi ne, %161, %c0_i32_53 : i32
    scf.if %162 {
      %cst_74 = arith.constant 0.000000e+00 : f32
      %252 = vector.broadcast %cst_74 : f32 to vector<1x16x4xf32>
      %c0_75 = arith.constant 0 : index
      %c1_76 = arith.constant 1 : index
      %c0_77 = arith.constant 0 : index
      %253 = vector.load %arg16[%c0_75, %c1_76, %c0_77] : memref<14x18x4xf32, #tpu.memory_space<vmem>>, vector<1x16x4xf32>
      tpu.vector_store %arg16[%c0_75, %c1_76, %c0_77], %252 {strides = array<i32>} : memref<14x18x4xf32, #tpu.memory_space<vmem>>, vector<1x16x4xf32>,
    } else {
    }
    %c1_i32_54 = arith.constant 1 : i32
    %163 = arith.cmpi eq, %arg1, %c1_i32_54 : i32
    %164 = arith.extui %163 : i1 to i32
    %c0_i32_55 = arith.constant 0 : i32
    %165 = arith.cmpi ne, %164, %c0_i32_55 : i32
    scf.if %165 {
      %cst_74 = arith.constant 0.000000e+00 : f32
      %252 = vector.broadcast %cst_74 : f32 to vector<1x16x4xf32>
      %c9 = arith.constant 9 : index
      %c1_75 = arith.constant 1 : index
      %c0_76 = arith.constant 0 : index
      %253 = vector.load %arg16[%c9, %c1_75, %c0_76] : memref<14x18x4xf32, #tpu.memory_space<vmem>>, vector<1x16x4xf32>
      tpu.vector_store %arg16[%c9, %c1_75, %c0_76], %252 {strides = array<i32>} : memref<14x18x4xf32, #tpu.memory_space<vmem>>, vector<1x16x4xf32>,
    } else {
    }
    %c0_56 = arith.constant 0 : index
    %c0_57 = arith.constant 0 : index
    %c0_58 = arith.constant 0 : index
    %166 = vector.load %arg16[%c0_56, %c0_57, %c0_58] : memref<14x18x4xf32, #tpu.memory_space<vmem>>, vector<10x18x4xf32>
    %c0_59 = arith.constant 0 : index
    %c0_60 = arith.constant 0 : index
    %167 = vector.load %arg11[%c0_59, %c0_60] : memref<9x4xf32, #tpu.memory_space<vmem>>, vector<9x4xf32>
    %cst_61 = arith.constant 0.000000e+00 : f32
    %168 = vector.broadcast %cst_61 : f32 to vector<8x16x4xf32>
    %169 = vector.extract_strided_slice %166 {offsets = [0, 0, 0], sizes = [10, 16, 4], strides = [1, 1, 1]} : vector<10x18x4xf32> to vector<10x16x4xf32>
    %170 = vector.extract_strided_slice %169 {offsets = [0, 0, 0], sizes = [8, 16, 4], strides = [1, 1, 1]} : vector<10x16x4xf32> to vector<8x16x4xf32>
    %171 = vector.extract_strided_slice %167 {offsets = [0, 0], sizes = [1, 4], strides = [1, 1]} : vector<9x4xf32> to vector<1x4xf32>
    %172 = vector.shape_cast %171 : vector<1x4xf32> to vector<4xf32>
    %173 = vector.shape_cast %172 : vector<4xf32> to vector<1x1x4xf32>
    %174 = vector.broadcast %173 : vector<1x1x4xf32> to vector<8x16x4xf32>
    %175 = arith.mulf %170, %174 : vector<8x16x4xf32>
    %176 = arith.addf %168, %175 : vector<8x16x4xf32>
    %177 = vector.extract_strided_slice %169 {offsets = [1, 0, 0], sizes = [8, 16, 4], strides = [1, 1, 1]} : vector<10x16x4xf32> to vector<8x16x4xf32>
    %178 = vector.extract_strided_slice %167 {offsets = [3, 0], sizes = [1, 4], strides = [1, 1]} : vector<9x4xf32> to vector<1x4xf32>
    %179 = vector.shape_cast %178 : vector<1x4xf32> to vector<4xf32>
    %180 = vector.shape_cast %179 : vector<4xf32> to vector<1x1x4xf32>
    %181 = vector.broadcast %180 : vector<1x1x4xf32> to vector<8x16x4xf32>
    %182 = arith.mulf %177, %181 : vector<8x16x4xf32>
    %183 = arith.addf %176, %182 : vector<8x16x4xf32>
    %184 = vector.extract_strided_slice %169 {offsets = [2, 0, 0], sizes = [8, 16, 4], strides = [1, 1, 1]} : vector<10x16x4xf32> to vector<8x16x4xf32>
    %185 = vector.extract_strided_slice %167 {offsets = [6, 0], sizes = [1, 4], strides = [1, 1]} : vector<9x4xf32> to vector<1x4xf32>
    %186 = vector.shape_cast %185 : vector<1x4xf32> to vector<4xf32>
    %187 = vector.shape_cast %186 : vector<4xf32> to vector<1x1x4xf32>
    %188 = vector.broadcast %187 : vector<1x1x4xf32> to vector<8x16x4xf32>
    %189 = arith.mulf %184, %188 : vector<8x16x4xf32>
    %190 = arith.addf %183, %189 : vector<8x16x4xf32>
    %191 = vector.extract_strided_slice %166 {offsets = [0, 1, 0], sizes = [10, 16, 4], strides = [1, 1, 1]} : vector<10x18x4xf32> to vector<10x16x4xf32>
    %192 = vector.extract_strided_slice %191 {offsets = [0, 0, 0], sizes = [8, 16, 4], strides = [1, 1, 1]} : vector<10x16x4xf32> to vector<8x16x4xf32>
    %193 = vector.extract_strided_slice %167 {offsets = [1, 0], sizes = [1, 4], strides = [1, 1]} : vector<9x4xf32> to vector<1x4xf32>
    %194 = vector.shape_cast %193 : vector<1x4xf32> to vector<4xf32>
    %195 = vector.shape_cast %194 : vector<4xf32> to vector<1x1x4xf32>
    %196 = vector.broadcast %195 : vector<1x1x4xf32> to vector<8x16x4xf32>
    %197 = arith.mulf %192, %196 : vector<8x16x4xf32>
    %198 = arith.addf %190, %197 : vector<8x16x4xf32>
    %199 = vector.extract_strided_slice %191 {offsets = [1, 0, 0], sizes = [8, 16, 4], strides = [1, 1, 1]} : vector<10x16x4xf32> to vector<8x16x4xf32>
    %200 = vector.extract_strided_slice %167 {offsets = [4, 0], sizes = [1, 4], strides = [1, 1]} : vector<9x4xf32> to vector<1x4xf32>
    %201 = vector.shape_cast %200 : vector<1x4xf32> to vector<4xf32>
    %202 = vector.shape_cast %201 : vector<4xf32> to vector<1x1x4xf32>
    %203 = vector.broadcast %202 : vector<1x1x4xf32> to vector<8x16x4xf32>
    %204 = arith.mulf %199, %203 : vector<8x16x4xf32>
    %205 = arith.addf %198, %204 : vector<8x16x4xf32>
    %206 = vector.extract_strided_slice %191 {offsets = [2, 0, 0], sizes = [8, 16, 4], strides = [1, 1, 1]} : vector<10x16x4xf32> to vector<8x16x4xf32>
    %207 = vector.extract_strided_slice %167 {offsets = [7, 0], sizes = [1, 4], strides = [1, 1]} : vector<9x4xf32> to vector<1x4xf32>
    %208 = vector.shape_cast %207 : vector<1x4xf32> to vector<4xf32>
    %209 = vector.shape_cast %208 : vector<4xf32> to vector<1x1x4xf32>
    %210 = vector.broadcast %209 : vector<1x1x4xf32> to vector<8x16x4xf32>
    %211 = arith.mulf %206, %210 : vector<8x16x4xf32>
    %212 = arith.addf %205, %211 : vector<8x16x4xf32>
    %213 = vector.extract_strided_slice %166 {offsets = [0, 2, 0], sizes = [10, 16, 4], strides = [1, 1, 1]} : vector<10x18x4xf32> to vector<10x16x4xf32>
    %214 = vector.extract_strided_slice %213 {offsets = [0, 0, 0], sizes = [8, 16, 4], strides = [1, 1, 1]} : vector<10x16x4xf32> to vector<8x16x4xf32>
    %215 = vector.extract_strided_slice %167 {offsets = [2, 0], sizes = [1, 4], strides = [1, 1]} : vector<9x4xf32> to vector<1x4xf32>
    %216 = vector.shape_cast %215 : vector<1x4xf32> to vector<4xf32>
    %217 = vector.shape_cast %216 : vector<4xf32> to vector<1x1x4xf32>
    %218 = vector.broadcast %217 : vector<1x1x4xf32> to vector<8x16x4xf32>
    %219 = arith.mulf %214, %218 : vector<8x16x4xf32>
    %220 = arith.addf %212, %219 : vector<8x16x4xf32>
    %221 = vector.extract_strided_slice %213 {offsets = [1, 0, 0], sizes = [8, 16, 4], strides = [1, 1, 1]} : vector<10x16x4xf32> to vector<8x16x4xf32>
    %222 = vector.extract_strided_slice %167 {offsets = [5, 0], sizes = [1, 4], strides = [1, 1]} : vector<9x4xf32> to vector<1x4xf32>
    %223 = vector.shape_cast %222 : vector<1x4xf32> to vector<4xf32>
    %224 = vector.shape_cast %223 : vector<4xf32> to vector<1x1x4xf32>
    %225 = vector.broadcast %224 : vector<1x1x4xf32> to vector<8x16x4xf32>
    %226 = arith.mulf %221, %225 : vector<8x16x4xf32>
    %227 = arith.addf %220, %226 : vector<8x16x4xf32>
    %228 = vector.extract_strided_slice %213 {offsets = [2, 0, 0], sizes = [8, 16, 4], strides = [1, 1, 1]} : vector<10x16x4xf32> to vector<8x16x4xf32>
    %229 = vector.extract_strided_slice %167 {offsets = [8, 0], sizes = [1, 4], strides = [1, 1]} : vector<9x4xf32> to vector<1x4xf32>
    %230 = vector.shape_cast %229 : vector<1x4xf32> to vector<4xf32>
    %231 = vector.shape_cast %230 : vector<4xf32> to vector<1x1x4xf32>
    %232 = vector.broadcast %231 : vector<1x1x4xf32> to vector<8x16x4xf32>
    %233 = arith.mulf %228, %232 : vector<8x16x4xf32>
    %234 = arith.addf %227, %233 : vector<8x16x4xf32>
    %c0_62 = arith.constant 0 : index
    %c0_63 = arith.constant 0 : index
    %235 = vector.load %arg12[%c0_62, %c0_63] : memref<1x4xf32, #tpu.memory_space<vmem>>, vector<1x4xf32>
    %236 = vector.shape_cast %235 : vector<1x4xf32> to vector<4xf32>
    %237 = vector.shape_cast %236 : vector<4xf32> to vector<1x1x4xf32>
    %238 = vector.broadcast %237 : vector<1x1x4xf32> to vector<8x16x4xf32>
    %239 = arith.addf %234, %238 : vector<8x16x4xf32>
    %c0_64 = arith.constant 0 : index
    %c0_65 = arith.constant 0 : index
    %240 = vector.load %arg13[%c0_64, %c0_65] : memref<4x4xf32, #tpu.memory_space<vmem>>, vector<4x4xf32>
    %cst_66 = arith.constant dense<0.000000e+00> : vector<8x16x4xf32>
    %241 = tpu.matmul %239, %240, %cst_66 {dimension_numbers = #tpu.dot_dimension_numbers<[2], [0], [0, 1], [1], [0, 0, 0, 1, 1, 1], [], []>} : vector<8x16x4xf32>, vector<4x4xf32>, vector<8x16x4xf32> -> vector<8x16x4xf32>
    %c0_67 = arith.constant 0 : index
    %c0_68 = arith.constant 0 : index
    %242 = vector.load %arg14[%c0_67, %c0_68] : memref<1x4xf32, #tpu.memory_space<vmem>>, vector<1x4xf32>
    %243 = vector.shape_cast %242 : vector<1x4xf32> to vector<4xf32>
    %244 = vector.shape_cast %243 : vector<4xf32> to vector<1x1x4xf32>
    %245 = vector.broadcast %244 : vector<1x1x4xf32> to vector<8x16x4xf32>
    %246 = arith.addf %241, %245 : vector<8x16x4xf32>
    %cst_69 = arith.constant 0.000000e+00 : f32
    %247 = vector.broadcast %cst_69 : f32 to vector<8x16x4xf32>
    %248 = arith.maximumf %246, %247 : vector<8x16x4xf32>
    %c0_70 = arith.constant 0 : index
    %c0_71 = arith.constant 0 : index
    %c0_72 = arith.constant 0 : index
    %c0_73 = arith.constant 0 : index
    %249 = vector.load %arg15[%c0_70, %c0_71, %c0_72, %c0_73] : memref<1x8x16x4xf32, #tpu.memory_space<vmem>>, vector<1x8x16x4xf32>
    %250 = vector.shape_cast %249 : vector<1x8x16x4xf32> to vector<8x16x4xf32>
    %251 = vector.shape_cast %248 : vector<8x16x4xf32> to vector<1x8x16x4xf32>
    tpu.vector_store %arg15[%c0_70, %c0_71, %c0_72, %c0_73], %251 {strides = array<i32>} : memref<1x8x16x4xf32, #tpu.memory_space<vmem>>, vector<1x8x16x4xf32>,
    return
  }
  func.func @transform_0(%arg0: i32, %arg1: i32) -> (i32, i32, i32, i32) {
    %c1_i32 = arith.constant 1 : i32
    %0 = arith.subi %arg1, %c1_i32 : i32
    %c0_i32 = arith.constant 0 : i32
    %1 = arith.maxsi %0, %c0_i32 : i32
    %c0_i32_0 = arith.constant 0 : i32
    %c0_i32_1 = arith.constant 0 : i32
    %c0_i32_2 = arith.constant 0 : i32
    return %arg0, %1, %c0_i32_0, %c0_i32_1 : i32, i32, i32, i32
  }
  func.func @transform_1(%arg0: i32, %arg1: i32) -> (i32, i32, i32, i32) {
    %c0_i32 = arith.constant 0 : i32
    %c0_i32_0 = arith.constant 0 : i32
    %c0_i32_1 = arith.constant 0 : i32
    return %arg0, %arg1, %c0_i32, %c0_i32_0 : i32, i32, i32, i32
  }
  func.func @transform_2(%arg0: i32, %arg1: i32) -> (i32, i32, i32, i32) {
    %c1_i32 = arith.constant 1 : i32
    %0 = arith.addi %arg1, %c1_i32 : i32
    %c1_i32_0 = arith.constant 1 : i32
    %1 = arith.minsi %0, %c1_i32_0 : i32
    %c0_i32 = arith.constant 0 : i32
    %c0_i32_1 = arith.constant 0 : i32
    %c0_i32_2 = arith.constant 0 : i32
    return %arg0, %1, %c0_i32, %c0_i32_1 : i32, i32, i32, i32
  }
  func.func @transform_3(%arg0: i32, %arg1: i32) -> (i32, i32, i32) {
    %c0_i32 = arith.constant 0 : i32
    %c0_i32_0 = arith.constant 0 : i32
    %c0_i32_1 = arith.constant 0 : i32
    %c0_i32_2 = arith.constant 0 : i32
    return %c0_i32, %c0_i32_0, %c0_i32_1 : i32, i32, i32
  }
  func.func @transform_4(%arg0: i32, %arg1: i32) -> (i32, i32) {
    %c0_i32 = arith.constant 0 : i32
    %c0_i32_0 = arith.constant 0 : i32
    %c0_i32_1 = arith.constant 0 : i32
    return %c0_i32, %c0_i32_0 : i32, i32
  }
  func.func @transform_5(%arg0: i32, %arg1: i32) -> (i32, i32) {
    %c0_i32 = arith.constant 0 : i32
    %c0_i32_0 = arith.constant 0 : i32
    %c0_i32_1 = arith.constant 0 : i32
    return %c0_i32, %c0_i32_0 : i32, i32
  }
  func.func @transform_6(%arg0: i32, %arg1: i32) -> (i32, i32) {
    %c0_i32 = arith.constant 0 : i32
    %c0_i32_0 = arith.constant 0 : i32
    %c0_i32_1 = arith.constant 0 : i32
    return %c0_i32, %c0_i32_0 : i32, i32
  }
  func.func @transform_7(%arg0: i32, %arg1: i32) -> (i32, i32) {
    %c0_i32 = arith.constant 0 : i32
    %c0_i32_0 = arith.constant 0 : i32
    %c0_i32_1 = arith.constant 0 : i32
    return %c0_i32, %c0_i32_0 : i32, i32
  }
  func.func @transform_8(%arg0: i32, %arg1: i32) -> (i32, i32) {
    %c0_i32 = arith.constant 0 : i32
    %c0_i32_0 = arith.constant 0 : i32
    %c0_i32_1 = arith.constant 0 : i32
    return %c0_i32, %c0_i32_0 : i32, i32
  }
  func.func @transform_9(%arg0: i32, %arg1: i32) -> (i32, i32) {
    %c0_i32 = arith.constant 0 : i32
    %c0_i32_0 = arith.constant 0 : i32
    %c0_i32_1 = arith.constant 0 : i32
    return %c0_i32, %c0_i32_0 : i32, i32
  }
  func.func @transform_10(%arg0: i32, %arg1: i32) -> (i32, i32) {
    %c0_i32 = arith.constant 0 : i32
    %c0_i32_0 = arith.constant 0 : i32
    %c0_i32_1 = arith.constant 0 : i32
    return %c0_i32, %c0_i32_0 : i32, i32
  }
  func.func @transform_11(%arg0: i32, %arg1: i32) -> (i32, i32) {
    %c0_i32 = arith.constant 0 : i32
    %c0_i32_0 = arith.constant 0 : i32
    %c0_i32_1 = arith.constant 0 : i32
    return %c0_i32, %c0_i32_0 : i32, i32
  }
  func.func @transform_12(%arg0: i32, %arg1: i32) -> (i32, i32) {
    %c0_i32 = arith.constant 0 : i32
    %c0_i32_0 = arith.constant 0 : i32
    %c0_i32_1 = arith.constant 0 : i32
    return %c0_i32, %c0_i32_0 : i32, i32
  }
  func.func @transform_13(%arg0: i32, %arg1: i32) -> (i32, i32, i32, i32) {
    %c0_i32 = arith.constant 0 : i32
    %c0_i32_0 = arith.constant 0 : i32
    %c0_i32_1 = arith.constant 0 : i32
    return %arg0, %arg1, %c0_i32, %c0_i32_0 : i32, i32, i32, i32
  }
}

</mosaic_0001>

<bundles_post_ra>
// kernel: tpu_custom_call.1
= control target key start
LH: loop header
LB: loop body
LE: loop exit
PB: predicated region body
PF: predicated region fallthrough
CT: control target
= control target key end

     0   :  { %s6905_s25 = smov 0   ;;  %s6907_s26 = smov 0   ;;  %s9789_s0 = inlined_call_operand.vmem [shape: f32[2,16,16,4], index: 0, kind: input, shape index: {}]   ;;  %s9790_s1 = inlined_call_operand.vmem [shape: f32[2,16,16,4], index: 1, kind: input, shape index: {}]   ;;  %s9791_s2 = inlined_call_operand.vmem [shape: f32[2,16,16,4], index: 2, kind: input, shape index: {}]   ;;  %s9792_s3 = inlined_call_operand.vmem [shape: f32[9,4,4], index: 3, kind: input, shape index: {}]   ;;  %s9793_s4 = inlined_call_operand.vmem [shape: f32[1,4], index: 4, kind: input, shape index: {}]   ;;  %s9794_s5 = inlined_call_operand.vmem [shape: f32[9,4], index: 5, kind: input, shape index: {}]   ;;  %s9795_s6 = inlined_call_operand.vmem [shape: f32[1,4], index: 6, kind: input, shape index: {}]   ;;  %s9796_s7 = inlined_call_operand.vmem [shape: f32[4,4], index: 7, kind: input, shape index: {}]   ;;  %s9797_s8 = inlined_call_operand.vmem [shape: f32[1,4], index: 8, kind: input, shape index: {}]   ;;  %s9798_s9 = inlined_call_operand.vmem [shape: f32[9,4], index: 9, kind: input, shape index: {}]   ;;  %s9799_s10 = inlined_call_operand.vmem [shape: f32[1,4], index: 10, kind: input, shape index: {}]   ;;  %s9800_s11 = inlined_call_operand.vmem [shape: f32[4,4], index: 11, kind: input, shape index: {}]   ;;  %s9801_s12 = inlined_call_operand.vmem [shape: f32[1,4], index: 12, kind: input, shape index: {}]   ;;  %s9802_s13 = inlined_call_operand.vmem [shape: f32[2,16,16,4], index: 13, kind: output, shape index: {}]  }
   0x1   :  { %s6909_s27 = smov 0   ;;  %s6911_s28 = smov 0  }
   0x2   :  { %s6913_s29 = smov 0  }
   0x3 LB: > { %9807 = sst [smem:[#allocation3_spill]] %s6820_s27  ;;  %s32_s30 = sadd.s32 1, %s6820_s27  ;;  %s6828_s29 = sphi %s6913_s29, %s23_s29   ;;  %s6824_s28 = sphi %s6911_s28, %s9874_s28   ;;  %s6820_s27 = sphi %s6909_s27, %s9873_s27   ;;  %s6816_s26 = sphi %s6907_s26, %s9872_s26   ;;  %s6812_s25 = sphi %s6905_s25, %s9871_s25  }
   0x4   : > { %9808 = sst [smem:[#allocation4_spill]] %s6824_s28  ;;  %s35_s14 = sadd.s32 1, %s6824_s28 }
   0x5   : > { %p33_p0 = scmp.ge.s32.totalorder %s32_s30, 2  ;;  %p5774_p1 = scmp.ge.s32.totalorder %s6828_s29, 1 }
   0x6   : > { %p469_p2 = scmp.lt.s32.totalorder %s6828_s29, 5 }
   0x7   : > { %s9876_s30 = smov (%p33_p0, %s32_s30), 0  ;;  %s9878_s14 = smov (!%p33_p0, %s35_s14), %s6824_s28 }
   0x8   : > { %9809 = sst [smem:[#allocation5_spill]] %s9876_s30  ;;  %p470_p3 = pnand %p5774_p1, %p469_p2 }
   0x9   : > { %p37_p4 = scmp.ge.s32.totalorder %s9878_s14, 2 }
   0xa   : > { %473 = sbr.rel (%p470_p3) target bundleno = 1293 (0x50d), region = 72 }
   0xb   : > { %s9880_s14 = smov (%p37_p4, %s9878_s14), 0 }
   0xc   : > { %9810 = sst [smem:[#allocation6_spill]] %s9880_s14 }
   0xf   : > { %vm605_vm0 = vcmask 31744   ;;  %vm608_vm1 = vcmask 25600   ;;  %s5775_s15 = sadd.s32 4294967295, %s6812_s25  ;;  %p553_p5 = scmp.lt.s32.totalorder %s6816_s26, 1  ;;  %v6830_v0 = vmov 0.0  }
  0x10   : > { %616 = vst.msk [vmem:[#allocation2 + $0x48] sm:$0xff] %vm605_vm0, %v6830_v0  ;;  %606 = vst.msk [vmem:[#allocation2] sm:$0xff] %vm605_vm0, %v6830_v0  ;;  %p550_p6 = scmp.gt.s32.totalorder %s5775_s15, 0  ;;  %s5780_s16 = sshll.u32 %s6812_s25, 3 }
  0x11   : > { %607 = vst.msk [vmem:[#allocation2 + $0x8] sm:$0xff] %vm605_vm0, %v6830_v0  ;;  %610 = vst.msk [vmem:[#allocation2 + $0x18] sm:$0xff] %vm605_vm0, %v6830_v0  ;;  %s9882_s26 = smov (!%p553_p5, %s6816_s26), 1  ;;  %p569_p7 = scmp.lt.s32.totalorder %s5780_s16, 15 }
  0x12   : > { %611 = vst.msk [vmem:[#allocation2 + $0x20] sm:$0xff] %vm605_vm0, %v6830_v0  ;;  %613 = vst.msk [vmem:[#allocation2 + $0x30] sm:$0xff] %vm605_vm0, %v6830_v0  ;;  %s9884_s15 = smov (!%p550_p6, %s5775_s15), 0  ;;  %s6991_s18 = sshll.u32 %s9882_s26, 5 }
  0x13   : > { %614 = vst.msk [vmem:[#allocation2 + $0x38] sm:$0xff] %vm605_vm0, %v6830_v0  ;;  %617 = vst.msk [vmem:[#allocation2 + $0x50] sm:$0xff] %vm605_vm0, %v6830_v0  ;;  %s5776_s17 = sshll.u32 %s9884_s15, 3  ;;  %s577_s19 = sadd.s32 1, %s6812_s25 }
  0x14   : > { %619 = vst.msk [vmem:[#allocation2 + $0x60] sm:$0xff] %vm605_vm0, %v6830_v0  ;;  %620 = vst.msk [vmem:[#allocation2 + $0x68] sm:$0xff] %vm605_vm0, %v6830_v0  ;;  %p555_p8 = scmp.lt.s32.totalorder %s5776_s17, 15  ;;  %s9886_s16 = smov (!%p569_p7, %s5780_s16), 15 }
  0x15   : > { %622 = vst.msk [vmem:[#allocation2 + $0x78] sm:$0xff] %vm605_vm0, %v6830_v0  ;;  %623 = vst.msk [vmem:[#allocation2 + $0x80] sm:$0xff] %vm605_vm0, %v6830_v0  ;;  %s5781_s20 = sshll.u32 %s9886_s16, 1  ;;  %p578_p9 = scmp.lt.s32.totalorder %s577_s19, 1 }
  0x16   : > { %625 = vst.msk [vmem:[#allocation2 + $0x90] sm:$0xff] %vm605_vm0, %v6830_v0  ;;  %626 = vst.msk [vmem:[#allocation2 + $0x98] sm:$0xff] %vm605_vm0, %v6830_v0  ;;  %s9888_s17 = smov (!%p555_p8, %s5776_s17), 15  ;;  %s573_s22 = sadd.s32 %s5781_s20, %s6991_s18 }
  0x17   : > { %628 = vst.msk [vmem:[#allocation2 + $0xa8] sm:$0xff] %vm605_vm0, %v6830_v0  ;;  %629 = vst.msk [vmem:[#allocation2 + $0xb0] sm:$0xff] %vm605_vm0, %v6830_v0  ;;  %s5777_s21 = sshll.u32 %s9888_s17, 1  ;;  %s5783_s24 = sshll.u32 %s573_s22, 3 }
  0x18   : > { %631 = vst.msk [vmem:[#allocation2 + $0xc0] sm:$0xff] %vm605_vm0, %v6830_v0  ;;  %632 = vst.msk [vmem:[#allocation2 + $0xc8] sm:$0xff] %vm605_vm0, %v6830_v0  ;;  %s559_s23 = sadd.s32 %s6991_s18, %s5777_s21  ;;  %s6999_s27 = scalar_lea.vmem %s9790_s1, %s5783_s24 }
  0x19   : > { %634 = vst.msk [vmem:[#allocation2 + $0xd8] sm:$0xff] %vm605_vm0, %v6830_v0  ;;  %635 = vst.msk [vmem:[#allocation2 + $0xe0] sm:$0xff] %vm605_vm0, %v6830_v0  ;;  %s5779_s14 = sshll.u32 %s559_s23, 3  ;;  %s7009_s21 = scalar_lea.vmem %s9802_s13, %s5783_s24  ;;  %v649_v1 = vld [vmem:[%s6999_s27] sm:$0xff]  ;;  %v650_v2 = vld [vmem:[%s6999_s27 + $0x8] sm:$0xff] }
  0x1a   : > { %637 = vst.msk [vmem:[#allocation2 + $0xf0] sm:$0xff] %vm605_vm0, %v6830_v0  ;;  %638 = vst.msk [vmem:[#allocation2 + $0xf8] sm:$0xff] %vm605_vm0, %v6830_v0  ;;  %s7004_s16 = scalar_lea.vmem %s9789_s0, %s5779_s14  ;;  %v651_v3 = vld [vmem:[%s6999_s27 + $0x10] sm:$0xff]  ;;  %s9890_s19 = smov (!%p578_p9, %s577_s19), 1  ;;  %v652_v4 = vld [vmem:[%s6999_s27 + $0x18] sm:$0xff] }
  0x1b   : > { %640 = vst.msk [vmem:[#allocation2 + $0x108] sm:$0xff] %vm605_vm0, %v6830_v0  ;;  %641 = vst.msk [vmem:[#allocation2 + $0x110] sm:$0xff] %vm605_vm0, %v6830_v0  ;;  %v653_v5 = vld [vmem:[%s6999_s27 + $0x20] sm:$0xff]  ;;  %v654_v6 = vld [vmem:[%s6999_s27 + $0x28] sm:$0xff]  ;;  %s5784_s28 = sshll.u32 %s9890_s19, 3  ;;  %p5792_p11 = scmp.le.s32.totalorder %s6812_s25, 0 }
  0x1c   : > { %643 = vst.msk [vmem:[#allocation2 + $0x120] sm:$0xff] %vm605_vm0, %v6830_v0  ;;  %644 = vst.msk [vmem:[#allocation2 + $0x128] sm:$0xff] %vm605_vm0, %v6830_v0  ;;  %v655_v7 = vld [vmem:[%s6999_s27 + $0x30] sm:$0xff]  ;;  %v656_v8 = vld [vmem:[%s6999_s27 + $0x38] sm:$0xff]  ;;  %p583_p10 = scmp.lt.s32.totalorder %s5784_s28, 15 }
  0x1d   : > { %646 = vst.msk [vmem:[#allocation2 + $0x138] sm:$0xff] %vm605_vm0, %v6830_v0  ;;  %647 = vst.msk [vmem:[#allocation2 + $0x140] sm:$0xff] %vm605_vm0, %v6830_v0  ;;  %v657_v9 = vld [vmem:[%s6999_s27 + $0x40] sm:$0xff]  ;;  %v658_v10 = vld [vmem:[%s6999_s27 + $0x48] sm:$0xff] }
  0x1e   : > { %618 = vst.msk [vmem:[#allocation2 + $0x58] sm:$0x3] %vm608_vm1, %v6830_v0  ;;  %609 = vst.msk [vmem:[#allocation2 + $0x10] sm:$0x3] %vm608_vm1, %v6830_v0  ;;  %v659_v11 = vld [vmem:[%s6999_s27 + $0x50] sm:$0xff]  ;;  %v660_v12 = vld [vmem:[%s6999_s27 + $0x58] sm:$0xff] }
  0x1f   : > { %612 = vst.msk [vmem:[#allocation2 + $0x28] sm:$0x3] %vm608_vm1, %v6830_v0  ;;  %615 = vst.msk [vmem:[#allocation2 + $0x40] sm:$0x3] %vm608_vm1, %v6830_v0  ;;  %v661_v13 = vld [vmem:[%s6999_s27 + $0x60] sm:$0xff]  ;;  %v662_v14 = vld [vmem:[%s6999_s27 + $0x68] sm:$0xff] }
  0x20   : > { %621 = vst.msk [vmem:[#allocation2 + $0x70] sm:$0x3] %vm608_vm1, %v6830_v0  ;;  %624 = vst.msk [vmem:[#allocation2 + $0x88] sm:$0x3] %vm608_vm1, %v6830_v0  ;;  %v663_v15 = vld [vmem:[%s6999_s27 + $0x70] sm:$0xff]  ;;  %v664_v16 = vld [vmem:[%s6999_s27 + $0x78] sm:$0xff] }
  0x21   : > { %627 = vst.msk [vmem:[#allocation2 + $0xa0] sm:$0x3] %vm608_vm1, %v6830_v0  ;;  %630 = vst.msk [vmem:[#allocation2 + $0xb8] sm:$0x3] %vm608_vm1, %v6830_v0  ;;  %s9892_s28 = smov (!%p583_p10, %s5784_s28), 15 }
  0x22   : > { %633 = vst.msk [vmem:[#allocation2 + $0xd0] sm:$0x3] %vm608_vm1, %v6830_v0  ;;  %636 = vst.msk [vmem:[#allocation2 + $0xe8] sm:$0x3] %vm608_vm1, %v6830_v0  ;;  %s5785_s30 = sshll.u32 %s9892_s28, 1 }
  0x23   : > { %639 = vst.msk [vmem:[#allocation2 + $0x100] sm:$0x3] %vm608_vm1, %v6830_v0  ;;  %642 = vst.msk [vmem:[#allocation2 + $0x118] sm:$0x3] %vm608_vm1, %v6830_v0  ;;  %s587_s14 = sadd.s32 %s5785_s30, %s6991_s18 }
  0x24   : > { %645 = vst.msk [vmem:[#allocation2 + $0x130] sm:$0x3] %vm608_vm1, %v6830_v0  ;;  %648 = vst.msk [vmem:[#allocation2 + $0x148] sm:$0x3] %vm608_vm1, %v6830_v0  ;;  %s5787_s19 = sshll.u32 %s587_s14, 3 }
  0x25   : > { %666 = vst.msk [vmem:[#allocation2 + $0x49] sm:$0xff] %vm605_vm0, %v649_v1  ;;  %667 = vst.msk [vmem:[#allocation2 + $0x51] sm:$0xff] %vm605_vm0, %v650_v2  ;;  %s589_s24 = scalar_lea.vmem %s9791_s2, %s5787_s19 }
  0x26   : > { %668 = vst.msk [vmem:[#allocation2 + $0x61] sm:$0xff] %vm605_vm0, %v651_v3  ;;  %669 = vst.msk [vmem:[#allocation2 + $0x69] sm:$0xff] %vm605_vm0, %v652_v4 }
  0x27   : > { %670 = vst.msk [vmem:[#allocation2 + $0x79] sm:$0xff] %vm605_vm0, %v653_v5  ;;  %671 = vst.msk [vmem:[#allocation2 + $0x81] sm:$0xff] %vm605_vm0, %v654_v6 }
  0x28   : > { %672 = vst.msk [vmem:[#allocation2 + $0x91] sm:$0xff] %vm605_vm0, %v655_v7  ;;  %673 = vst.msk [vmem:[#allocation2 + $0x99] sm:$0xff] %vm605_vm0, %v656_v8  ;;  %685 = sbr.rel (%p5792_p11) target bundleno = 49 (0x31), region = 76 }
  0x29   : > { %674 = vst.msk [vmem:[#allocation2 + $0xa9] sm:$0xff] %vm605_vm0, %v657_v9  ;;  %675 = vst.msk [vmem:[#allocation2 + $0xb1] sm:$0xff] %vm605_vm0, %v658_v10 }
  0x2a   : > { %676 = vst.msk [vmem:[#allocation2 + $0xc1] sm:$0xff] %vm605_vm0, %v659_v11  ;;  %677 = vst.msk [vmem:[#allocation2 + $0xc9] sm:$0xff] %vm605_vm0, %v660_v12 }
  0x2b   : > { %678 = vst.msk [vmem:[#allocation2 + $0xd9] sm:$0xff] %vm605_vm0, %v661_v13  ;;  %679 = vst.msk [vmem:[#allocation2 + $0xe1] sm:$0xff] %vm605_vm0, %v662_v14 }
  0x2c   : > { %680 = vst.msk [vmem:[#allocation2 + $0xf1] sm:$0xff] %vm605_vm0, %v663_v15  ;;  %681 = vst.msk [vmem:[#allocation2 + $0xf9] sm:$0xff] %vm605_vm0, %v664_v16 }
  0x2d   : > { %v5793_v17 = vld [vmem:[%s7004_s16 + $0x50] sm:$0xff]  ;;  %v5794_v18 = vld [vmem:[%s7004_s16 + $0x58] sm:$0xff]  ;;  %v5795_v19 = vld [vmem:[%s7004_s16 + $0x60] sm:$0xff] }
  0x2e   : > { %693 = vst.msk [vmem:[#allocation2 + $0x1] sm:$0xff] %vm605_vm0, %v5793_v17  ;;  %694 = vst.msk [vmem:[#allocation2 + $0x9] sm:$0xff] %vm605_vm0, %v5794_v18  ;;  %v5796_v20 = vld [vmem:[%s7004_s16 + $0x68] sm:$0xff]  ;;  %v5797_v21 = vld [vmem:[%s7004_s16 + $0x70] sm:$0xff] }
  0x2f   : > { %695 = vst.msk [vmem:[#allocation2 + $0x19] sm:$0xff] %vm605_vm0, %v5795_v19  ;;  %v5798_v22 = vld [vmem:[%s7004_s16 + $0x78] sm:$0xff]  ;;  %696 = vst.msk [vmem:[#allocation2 + $0x21] sm:$0xff] %vm605_vm0, %v5796_v20 }
  0x30   : > { %697 = vst.msk [vmem:[#allocation2 + $0x31] sm:$0xff] %vm605_vm0, %v5797_v21  ;;  %698 = vst.msk [vmem:[#allocation2 + $0x39] sm:$0xff] %vm605_vm0, %v5798_v22 }
  0x31 PF: > { %p5799_p12 = scmp.ge.s32.totalorder %s6812_s25, 1 }
  0x33   : > { %702 = sbr.rel (%p5799_p12) target bundleno = 60 (0x3c), region = 80 }
  0x38   : > { %v703_v23 = vld [vmem:[%s589_s24] sm:$0xff]  ;;  %v704_v24 = vld [vmem:[%s589_s24 + $0x8] sm:$0xff]  ;;  %v705_v25 = vld [vmem:[%s589_s24 + $0x10] sm:$0xff] }
  0x39   : > { %710 = vst.msk [vmem:[#allocation2 + $0x109] sm:$0xff] %vm605_vm0, %v703_v23  ;;  %711 = vst.msk [vmem:[#allocation2 + $0x111] sm:$0xff] %vm605_vm0, %v704_v24  ;;  %v706_v26 = vld [vmem:[%s589_s24 + $0x18] sm:$0xff]  ;;  %v707_v27 = vld [vmem:[%s589_s24 + $0x20] sm:$0xff] }
  0x3a   : > { %712 = vst.msk [vmem:[#allocation2 + $0x121] sm:$0xff] %vm605_vm0, %v705_v25  ;;  %v708_v28 = vld [vmem:[%s589_s24 + $0x28] sm:$0xff]  ;;  %713 = vst.msk [vmem:[#allocation2 + $0x129] sm:$0xff] %vm605_vm0, %v706_v26 }
  0x3b   : > { %714 = vst.msk [vmem:[#allocation2 + $0x139] sm:$0xff] %vm605_vm0, %v707_v27  ;;  %715 = vst.msk [vmem:[#allocation2 + $0x141] sm:$0xff] %vm605_vm0, %v708_v28 }
  0x3c PF: > { %v761_v29 = vld [vmem:[%s9792_s3 + $0xc] sm:$0xf]  ;;  %vm839_vm2 = vcmask 1043456   ;;  %v7073_v30 = vld [vmem:[#allocation2 + $0x18] sm:$0xff]  ;;  %v7075_v31 = vld [vmem:[#allocation2 + $0x20] sm:$0xff]  ;;  %vm1452_vm3 = vcmask 1046528  }
  0x3d   : > { %6339 = vmatprep.subr.msk.mxu0 %vm839_vm2, %v761_v29  ;;  %6341 = vmatprep.mubr.msk.f32.mxu0 %vm605_vm0, %v7073_v30  ;;  %v758_v32 = vld [vmem:[%s9792_s3] sm:$0xf]  ;;  %v7083_v33 = vld [vmem:[#allocation2 + $0x30] sm:$0xff]  ;;  %v7093_v34 = vld [vmem:[#allocation2 + $0x38] sm:$0xff]  ;;  %v1458_v62 = vrot.slane %v7073_v30, 1  ;;  %v1459_v63 = vrot.slane %v7075_v31, 1 }
  0x3e   : > { %6340 = vmatpush3.msk.msra.mxu0 %vm839_vm2, %v761_v29  ;;  %6739 = vmatprep.subr.msk.mxu1 %vm839_vm2, %v758_v32  ;;  %v7095_v35 = vld [vmem:[#allocation2 + $0x48] sm:$0xff]  ;;  %v7097_v36 = vld [vmem:[#allocation2 + $0x50] sm:$0xff]  ;;  %v7102_v37 = vld [vmem:[#allocation2 + $0x60] sm:$0xff]  ;;  %v1463_v5 = vrot.slane %v7083_v33, 1  ;;  %v1464_v6 = vrot.slane %v7093_v34, 1  ;;  %vm2217_vm4 = vcmask 1045504  }
  0x3f   : > { %6342 = vmatmul.mubr.msk.f32.vlgmr.msra.gmra.mxu0 %vm605_vm0, %v7075_v31  ;;  %6377 = vmatprep.subr.msk.mxu0 %vm839_vm2, %v758_v32  ;;  %v7112_v38 = vld [vmem:[#allocation2 + $0x68] sm:$0xff]  ;;  %v7117_v39 = vld [vmem:[%s9792_s3 + $0x18] sm:$0xf]  ;;  %v759_v40 = vld [vmem:[%s9792_s3 + $0x4] sm:$0xf]  ;;  %v7241_v4 = vsel %vm1452_vm3, %v1458_v62, %v1459_v63  ;;  %v1468_v14 = vrot.slane %v7095_v35, 1 }
  0x40   : > { %6378 = vmatpush3.msk.msra.mxu0 %vm839_vm2, %v758_v32  ;;  %6344 = vmatprep.mubr.msk.f32.mxu0 %vm605_vm0, %v7083_v33  ;;  %v7122_v41 = vld [vmem:[#allocation2 + $0x78] sm:$0xff]  ;;  %v7135_v42 = vld [vmem:[#allocation2 + $0x80] sm:$0xff]  ;;  %v7138_v43 = vld [vmem:[#allocation2 + $0x90] sm:$0xff]  ;;  %v7268_v13 = vsel %vm1452_vm3, %v1463_v5, %v1464_v6  ;;  %v1469_v15 = vrot.slane %v7097_v36, 1  ;;  %v1473_v20 = vrot.slane %v7102_v37, 1  ;;  %v1474_v21 = vrot.slane %v7112_v38, 1 }
  0x41   : > { %6740 = vmatpush3.msk.msra.mxu1 %vm839_vm2, %v758_v32  ;;  %6388 = vmatprep.mubr.msk.f32.mxu1 %vm605_vm0, %v7095_v35  ;;  %v7148_v44 = vld [vmem:[#allocation2 + $0x98] sm:$0xff]  ;;  %v7155_v46 = vld [vmem:[#allocation2 + $0xa8] sm:$0xff]  ;;  %v7167_v47 = vld [vmem:[#allocation2 + $0xb0] sm:$0xff]  ;;  %v1478_v27 = vrot.slane %v7122_v41, 1  ;;  %v1479_v28 = vrot.slane %v7135_v42, 1  ;;  %p6026_p13 = scmp.ne.s32.totalorder %s6812_s25, 0 }
  0x42   : > { %6389 = vmatmul.mubr.msk.f32.vlgmr.msra.gmra.mxu1 %vm605_vm0, %v7097_v36  ;;  %6415 = vmatprep.subr.msk.mxu0 %vm839_vm2, %v7117_v39  ;;  %v7153_v45 = vld [vmem:[%s9792_s3 + $0x1c] sm:$0xf]  ;;  %v7169_v48 = vld [vmem:[#allocation2 + $0xc0] sm:$0xff]  ;;  %v7179_v49 = vld [vmem:[#allocation2 + $0xc8] sm:$0xff]  ;;  %v7291_v19 = vsel %vm1452_vm3, %v1468_v14, %v1469_v15  ;;  %v7315_v26 = vsel %vm1452_vm3, %v1473_v20, %v1474_v21 }
  0x43   : > { %6345 = vmatmul.mubr.msk.f32.gmra.mxu0 %vm605_vm0, %v7093_v34  ;;  %6391 = vmatprep.mubr.msk.f32.mxu1 %vm605_vm0, %v7102_v37  ;;  %v7181_v50 = vld [vmem:[#allocation2 + $0xd8] sm:$0xff]  ;;  %v7191_v51 = vld [vmem:[#allocation2 + $0xe0] sm:$0xff]  ;;  %v7193_v52 = vld [vmem:[#allocation2 + $0xf0] sm:$0xff] }
  0x44   : > { %6347 = vmatprep.mubr.msk.f32.mxu0 %vm605_vm0, %v7095_v35  ;;  %6453 = vmatprep.subr.msk.mxu1 %vm839_vm2, %v759_v40  ;;  %v7201_v53 = vld [vmem:[#allocation2] sm:$0xff]  ;;  %v7203_v54 = vld [vmem:[#allocation2 + $0x8] sm:$0xff]  ;;  %v7209_v57 = vld [vmem:[#allocation2 + $0x10] sm:$0x3] }
  0x45   : > { %6454 = vmatpush3.msk.msra.mxu1 %vm839_vm2, %v759_v40  ;;  %v1453_v55 = vrot.slane %v7201_v53, 1  ;;  %v1454_v56 = vrot.slane %v7203_v54, 1  ;;  %v7211_v58 = vld [vmem:[#allocation2 + $0xf8] sm:$0xff]  ;;  %v7213_v59 = vld [vmem:[#allocation2 + $0x108] sm:$0xff]  ;;  %v1456_v60 = vrot.slane %v7209_v57, 1  ;;  %v7229_v1 = vld [vmem:[#allocation2 + $0x110] sm:$0xff]  ;;  %v7335_v40 = vsel %vm1452_vm3, %v1478_v27, %v1479_v28 }
  0x46   : > { %6392 = vmatmul.mubr.msk.f32.gmra.mxu1 %vm605_vm0, %v7112_v38  ;;  %6529 = vmatprep.subr.msk.mxu1 %vm839_vm2, %v7153_v45  ;;  %v7227_v0 = vld [vmem:[#allocation2 + $0x28] sm:$0x3]  ;;  %v7245_v7 = vld [vmem:[#allocation2 + $0x40] sm:$0x3]  ;;  %v7253_v9 = vld [vmem:[%s9792_s3 + $0x14] sm:$0xf] }
  0x47   : > { %6348 = vmatmul.mubr.msk.f32.gmra.mxu0 %vm605_vm0, %v7097_v36  ;;  %6394 = vmatprep.mubr.msk.f32.mxu1 %vm605_vm0, %v7122_v41  ;;  %v1455_v61 = vsel %vm1452_vm3, %v1453_v55, %v1454_v56  ;;  %v1457_v2 = vsel %vm1452_vm3, %v1454_v56, %v1456_v60  ;;  %v1461_v3 = vrot.slane %v7227_v0, 1  ;;  %v7247_v8 = vld [vmem:[#allocation2 + $0x120] sm:$0xff]  ;;  %v1466_v11 = vrot.slane %v7245_v7, 1  ;;  %v7265_v12 = vld [vmem:[#allocation2 + $0x128] sm:$0xff]  ;;  %v7272_v16 = vld [vmem:[#allocation2 + $0x58] sm:$0x3] }
  0x48   : > { %6350 = vmatprep.mubr.msk.f32.mxu0 %vm605_vm0, %v7102_v37  ;;  %v1471_v18 = vrot.slane %v7272_v16, 1  ;;  %v7295_v22 = vld [vmem:[#allocation2 + $0x70] sm:$0x3]  ;;  %v7319_v29 = vld [vmem:[#allocation2 + $0x88] sm:$0x3]  ;;  %v1484_v55 = vrot.slane %v7148_v44, 1 }
  0x49   : > { %v7260_v10 = vsel %vm1452_vm3, %v1459_v63, %v1461_v3  ;;  %v7285_v17 = vsel %vm1452_vm3, %v1464_v6, %v1466_v11  ;;  %v762_v23 = vld [vmem:[%s9792_s3 + $0x10] sm:$0xf]  ;;  %v1476_v25 = vrot.slane %v7295_v22, 1  ;;  %v7339_v56 = vld [vmem:[#allocation2 + $0xa0] sm:$0x3]  ;;  %v1488_v63 = vrot.slane %v7155_v46, 1 }
  0x4a   : > { %6395 = vmatmul.mubr.msk.f32.gmra.mxu1 %vm605_vm0, %v7135_v42  ;;  %v7307_v24 = vsel %vm1452_vm3, %v1469_v15, %v1471_v18  ;;  %v7358_v3 = vld [vmem:[#allocation2 + $0xb8] sm:$0x3]  ;;  %v7365_v5 = vld [vmem:[%s9792_s3 + $0x8] sm:$0xf]  ;;  %v1493_v15 = vrot.slane %v7169_v48, 1  ;;  %v1494_v18 = vrot.slane %v7179_v49, 1 }
  0x4b   : > { %6351 = vmatmul.mubr.msk.f32.gmra.mxu0 %vm605_vm0, %v7112_v38  ;;  %6397 = vmatprep.mubr.msk.f32.mxu1 %vm605_vm0, %v7138_v43  ;;  %v7329_v32 = vsel %vm1452_vm3, %v1474_v21, %v1476_v25  ;;  %v1491_v11 = vrot.slane %v7358_v3, 1  ;;  %v7383_v20 = vld [vmem:[#allocation2 + $0xd0] sm:$0x3]  ;;  %v1498_v27 = vrot.slane %v7181_v50, 1 }
  0x4c   : > { %6353 = vmatprep.mubr.msk.f32.mxu0 %vm605_vm0, %v7122_v41  ;;  %9811 = vst [vmem:[#allocation7_spill] sm:$0xff] %v7383_v20  ;;  %v7400_v25 = vsel %vm1452_vm3, %v1493_v15, %v1494_v18 }
  0x4e   : > { %6398 = vmatmul.mubr.msk.f32.gmra.mxu1 %vm605_vm0, %v7148_v44 }
  0x4f   : > { %6354 = vmatmul.mubr.msk.f32.gmra.mxu0 %vm605_vm0, %v7135_v42  ;;  %6400 = vmatprep.mubr.msk.f32.mxu1 %vm605_vm0, %v7155_v46 }
  0x50   : > { %6356 = vmatprep.mubr.msk.f32.mxu0 %vm605_vm0, %v7138_v43 }
  0x52   : > { %6401 = vmatmul.mubr.msk.f32.gmra.mxu1 %vm605_vm0, %v7167_v47 }
  0x53   : > { %6357 = vmatmul.mubr.msk.f32.gmra.mxu0 %vm605_vm0, %v7148_v44  ;;  %6403 = vmatprep.mubr.msk.f32.mxu1 %vm605_vm0, %v7169_v48 }
  0x54   : > { %6359 = vmatprep.mubr.msk.f32.mxu0 %vm605_vm0, %v7155_v46 }
  0x56   : > { %6404 = vmatmul.mubr.msk.f32.gmra.mxu1 %vm605_vm0, %v7179_v49 }
  0x57   : > { %6360 = vmatmul.mubr.msk.f32.gmra.mxu0 %vm605_vm0, %v7167_v47  ;;  %6406 = vmatprep.mubr.msk.f32.mxu1 %vm605_vm0, %v7181_v50 }
  0x58   : > { %6362 = vmatprep.mubr.msk.f32.mxu0 %vm605_vm0, %v7169_v48 }
  0x5a   : > { %6407 = vmatmul.mubr.msk.f32.gmra.mxu1 %vm605_vm0, %v7191_v51 }
  0x5b   : > { %6363 = vmatmul.mubr.msk.f32.gmra.mxu0 %vm605_vm0, %v7179_v49  ;;  %6409 = vmatprep.mubr.msk.f32.mxu1 %vm605_vm0, %v7193_v52 }
  0x5c   : > { %6365 = vmatprep.mubr.msk.f32.mxu0 %vm605_vm0, %v7181_v50 }
  0x5e   : > { %6410 = vmatmul.mubr.msk.f32.gmra.mxu1 %vm605_vm0, %v7211_v58 }
  0x5f   : > { %6366 = vmatmul.mubr.msk.f32.gmra.mxu0 %vm605_vm0, %v7191_v51  ;;  %6412 = vmatprep.mubr.msk.f32.mxu1 %vm605_vm0, %v7213_v59 }
  0x60   : > { %6368 = vmatprep.mubr.msk.f32.mxu0 %vm605_vm0, %v7193_v52 }
  0x62   : > { %6413 = vmatmul.mubr.msk.f32.gmra.mxu1 %vm605_vm0, %v7229_v1 }
  0x63   : > { %6369 = vmatmul.mubr.msk.f32.gmra.mxu0 %vm605_vm0, %v7211_v58  ;;  %6455 = vmatprep.mubr.msk.f32.mxu1 %vm605_vm0, %v1455_v61  ;;  %v1486_v61 = vrot.slane %v7339_v56, 1 }
  0x64   : > { %6371 = vmatprep.mubr.msk.f32.mxu0 %vm605_vm0, %v7213_v59 }
  0x65   : > { %v7372_v6 = vsel %vm1452_vm3, %v1484_v55, %v1486_v61 }
  0x66   : > { %6456 = vmatmul.mubr.msk.f32.vlgmr.msra.gmra.mxu1 %vm605_vm0, %v1457_v2  ;;  %v1489_v2 = vrot.slane %v7167_v47, 1 }
  0x67   : > { %6372 = vmatmul.mubr.msk.f32.gmra.mxu0 %vm605_vm0, %v7229_v1  ;;  %6458 = vmatprep.mubr.msk.f32.mxu1 %vm605_vm0, %v7241_v4 }
  0x68   : > { %6374 = vmatprep.mubr.msk.f32.mxu0 %vm605_vm0, %v7247_v8  ;;  %6530 = vmatpush3.msk.msra.mxu1 %vm839_vm2, %v7153_v45  ;;  %v1483_v45 = vrot.slane %v7138_v43, 1  ;;  %v7379_v14 = vsel %vm1452_vm3, %v1488_v63, %v1489_v2  ;;  %v7394_v21 = vsel %vm1452_vm3, %v1489_v2, %v1491_v11  ;;  %v1503_v63 = vrot.slane %v7193_v52, 1  ;;  %v7423_v11 = vld [vmem:[#allocation2 + $0x100] sm:$0x3] }
  0x69   : > { %6605 = vmatprep.subr.msk.mxu1 %vm839_vm2, %v7253_v9  ;;  %v1504_v2 = vrot.slane %v7211_v58, 1 }
  0x6a   : > { %6459 = vmatmul.mubr.msk.f32.gmra.mxu1 %vm605_vm0, %v7260_v10  ;;  %v7354_v62 = vsel %vm1452_vm3, %v1483_v45, %v1484_v55 }
  0x6b   : > { %6375 = vmatmul.mubr.msk.f32.gmra.mxu0 %vm605_vm0, %v7265_v12  ;;  %6461 = vmatprep.mubr.msk.f32.mxu1 %vm605_vm0, %v7268_v13 }
  0x6c   : > { %6379 = vmatprep.mubr.msk.f32.mxu0 %vm605_vm0, %v7201_v53 }
  0x6e   : > { %6462 = vmatmul.mubr.msk.f32.gmra.mxu1 %vm605_vm0, %v7285_v17 }
  0x6f   : > { %6380 = vmatmul.mubr.msk.f32.vlgmr.msra.gmra.mxu0 %vm605_vm0, %v7203_v54  ;;  %6464 = vmatprep.mubr.msk.f32.mxu1 %vm605_vm0, %v7291_v19 }
  0x70   : > { %6416 = vmatpush3.msk.msra.mxu0 %vm839_vm2, %v7117_v39  ;;  %6382 = vmatprep.mubr.msk.f32.mxu0 %vm605_vm0, %v7073_v30  ;;  %v1481_v39 = vrot.slane %v7319_v29, 1 }
  0x71   : > { %6491 = vmatprep.subr.msk.mxu0 %vm839_vm2, %v762_v23 }
  0x72   : > { %6465 = vmatmul.mubr.msk.f32.gmra.mxu1 %vm605_vm0, %v7307_v24  ;;  %v7348_v60 = vsel %vm1452_vm3, %v1479_v28, %v1481_v39  ;;  %v1499_v28 = vrot.slane %v7191_v51, 1  ;;  %v7404_v39 = vld [vmem:[#allocation2 + $0xe8] sm:$0x3] }
  0x73   : > { %6383 = vmatmul.mubr.msk.f32.gmra.mxu0 %vm605_vm0, %v7075_v31  ;;  %6467 = vmatprep.mubr.msk.f32.mxu1 %vm605_vm0, %v7315_v26  ;;  %9812 = vst [vmem:[#allocation8_spill] sm:$0xff] %v7404_v39  ;;  %v1501_v55 = vrot.slane %v7404_v39, 1  ;;  %v1509_v39 = vrot.slane %v7229_v1, 1 }
  0x74   : > { %6385 = vmatprep.mubr.msk.f32.mxu0 %vm605_vm0, %v7083_v33  ;;  %v7419_v61 = vsel %vm1452_vm3, %v1498_v27, %v1499_v28  ;;  %v1508_v27 = vrot.slane %v7213_v59, 1 }
  0x75   : > { %v7432_v15 = vsel %vm1452_vm3, %v1499_v28, %v1501_v55 }
  0x76   : > { %6468 = vmatmul.mubr.msk.f32.gmra.mxu1 %vm605_vm0, %v7329_v32 }
  0x77   : > { %6386 = vmatmul.mubr.msk.f32.gmra.mxu0 %vm605_vm0, %v7093_v34  ;;  %6470 = vmatprep.mubr.msk.f32.mxu1 %vm605_vm0, %v7335_v40 }
  0x78   : > { %6417 = vmatprep.mubr.msk.f32.mxu0 %vm605_vm0, %v7083_v33 }
  0x7a   : > { %6471 = vmatmul.mubr.msk.f32.gmra.mxu1 %vm605_vm0, %v7348_v60 }
  0x7b   : > { %6418 = vmatmul.mubr.msk.f32.vlgmr.msra.gmra.mxu0 %vm605_vm0, %v7093_v34  ;;  %6473 = vmatprep.mubr.msk.f32.mxu1 %vm605_vm0, %v7354_v62 }
  0x7c   : > { %6492 = vmatpush3.msk.msra.mxu0 %vm839_vm2, %v762_v23  ;;  %6420 = vmatprep.mubr.msk.f32.mxu0 %vm605_vm0, %v7095_v35  ;;  %v1496_v23 = vrot.slane %v7383_v20, 1  ;;  %v7442_v20 = vld [vmem:[#allocation2 + $0x118] sm:$0x3] }
  0x7d   : > { %6567 = vmatprep.subr.msk.mxu0 %vm839_vm2, %v7365_v5  ;;  %v1511_v55 = vrot.slane %v7442_v20, 1 }
  0x7e   : > { %6474 = vmatmul.mubr.msk.f32.gmra.mxu1 %vm605_vm0, %v7372_v6  ;;  %v7413_v45 = vsel %vm1452_vm3, %v1494_v18, %v1496_v23  ;;  %v1506_v18 = vrot.slane %v7423_v11, 1  ;;  %v7438_v23 = vsel %vm1452_vm3, %v1503_v63, %v1504_v2  ;;  %v7457_v63 = vsel %vm1452_vm3, %v1508_v27, %v1509_v39 }
  0x7f   : > { %6421 = vmatmul.mubr.msk.f32.gmra.mxu0 %vm605_vm0, %v7097_v36  ;;  %6476 = vmatprep.mubr.msk.f32.mxu1 %vm605_vm0, %v7379_v14 }
  0x80   : > { %6423 = vmatprep.mubr.msk.f32.mxu0 %vm605_vm0, %v7102_v37  ;;  %v7451_v28 = vsel %vm1452_vm3, %v1504_v2, %v1506_v18  ;;  %v7466_v2 = vsel %vm1452_vm3, %v1509_v39, %v1511_v55  ;;  %v7514_v39 = vld [vmem:[#allocation2 + $0x140] sm:$0xff]  ;;  %v2223_v55 = vrot.slane %v7073_v30, 2 }
  0x81   : > { %v7529_v18 = vld [vmem:[%s9792_s3 + $0x20] sm:$0xf] }
  0x82   : > { %6477 = vmatmul.mubr.msk.f32.gmra.mxu1 %vm605_vm0, %v7394_v21 }
  0x83   : > { %6424 = vmatmul.mubr.msk.f32.gmra.mxu0 %vm605_vm0, %v7112_v38  ;;  %6479 = vmatprep.mubr.msk.f32.mxu1 %vm605_vm0, %v7400_v25 }
  0x84   : > { %6426 = vmatprep.mubr.msk.f32.mxu0 %vm605_vm0, %v7122_v41 }
  0x86   : > { %6480 = vmatmul.mubr.msk.f32.gmra.mxu1 %vm605_vm0, %v7413_v45 }
  0x87   : > { %6427 = vmatmul.mubr.msk.f32.gmra.mxu0 %vm605_vm0, %v7135_v42  ;;  %6482 = vmatprep.mubr.msk.f32.mxu1 %vm605_vm0, %v7419_v61 }
  0x88   : > { %6429 = vmatprep.mubr.msk.f32.mxu0 %vm605_vm0, %v7138_v43 }
  0x8a   : > { %6483 = vmatmul.mubr.msk.f32.gmra.mxu1 %vm605_vm0, %v7432_v15 }
  0x8b   : > { %6430 = vmatmul.mubr.msk.f32.gmra.mxu0 %vm605_vm0, %v7148_v44  ;;  %6485 = vmatprep.mubr.msk.f32.mxu1 %vm605_vm0, %v7438_v23 }
  0x8c   : > { %6432 = vmatprep.mubr.msk.f32.mxu0 %vm605_vm0, %v7155_v46 }
  0x8e   : > { %6486 = vmatmul.mubr.msk.f32.gmra.mxu1 %vm605_vm0, %v7451_v28 }
  0x8f   : > { %6433 = vmatmul.mubr.msk.f32.gmra.mxu0 %vm605_vm0, %v7167_v47  ;;  %6488 = vmatprep.mubr.msk.f32.mxu1 %vm605_vm0, %v7457_v63 }
  0x90   : > { %6435 = vmatprep.mubr.msk.f32.mxu0 %vm605_vm0, %v7169_v48 }
  0x92   : > { %6489 = vmatmul.mubr.msk.f32.gmra.mxu1 %vm605_vm0, %v7466_v2 }
  0x93   : > { %6436 = vmatmul.mubr.msk.f32.gmra.mxu0 %vm605_vm0, %v7179_v49  ;;  %6531 = vmatprep.mubr.msk.f32.mxu1 %vm605_vm0, %v7268_v13 }
  0x94   : > { %6438 = vmatprep.mubr.msk.f32.mxu0 %vm605_vm0, %v7181_v50 }
  0x96   : > { %6532 = vmatmul.mubr.msk.f32.vlgmr.msra.gmra.mxu1 %vm605_vm0, %v7285_v17 }
  0x97   : > { %6439 = vmatmul.mubr.msk.f32.gmra.mxu0 %vm605_vm0, %v7191_v51  ;;  %6534 = vmatprep.mubr.msk.f32.mxu1 %vm605_vm0, %v7291_v19 }
  0x98   : > { %6441 = vmatprep.mubr.msk.f32.mxu0 %vm605_vm0, %v7193_v52  ;;  %6606 = vmatpush3.msk.msra.mxu1 %vm839_vm2, %v7253_v9  ;;  %v7504_v9 = vld [vmem:[#allocation2 + $0x138] sm:$0xff] }
  0x9a   : > { %6535 = vmatmul.mubr.msk.f32.gmra.mxu1 %vm605_vm0, %v7307_v24 }
  0x9b   : > { %6442 = vmatmul.mubr.msk.f32.gmra.mxu0 %vm605_vm0, %v7211_v58  ;;  %6537 = vmatprep.mubr.msk.f32.mxu1 %vm605_vm0, %v7315_v26 }
  0x9c   : > { %6444 = vmatprep.mubr.msk.f32.mxu0 %vm605_vm0, %v7213_v59 }
  0x9e   : > { %6538 = vmatmul.mubr.msk.f32.gmra.mxu1 %vm605_vm0, %v7329_v32 }
  0x9f   : > { %6445 = vmatmul.mubr.msk.f32.gmra.mxu0 %vm605_vm0, %v7229_v1  ;;  %6540 = vmatprep.mubr.msk.f32.mxu1 %vm605_vm0, %v7335_v40 }
  0xa0   : > { %6447 = vmatprep.mubr.msk.f32.mxu0 %vm605_vm0, %v7247_v8 }
  0xa2   : > { %6541 = vmatmul.mubr.msk.f32.gmra.mxu1 %vm605_vm0, %v7348_v60 }
  0xa3   : > { %6448 = vmatmul.mubr.msk.f32.gmra.mxu0 %vm605_vm0, %v7265_v12  ;;  %6543 = vmatprep.mubr.msk.f32.mxu1 %vm605_vm0, %v7354_v62 }
  0xa4   : > { %6450 = vmatprep.mubr.msk.f32.mxu0 %vm605_vm0, %v7504_v9 }
  0xa6   : > { %6544 = vmatmul.mubr.msk.f32.gmra.mxu1 %vm605_vm0, %v7372_v6 }
  0xa7   : > { %6451 = vmatmul.mubr.msk.f32.gmra.mxu0 %vm605_vm0, %v7514_v39  ;;  %6546 = vmatprep.mubr.msk.f32.mxu1 %vm605_vm0, %v7379_v14 }
  0xa8   : > { %6493 = vmatprep.mubr.msk.f32.mxu0 %vm605_vm0, %v7241_v4  ;;  %v1774_v4 = vrot.slane %v7247_v8, 1 }
  0xaa   : > { %6547 = vmatmul.mubr.msk.f32.gmra.mxu1 %vm605_vm0, %v7394_v21 }
  0xab   : > { %6494 = vmatmul.mubr.msk.f32.vlgmr.msra.gmra.mxu0 %vm605_vm0, %v7260_v10  ;;  %6549 = vmatprep.mubr.msk.f32.mxu1 %vm605_vm0, %v7400_v25  ;;  %v1775_v10 = vrot.slane %v7265_v12, 1 }
  0xac   : > { %6568 = vmatpush3.msk.msra.mxu0 %vm839_vm2, %v7365_v5  ;;  %6496 = vmatprep.mubr.msk.f32.mxu0 %vm605_vm0, %v7268_v13  ;;  %v7559_v13 = vld [vmem:[#allocation2 + $0x130] sm:$0x3]  ;;  %v7575_v5 = vld [vmem:[#allocation2 + $0x148] sm:$0x3] }
  0xad   : > { %6643 = vmatprep.subr.msk.mxu0 %vm839_vm2, %v7529_v18  ;;  %v1999_v27 = vrot.slane %v7575_v5, 1 }
  0xae   : > { %6550 = vmatmul.mubr.msk.f32.gmra.mxu1 %vm605_vm0, %v7413_v45 }
  0xaf   : > { %6497 = vmatmul.mubr.msk.f32.gmra.mxu0 %vm605_vm0, %v7285_v17  ;;  %6552 = vmatprep.mubr.msk.f32.mxu1 %vm605_vm0, %v7419_v61  ;;  %v1777_v17 = vrot.slane %v7559_v13, 1 }
  0xb0   : > { %6499 = vmatprep.mubr.msk.f32.mxu0 %vm605_vm0, %v7291_v19  ;;  %v1996_v19 = vrot.slane %v7504_v9, 1 }
  0xb2   : > { %6553 = vmatmul.mubr.msk.f32.gmra.mxu1 %vm605_vm0, %v7432_v15 }
  0xb3   : > { %6500 = vmatmul.mubr.msk.f32.gmra.mxu0 %vm605_vm0, %v7307_v24  ;;  %6555 = vmatprep.mubr.msk.f32.mxu1 %vm605_vm0, %v7438_v23  ;;  %v1997_v24 = vrot.slane %v7514_v39, 1 }
  0xb4   : > { %6502 = vmatprep.mubr.msk.f32.mxu0 %vm605_vm0, %v7315_v26  ;;  %v7573_v26 = vsel %vm1452_vm3, %v1774_v4, %v1775_v10  ;;  %v2224_v4 = vrot.slane %v7075_v31, 2  ;;  %v2228_v31 = vrot.slane %v7083_v33, 2 }
  0xb6   : > { %6556 = vmatmul.mubr.msk.f32.gmra.mxu1 %vm605_vm0, %v7451_v28  ;;  %v7602_v30 = vsel %vm2217_vm4, %v2223_v55, %v2224_v4 }
  0xb7   : > { %6503 = vmatmul.mubr.msk.f32.gmra.mxu0 %vm605_vm0, %v7329_v32  ;;  %6558 = vmatprep.mubr.msk.f32.mxu1 %vm605_vm0, %v7457_v63  ;;  %v7584_v32 = vsel %vm1452_vm3, %v1775_v10, %v1777_v17  ;;  %v2226_v10 = vrot.slane %v7227_v0, 2  ;;  %v2219_v17 = vrot.slane %v7203_v54, 2  ;;  %v2253_v54 = vrot.slane %v7155_v46, 2 }
  0xb8   : > { %6505 = vmatprep.mubr.msk.f32.mxu0 %vm605_vm0, %v7335_v40  ;;  %v1998_v40 = vsel %vm1452_vm3, %v1996_v19, %v1997_v24  ;;  %v2258_v19 = vrot.slane %v7169_v48, 2 }
  0xb9   : > { %v7612_v0 = vsel %vm2217_vm4, %v2224_v4, %v2226_v10  ;;  %v2269_v4 = vrot.slane %v7211_v58, 2  ;;  %v2271_v10 = vrot.slane %v7423_v11, 2  ;;  %v2273_v58 = vrot.slane %v7213_v59, 2 }
  0xba   : > { %6559 = vmatmul.mubr.msk.f32.gmra.mxu1 %vm605_vm0, %v7466_v2 }
  0xbb   : > { %6506 = vmatmul.mubr.msk.f32.gmra.mxu0 %vm605_vm0, %v7348_v60  ;;  %6561 = vmatprep.mubr.msk.f32.mxu1 %vm605_vm0, %v7573_v26  ;;  %v2000_v60 = vsel %vm1452_vm3, %v1997_v24, %v1999_v27  ;;  %v2259_v24 = vrot.slane %v7179_v49, 2  ;;  %v2263_v49 = vrot.slane %v7181_v50, 2  ;;  %v2264_v27 = vrot.slane %v7191_v51, 2 }
  0xbc   : > { %6508 = vmatprep.mubr.msk.f32.mxu0 %vm605_vm0, %v7354_v62  ;;  %v2229_v62 = vrot.slane %v7093_v34, 2  ;;  %v2233_v34 = vrot.slane %v7095_v35, 2  ;;  %v2268_v51 = vrot.slane %v7193_v52, 2  ;;  %v7770_v11 = vsel %vm2217_vm4, %v2269_v4, %v2271_v10 }
  0xbd   : > { %v7725_v48 = vsel %vm2217_vm4, %v2258_v19, %v2259_v24  ;;  %v7742_v50 = vsel %vm2217_vm4, %v2263_v49, %v2264_v27 }
  0xbe   : > { %6562 = vmatmul.mubr.msk.f32.gmra.mxu1 %vm605_vm0, %v7584_v32  ;;  %v7618_v33 = vsel %vm2217_vm4, %v2228_v31, %v2229_v62  ;;  %v7759_v52 = vsel %vm2217_vm4, %v2268_v51, %v2269_v4  ;;  %v2276_v31 = vrot.slane %v7442_v20, 2 }
  0xbf   : > { %6509 = vmatmul.mubr.msk.f32.gmra.mxu0 %vm605_vm0, %v7372_v6  ;;  %6564 = vmatprep.mubr.msk.f32.mxu1 %vm605_vm0, %v1998_v40  ;;  %v2231_v6 = vrot.slane %v7245_v7, 2  ;;  %v9814_v40 = vld [vmem:[#allocation8_spill] sm:$0xff] }
  0xc0   : > { %6511 = vmatprep.mubr.msk.f32.mxu0 %vm605_vm0, %v7379_v14  ;;  %v2234_v14 = vrot.slane %v7097_v36, 2  ;;  %v2238_v36 = vrot.slane %v7102_v37, 2  ;;  %v2266_v55 = vrot.slane %v9814_v40, 2 }
  0xc1   : > { %v7629_v7 = vsel %vm2217_vm4, %v2229_v62, %v2231_v6  ;;  %v2539_v62 = vrot.slane %v7265_v12, 2 }
  0xc2   : > { %6565 = vmatmul.mubr.msk.f32.gmra.mxu1 %vm605_vm0, %v2000_v60  ;;  %v7635_v35 = vsel %vm2217_vm4, %v2233_v34, %v2234_v14  ;;  %v7753_v60 = vsel %vm2217_vm4, %v2264_v27, %v2266_v55 }
  0xc3   : > { %6512 = vmatmul.mubr.msk.f32.gmra.mxu0 %vm605_vm0, %v7394_v21  ;;  %6607 = vmatprep.mubr.msk.f32.mxu1 %vm605_vm0, %v7602_v30  ;;  %v2236_v21 = vrot.slane %v7272_v16, 2 }
  0xc4   : > { %6514 = vmatprep.mubr.msk.f32.mxu0 %vm605_vm0, %v7400_v25  ;;  %v2239_v25 = vrot.slane %v7112_v38, 2  ;;  %v2243_v38 = vrot.slane %v7122_v41, 2 }
  0xc5   : > { %v7646_v16 = vsel %vm2217_vm4, %v2234_v14, %v2236_v21 }
  0xc6   : > { %6608 = vmatmul.mubr.msk.f32.vlgmr.msra.gmra.mxu1 %vm605_vm0, %v7612_v0  ;;  %v7652_v37 = vsel %vm2217_vm4, %v2238_v36, %v2239_v25 }
  0xc7   : > { %6515 = vmatmul.mubr.msk.f32.gmra.mxu0 %vm605_vm0, %v7413_v45  ;;  %6610 = vmatprep.mubr.msk.f32.mxu1 %vm605_vm0, %v7618_v33  ;;  %v2241_v45 = vrot.slane %v7295_v22, 2 }
  0xc8   : > { %6517 = vmatprep.mubr.msk.f32.mxu0 %vm605_vm0, %v7419_v61  ;;  %v2244_v61 = vrot.slane %v7135_v42, 2  ;;  %v2248_v42 = vrot.slane %v7138_v43, 2  ;;  %v2251_v43 = vrot.slane %v7339_v56, 2  ;;  %v2256_v56 = vrot.slane %v7358_v3, 2 }
  0xc9   : > { %v7663_v22 = vsel %vm2217_vm4, %v2239_v25, %v2241_v45 }
  0xca   : > { %6611 = vmatmul.mubr.msk.f32.gmra.mxu1 %vm605_vm0, %v7629_v7  ;;  %v7669_v41 = vsel %vm2217_vm4, %v2243_v38, %v2244_v61 }
  0xcb   : > { %6518 = vmatmul.mubr.msk.f32.gmra.mxu0 %vm605_vm0, %v7432_v15  ;;  %6613 = vmatprep.mubr.msk.f32.mxu1 %vm605_vm0, %v7635_v35  ;;  %v2246_v15 = vrot.slane %v7319_v29, 2 }
  0xcc   : > { %6520 = vmatprep.mubr.msk.f32.mxu0 %vm605_vm0, %v7438_v23  ;;  %v2249_v23 = vrot.slane %v7148_v44, 2  ;;  %v2221_v44 = vrot.slane %v7209_v57, 2 }
  0xcd   : > { %v7682_v29 = vsel %vm2217_vm4, %v2244_v61, %v2246_v15 }
  0xce   : > { %6614 = vmatmul.mubr.msk.f32.gmra.mxu1 %vm605_vm0, %v7646_v16  ;;  %v7701_v57 = vsel %vm2217_vm4, %v2249_v23, %v2251_v43  ;;  %v2222_v46 = vsel %vm2217_vm4, %v2219_v17, %v2221_v44 }
  0xcf   : > { %6521 = vmatmul.mubr.msk.f32.gmra.mxu0 %vm605_vm0, %v7451_v28  ;;  %6616 = vmatprep.mubr.msk.f32.mxu1 %vm605_vm0, %v7652_v37  ;;  %v2218_v28 = vrot.slane %v7201_v53, 2  ;;  %v7689_v53 = vsel %vm2217_vm4, %v2248_v42, %v2249_v23 }
  0xd0   : > { %6523 = vmatprep.mubr.msk.f32.mxu0 %vm605_vm0, %v7457_v63  ;;  %v2254_v63 = vrot.slane %v7167_v47, 2 }
  0xd2   : > { %6617 = vmatmul.mubr.msk.f32.gmra.mxu1 %vm605_vm0, %v7663_v22  ;;  %v7707_v47 = vsel %vm2217_vm4, %v2253_v54, %v2254_v63  ;;  %v7717_v3 = vsel %vm2217_vm4, %v2254_v63, %v2256_v56 }
  0xd3   : > { %6524 = vmatmul.mubr.msk.f32.gmra.mxu0 %vm605_vm0, %v7466_v2  ;;  %6619 = vmatprep.mubr.msk.f32.mxu1 %vm605_vm0, %v7669_v41  ;;  %v2220_v2 = vsel %vm2217_vm4, %v2218_v28, %v2219_v17 }
  0xd4   : > { %6526 = vmatprep.mubr.msk.f32.mxu0 %vm605_vm0, %v7573_v26  ;;  %v9813_v26 = vld [vmem:[#allocation7_spill] sm:$0xff] }
  0xd6   : > { %6620 = vmatmul.mubr.msk.f32.gmra.mxu1 %vm605_vm0, %v7682_v29 }
  0xd7   : > { %6527 = vmatmul.mubr.msk.f32.gmra.mxu0 %vm605_vm0, %v7584_v32  ;;  %6622 = vmatprep.mubr.msk.f32.mxu1 %vm605_vm0, %v7689_v53  ;;  %v2261_v32 = vrot.slane %v9813_v26, 2 }
  0xd8   : > { %6569 = vmatprep.mubr.msk.f32.mxu0 %vm605_vm0, %v2220_v2 }
  0xda   : > { %6623 = vmatmul.mubr.msk.f32.gmra.mxu1 %vm605_vm0, %v7701_v57 }
  0xdb   : > { %6570 = vmatmul.mubr.msk.f32.vlgmr.msra.gmra.mxu0 %vm605_vm0, %v2222_v46  ;;  %6625 = vmatprep.mubr.msk.f32.mxu1 %vm605_vm0, %v7707_v47 }
  0xdc   : > { %6644 = vmatpush3.msk.msra.mxu0 %vm839_vm2, %v7529_v18  ;;  %6572 = vmatprep.mubr.msk.f32.mxu0 %vm605_vm0, %v7602_v30  ;;  %v7736_v18 = vsel %vm2217_vm4, %v2259_v24, %v2261_v32  ;;  %v2274_v30 = vrot.slane %v7229_v1, 2  ;;  %v2538_v1 = vrot.slane %v7247_v8, 2 }
  0xde   : > { %6626 = vmatmul.mubr.msk.f32.gmra.mxu1 %vm605_vm0, %v7717_v3  ;;  %v7776_v59 = vsel %vm2217_vm4, %v2273_v58, %v2274_v30  ;;  %v7787_v20 = vsel %vm2217_vm4, %v2274_v30, %v2276_v31  ;;  %v7793_v8 = vsel %vm2217_vm4, %v2538_v1, %v2539_v62 }
  0xdf   : > { %6573 = vmatmul.mubr.msk.f32.gmra.mxu0 %vm605_vm0, %v7612_v0  ;;  %6628 = vmatprep.mubr.msk.f32.mxu1 %vm605_vm0, %v7725_v48  ;;  %v2541_v0 = vrot.slane %v7559_v13, 2 }
  0xe0   : > { %6575 = vmatprep.mubr.msk.f32.mxu0 %vm605_vm0, %v7618_v33 }
  0xe1   : > { %v7802_v12 = vsel %vm2217_vm4, %v2539_v62, %v2541_v0 }
  0xe2   : > { %6629 = vmatmul.mubr.msk.f32.gmra.mxu1 %vm605_vm0, %v7736_v18 }
  0xe3   : > { %6576 = vmatmul.mubr.msk.f32.gmra.mxu0 %vm605_vm0, %v7629_v7  ;;  %6631 = vmatprep.mubr.msk.f32.mxu1 %vm605_vm0, %v7742_v50 }
  0xe4   : > { %6578 = vmatprep.mubr.msk.f32.mxu0 %vm605_vm0, %v7635_v35 }
  0xe6   : > { %6632 = vmatmul.mubr.msk.f32.gmra.mxu1 %vm605_vm0, %v7753_v60 }
  0xe7   : > { %6579 = vmatmul.mubr.msk.f32.gmra.mxu0 %vm605_vm0, %v7646_v16  ;;  %6634 = vmatprep.mubr.msk.f32.mxu1 %vm605_vm0, %v7759_v52 }
  0xe8   : > { %6581 = vmatprep.mubr.msk.f32.mxu0 %vm605_vm0, %v7652_v37 }
  0xea   : > { %6635 = vmatmul.mubr.msk.f32.gmra.mxu1 %vm605_vm0, %v7770_v11 }
  0xeb   : > { %6582 = vmatmul.mubr.msk.f32.gmra.mxu0 %vm605_vm0, %v7663_v22  ;;  %6637 = vmatprep.mubr.msk.f32.mxu1 %vm605_vm0, %v7776_v59 }
  0xec   : > { %6584 = vmatprep.mubr.msk.f32.mxu0 %vm605_vm0, %v7669_v41 }
  0xee   : > { %6638 = vmatmul.mubr.msk.f32.gmra.mxu1 %vm605_vm0, %v7787_v20 }
  0xef   : > { %6585 = vmatmul.mubr.msk.f32.gmra.mxu0 %vm605_vm0, %v7682_v29  ;;  %6640 = vmatprep.mubr.msk.f32.mxu1 %vm605_vm0, %v7793_v8 }
  0xf0   : > { %6587 = vmatprep.mubr.msk.f32.mxu0 %vm605_vm0, %v7689_v53 }
  0xf2   : > { %6641 = vmatmul.mubr.msk.f32.gmra.mxu1 %vm605_vm0, %v7802_v12 }
  0xf3   : > { %6588 = vmatmul.mubr.msk.f32.gmra.mxu0 %vm605_vm0, %v7701_v57 }
  0xf4   : > { %6590 = vmatprep.mubr.msk.f32.mxu0 %vm605_vm0, %v7707_v47 }
  0xf7   : > { %6591 = vmatmul.mubr.msk.f32.gmra.mxu0 %vm605_vm0, %v7717_v3 }
  0xf8   : > { %6593 = vmatprep.mubr.msk.f32.mxu0 %vm605_vm0, %v7725_v48 }
  0xfb   : > { %6594 = vmatmul.mubr.msk.f32.gmra.mxu0 %vm605_vm0, %v7736_v18 }
  0xfc   : > { %6596 = vmatprep.mubr.msk.f32.mxu0 %vm605_vm0, %v7742_v50 }
  0xff   : > { %v7820_v13 = vpop.f32.mrf.mxu0  ;;  %6597 = vmatmul.mubr.msk.f32.gmra.mxu0 %vm605_vm0, %v7753_v60 }
 0x100   : > { %6599 = vmatprep.mubr.msk.f32.mxu0 %vm605_vm0, %v7759_v52 }
 0x101   : > { %v7826_v6 = vpop.f32.mrf.mxu0 }
 0x102   : > { %v6390_v34 = vpop.f32.mrf.mxu1 }
 0x103   : > { %v7828_v14 = vpop.f32.mrf.mxu0  ;;  %6600 = vmatmul.mubr.msk.f32.gmra.mxu0 %vm605_vm0, %v7770_v11 }
 0x104   : > { %6602 = vmatprep.mubr.msk.f32.mxu0 %vm605_vm0, %v7776_v59  ;;  %v1133_v21 = vpop.f32.mrf.mxu1 }
 0x105   : > { %v7834_v36 = vpop.f32.mrf.mxu0 }
 0x106   : > { %v6393_v25 = vpop.f32.mrf.mxu1 }
 0x107   : > { %v7836_v45 = vpop.f32.mrf.mxu0  ;;  %6603 = vmatmul.mubr.msk.f32.gmra.mxu0 %vm605_vm0, %v7787_v20 }
 0x108   : > { %6645 = vmatprep.mubr.msk.f32.mxu0 %vm605_vm0, %v7618_v33  ;;  %v1143_v38 = vpop.f32.mrf.mxu1 }
 0x109   : > { %v7842_v61 = vpop.f32.mrf.mxu0 }
 0x10a   : > { %v6396_v15 = vpop.f32.mrf.mxu1 }
 0x10b   : > { %v6352_v42 = vpop.f32.mrf.mxu0  ;;  %6646 = vmatmul.mubr.msk.f32.vlgmr.msra.gmra.mxu0 %vm605_vm0, %v7629_v7 }
 0x10c   : > { %v7846_v23 = vadd.f32 %v6390_v34, %v6352_v42  ;;  %6648 = vmatprep.mubr.msk.f32.mxu0 %vm605_vm0, %v7635_v35  ;;  %v1153_v28 = vpop.f32.mrf.mxu1 }
 0x10d   : > { %v939_v17 = vpop.f32.mrf.mxu0 }
 0x10e   : > { %v7850_v43 = vadd.f32 %v1133_v21, %v939_v17  ;;  %v6399_v44 = vpop.f32.mrf.mxu1  ;;  %v2759_v17 = vrot.slane %v7504_v9, 2 }
 0x10f   : > { %v6355_v54 = vpop.f32.mrf.mxu0  ;;  %6649 = vmatmul.mubr.msk.f32.gmra.mxu0 %vm605_vm0, %v7646_v16 }
 0x110   : > { %v7854_v33 = vadd.f32 %v6393_v25, %v6355_v54  ;;  %6651 = vmatprep.mubr.msk.f32.mxu0 %vm605_vm0, %v7652_v37  ;;  %v1163_v7 = vpop.f32.mrf.mxu1 }
 0x111   : > { %v949_v63 = vpop.f32.mrf.mxu0 }
 0x112   : > { %v7858_v2 = vadd.f32 %v1143_v38, %v949_v63  ;;  %v6402_v56 = vpop.f32.mrf.mxu1 }
 0x113   : > { %v6358_v35 = vpop.f32.mrf.mxu0  ;;  %6652 = vmatmul.mubr.msk.f32.gmra.mxu0 %vm605_vm0, %v7663_v22 }
 0x114   : > { %v7862_v46 = vadd.f32 %v6396_v15, %v6358_v35  ;;  %6654 = vmatprep.mubr.msk.f32.mxu0 %vm605_vm0, %v7669_v41  ;;  %v1173_v16 = vpop.f32.mrf.mxu1 }
 0x115   : > { %v959_v19 = vpop.f32.mrf.mxu0 }
 0x116   : > { %v7866_v24 = vadd.f32 %v1153_v28, %v959_v19  ;;  %v6405_v26 = vpop.f32.mrf.mxu1 }
 0x117   : > { %v6361_v37 = vpop.f32.mrf.mxu0  ;;  %6655 = vmatmul.mubr.msk.f32.gmra.mxu0 %vm605_vm0, %v7682_v29 }
 0x118   : > { %v7870_v32 = vadd.f32 %v6399_v44, %v6361_v37  ;;  %6657 = vmatprep.mubr.msk.f32.mxu0 %vm605_vm0, %v7689_v53  ;;  %v1183_v22 = vpop.f32.mrf.mxu1  ;;  %v2760_v44 = vrot.slane %v7514_v39, 2 }
 0x119   : > { %v969_v49 = vpop.f32.mrf.mxu0 }
 0x11a   : > { %v7874_v27 = vadd.f32 %v1163_v7, %v969_v49  ;;  %v6408_v40 = vpop.f32.mrf.mxu1  ;;  %v2761_v9 = vsel %vm2217_vm4, %v2759_v17, %v2760_v44 }
 0x11b   : > { %v6364_v41 = vpop.f32.mrf.mxu0  ;;  %6658 = vmatmul.mubr.msk.f32.gmra.mxu0 %vm605_vm0, %v7701_v57 }
 0x11c   : > { %v7878_v55 = vadd.f32 %v6402_v56, %v6364_v41  ;;  %6660 = vmatprep.mubr.msk.f32.mxu0 %vm605_vm0, %v7707_v47  ;;  %v1193_v29 = vpop.f32.mrf.mxu1 }
 0x11d   : > { %v979_v51 = vpop.f32.mrf.mxu0 }
 0x11e   : > { %v7882_v4 = vadd.f32 %v1173_v16, %v979_v51  ;;  %v6411_v10 = vpop.f32.mrf.mxu1 }
 0x11f   : > { %v6367_v53 = vpop.f32.mrf.mxu0  ;;  %6661 = vmatmul.mubr.msk.f32.gmra.mxu0 %vm605_vm0, %v7717_v3 }
 0x120   : > { %v7886_v58 = vadd.f32 %v6405_v26, %v6367_v53  ;;  %6663 = vmatprep.mubr.msk.f32.mxu0 %vm605_vm0, %v7725_v48  ;;  %v1203_v57 = vpop.f32.mrf.mxu1 }
 0x121   : > { %v989_v30 = vpop.f32.mrf.mxu0 }
 0x122   : > { %v7890_v31 = vadd.f32 %v1183_v22, %v989_v30  ;;  %v6414_v1 = vpop.f32.mrf.mxu1 }
 0x123   : > { %v6370_v47 = vpop.f32.mrf.mxu0  ;;  %6664 = vmatmul.mubr.msk.f32.gmra.mxu0 %vm605_vm0, %v7736_v18 }
 0x124   : > { %v7894_v62 = vadd.f32 %v6408_v40, %v6370_v47  ;;  %6666 = vmatprep.mubr.msk.f32.mxu0 %vm605_vm0, %v7742_v50  ;;  %v1213_v3 = vpop.f32.mrf.mxu1 }
 0x125   : > { %v999_v0 = vpop.f32.mrf.mxu0 }
 0x126   : > { %v7898_v34 = vadd.f32 %v1193_v29, %v999_v0  ;;  %v6457_v21 = vpop.f32.mrf.mxu1 }
 0x127   : > { %v6373_v48 = vpop.f32.mrf.mxu0  ;;  %6667 = vmatmul.mubr.msk.f32.gmra.mxu0 %vm605_vm0, %v7753_v60 }
 0x128   : > { %v7902_v25 = vadd.f32 %v6411_v10, %v6373_v48  ;;  %6669 = vmatprep.mubr.msk.f32.mxu0 %vm605_vm0, %v7759_v52  ;;  %v1630_v18 = vpop.f32.mrf.mxu1 }
 0x129   : > { %v1009_v38 = vpop.f32.mrf.mxu0 }
 0x12a   : > { %v7906_v15 = vadd.f32 %v1203_v57, %v1009_v38  ;;  %v6460_v42 = vpop.f32.mrf.mxu1 }
 0x12b   : > { %v6376_v50 = vpop.f32.mrf.mxu0  ;;  %6670 = vmatmul.mubr.msk.f32.gmra.mxu0 %vm605_vm0, %v7770_v11 }
 0x12c   : > { %v7910_v28 = vadd.f32 %v6414_v1, %v6376_v50  ;;  %6672 = vmatprep.mubr.msk.f32.mxu0 %vm605_vm0, %v7776_v59  ;;  %v1640_v60 = vpop.f32.mrf.mxu1  ;;  %v2762_v59 = vrot.slane %v7575_v5, 2 }
 0x12d   : > { %v1019_v52 = vpop.f32.mrf.mxu0 }
 0x12e   : > { %v7916_v54 = vadd.f32 %v1213_v3, %v1019_v52  ;;  %v6463_v7 = vpop.f32.mrf.mxu1 }
 0x12f   : > { %v6381_v63 = vpop.f32.mrf.mxu0  ;;  %6673 = vmatmul.mubr.msk.f32.gmra.mxu0 %vm605_vm0, %v7787_v20 }
 0x130   : > { %v1109_v11 = vadd.f32 %v6381_v63, %v7820_v13  ;;  %6675 = vmatprep.mubr.msk.f32.mxu0 %vm605_vm0, %v7793_v8  ;;  %v1650_v56 = vpop.f32.mrf.mxu1  ;;  %v2763_v13 = vsel %vm2217_vm4, %v2760_v44, %v2762_v59 }
 0x131   : > { %v1103_v35 = vpop.f32.mrf.mxu0 }
 0x132   : > { %v1104_v39 = vadd.f32 %v1103_v35, %v7826_v6  ;;  %v6466_v16 = vpop.f32.mrf.mxu1 }
 0x133   : > { %v6384_v19 = vpop.f32.mrf.mxu0  ;;  %6676 = vmatmul.mubr.msk.f32.gmra.mxu0 %vm605_vm0, %v7802_v12 }
 0x134   : > { %v1119_v20 = vadd.f32 %v6384_v19, %v7828_v14  ;;  %6678 = vmatprep.mubr.msk.f32.mxu0 %vm605_vm0, %v2761_v9  ;;  %v1660_v8 = vpop.f32.mrf.mxu1 }
 0x135   : > { %v1113_v26 = vpop.f32.mrf.mxu0 }
 0x136   : > { %v1114_v5 = vadd.f32 %v1113_v26, %v7834_v36  ;;  %v6469_v37 = vpop.f32.mrf.mxu1 }
 0x137   : > { %v6387_v22 = vpop.f32.mrf.mxu0  ;;  %6679 = vmatmul.mubr.msk.f32.gmra.mxu0 %vm605_vm0, %v2763_v13 }
 0x138   : > { %v1129_v6 = vadd.f32 %v6387_v22, %v7836_v45  ;;  %v1670_v49 = vpop.f32.mrf.mxu1 }
 0x139   : > { %v1123_v40 = vpop.f32.mrf.mxu0 }
 0x13a   : > { %v1124_v12 = vadd.f32 %v1123_v40, %v7842_v61  ;;  %v6472_v41 = vpop.f32.mrf.mxu1 }
 0x13b   : > { %v6419_v14 = vpop.f32.mrf.mxu0 }
 0x13c   : > { %v1417_v29 = vadd.f32 %v6419_v14, %v1109_v11  ;;  %v1680_v51 = vpop.f32.mrf.mxu1 }
 0x13d   : > { %v1297_v10 = vpop.f32.mrf.mxu0 }
 0x13e   : > { %v1416_v53 = vadd.f32 %v1297_v10, %v1104_v39  ;;  %v7935_v57 = vadd.f32 %v6457_v21, %v1417_v29  ;;  %v6475_v30 = vpop.f32.mrf.mxu1 }
 0x13f   : > { %v6422_v36 = vpop.f32.mrf.mxu0 }
 0x140   : > { %v1419_v1 = vadd.f32 %v6422_v36, %v1119_v20  ;;  %v7937_v47 = vadd.f32 %v1630_v18, %v1416_v53  ;;  %v1690_v3 = vpop.f32.mrf.mxu1 }
 0x141   : > { %v1307_v0 = vpop.f32.mrf.mxu0 }
 0x142   : > { %v1418_v45 = vadd.f32 %v1307_v0, %v1114_v5  ;;  %v7939_v48 = vadd.f32 %v6460_v42, %v1419_v1  ;;  %v6478_v38 = vpop.f32.mrf.mxu1 }
 0x143   : > { %v6425_v61 = vpop.f32.mrf.mxu0 }
 0x144   : > { %v1421_v50 = vadd.f32 %v6425_v61, %v1129_v6  ;;  %v7941_v17 = vadd.f32 %v1640_v60, %v1418_v45  ;;  %v1700_v44 = vpop.f32.mrf.mxu1 }
 0x145   : > { %v1317_v52 = vpop.f32.mrf.mxu0 }
 0x146   : > { %v1420_v63 = vadd.f32 %v1317_v52, %v1124_v12  ;;  %v7943_v21 = vadd.f32 %v6463_v7, %v1421_v50  ;;  %v6481_v11 = vpop.f32.mrf.mxu1 }
 0x147   : > { %v6428_v59 = vpop.f32.mrf.mxu0 }
 0x148   : > { %v1423_v18 = vadd.f32 %v6428_v59, %v7846_v23  ;;  %v7946_v35 = vadd.f32 %v1650_v56, %v1420_v63  ;;  %v1710_v9 = vpop.f32.mrf.mxu1 }
 0x149   : > { %v1327_v39 = vpop.f32.mrf.mxu0 }
 0x14a   : > { %v1422_v42 = vadd.f32 %v1327_v39, %v7850_v43  ;;  %v7949_v19 = vadd.f32 %v6466_v16, %v1423_v18  ;;  %v6484_v20 = vpop.f32.mrf.mxu1 }
 0x14b   : > { %v6431_v60 = vpop.f32.mrf.mxu0 }
 0x14c   : > { %v1425_v13 = vadd.f32 %v6431_v60, %v7854_v33  ;;  %v7952_v26 = vadd.f32 %v1660_v8, %v1422_v42  ;;  %v1720_v7 = vpop.f32.mrf.mxu1 }
 0x14d   : > { %v1337_v5 = vpop.f32.mrf.mxu0 }
 0x14e   : > { %v1424_v22 = vadd.f32 %v1337_v5, %v7858_v2  ;;  %v7955_v6 = vadd.f32 %v6469_v37, %v1425_v13  ;;  %v6487_v23 = vpop.f32.mrf.mxu1 }
 0x14f   : > { %v6434_v56 = vpop.f32.mrf.mxu0 }
 0x150   : > { %v1427_v40 = vadd.f32 %v6434_v56, %v7862_v46  ;;  %v7958_v12 = vadd.f32 %v1670_v49, %v1424_v22  ;;  %v1730_v43 = vpop.f32.mrf.mxu1 }
 0x151   : > { %v1347_v16 = vpop.f32.mrf.mxu0 }
 0x152   : > { %v1426_v14 = vadd.f32 %v1347_v16, %v7866_v24  ;;  %v7961_v29 = vadd.f32 %v6472_v41, %v1427_v40  ;;  %v6490_v33 = vpop.f32.mrf.mxu1 }
 0x153   : > { %v6437_v8 = vpop.f32.mrf.mxu0 }
 0x154   : > { %v1429_v10 = vadd.f32 %v6437_v8, %v7870_v32  ;;  %v7964_v53 = vadd.f32 %v1680_v51, %v1426_v14  ;;  %v1740_v2 = vpop.f32.mrf.mxu1 }
 0x155   : > { %v1357_v37 = vpop.f32.mrf.mxu0 }
 0x156   : > { %v1428_v36 = vadd.f32 %v1357_v37, %v7874_v27  ;;  %v7967_v1 = vadd.f32 %v6475_v30, %v1429_v10  ;;  %v7969_v46 = vpop.f32.mrf.mxu1 }
 0x157   : > { %v6440_v49 = vpop.f32.mrf.mxu0 }
 0x158   : > { %v1431_v0 = vadd.f32 %v6440_v49, %v7878_v55  ;;  %v7972_v24 = vadd.f32 %v1690_v3, %v1428_v36  ;;  %v7974_v41 = vpop.f32.mrf.mxu1 }
 0x159   : > { %v1367_v45 = vpop.f32.mrf.mxu0 }
 0x15a   : > { %v1430_v32 = vadd.f32 %v1367_v45, %v7882_v4  ;;  %v7977_v51 = vadd.f32 %v6478_v38, %v1431_v0  ;;  %v7979_v61 = vpop.f32.mrf.mxu1 }
 0x15b   : > { %v6443_v50 = vpop.f32.mrf.mxu0 }
 0x15c   : > { %v1433_v27 = vadd.f32 %v6443_v50, %v7886_v58  ;;  %v7982_v30 = vadd.f32 %v1700_v44, %v1430_v32  ;;  %v7984_v52 = vpop.f32.mrf.mxu1 }
 0x15d   : > { %v1377_v63 = vpop.f32.mrf.mxu0 }
 0x15e   : > { %v1432_v55 = vadd.f32 %v1377_v63, %v7890_v31  ;;  %v7987_v3 = vadd.f32 %v6481_v11, %v1433_v27  ;;  %v7989_v59 = vpop.f32.mrf.mxu1 }
 0x15f   : > { %v6446_v18 = vpop.f32.mrf.mxu0 }
 0x160   : > { %v1435_v4 = vadd.f32 %v6446_v18, %v7894_v62  ;;  %v7992_v38 = vadd.f32 %v1710_v9, %v1432_v55  ;;  %v7994_v39 = vpop.f32.mrf.mxu1 }
 0x161   : > { %v1387_v42 = vpop.f32.mrf.mxu0 }
 0x162   : > { %v1434_v58 = vadd.f32 %v1387_v42, %v7898_v34  ;;  %v7997_v44 = vadd.f32 %v6484_v20, %v1435_v4  ;;  %v7999_v60 = vpop.f32.mrf.mxu1 }
 0x163   : > { %v6449_v13 = vpop.f32.mrf.mxu0 }
 0x164   : > { %v1437_v31 = vadd.f32 %v6449_v13, %v7902_v25  ;;  %v8002_v11 = vadd.f32 %v1720_v7, %v1434_v58  ;;  %v8004_v5 = vpop.f32.mrf.mxu1 }
 0x165   : > { %v1397_v22 = vpop.f32.mrf.mxu0 }
 0x166   : > { %v1436_v62 = vadd.f32 %v1397_v22, %v7906_v15  ;;  %v8007_v9 = vadd.f32 %v6487_v23, %v1437_v31  ;;  %v8009_v56 = vpop.f32.mrf.mxu1 }
 0x167   : > { %v6452_v40 = vpop.f32.mrf.mxu0 }
 0x168   : > { %v1439_v34 = vadd.f32 %v6452_v40, %v7910_v28  ;;  %v8012_v20 = vadd.f32 %v1730_v43, %v1436_v62  ;;  %v8014_v16 = vpop.f32.mrf.mxu1 }
 0x169   : > { %v1407_v14 = vpop.f32.mrf.mxu0 }
 0x16a   : > { %v1438_v25 = vadd.f32 %v1407_v14, %v7916_v54  ;;  %v1772_v7 = vadd.f32 %v6490_v33, %v1439_v34  ;;  %v8017_v8 = vpop.f32.mrf.mxu1 }
 0x16b   : > { %v6495_v10 = vpop.f32.mrf.mxu0 }
 0x16c   : > { %v1771_v37 = vadd.f32 %v1740_v2, %v1438_v25  ;;  %v8020_v15 = vadd.f32 %v6495_v10, %v7935_v57  ;;  %v8022_v23 = vpop.f32.mrf.mxu1 }
 0x16d   : > { %v1852_v36 = vpop.f32.mrf.mxu0 }
 0x16e   : > { %v8025_v28 = vadd.f32 %v1852_v36, %v7937_v47  ;;  %v8027_v43 = vpop.f32.mrf.mxu1 }
 0x16f   : > { %v6498_v49 = vpop.f32.mrf.mxu0 }
 0x170   : > { %v8030_v0 = vadd.f32 %v6498_v49, %v7939_v48  ;;  %v8032_v54 = vpop.f32.mrf.mxu1 }
 0x171   : > { %v1862_v33 = vpop.f32.mrf.mxu0 }
 0x172   : > { %v8035_v2 = vadd.f32 %v1862_v33, %v7941_v17  ;;  %v8037_v57 = vpop.f32.mrf.mxu1 }
 0x173   : > { %v6501_v45 = vpop.f32.mrf.mxu0 }
 0x174   : > { %v8040_v32 = vadd.f32 %v6501_v45, %v7943_v21  ;;  %v8042_v50 = vpop.f32.mrf.mxu1 }
 0x175   : > { %v1872_v47 = vpop.f32.mrf.mxu0  ;;  %9815 = vst [vmem:[#allocation7_spill] sm:$0xff] %v8042_v50 }
 0x176   : > { %v8045_v27 = vadd.f32 %v1872_v47, %v7946_v35  ;;  %v8050_v18 = vpop.f32.mrf.mxu1 }
 0x177   : > { %v6504_v48 = vpop.f32.mrf.mxu0  ;;  %9816 = vst [vmem:[#allocation8_spill] sm:$0xff] %v8050_v18 }
 0x178   : > { %v8048_v63 = vadd.f32 %v6504_v48, %v7949_v19  ;;  %v8058_v58 = vpop.f32.mrf.mxu1 }
 0x179   : > { %v1882_v55 = vpop.f32.mrf.mxu0  ;;  %9817 = vst [vmem:[#allocation9_spill] sm:$0xff] %v8058_v58 }
 0x17a   : > { %v8053_v17 = vadd.f32 %v1882_v55, %v7952_v26  ;;  %v8066_v22 = vpop.f32.mrf.mxu1 }
 0x17b   : > { %v6507_v4 = vpop.f32.mrf.mxu0  ;;  %9818 = vst [vmem:[#allocation10_spill] sm:$0xff] %v8066_v22 }
 0x17c   : > { %v8056_v21 = vadd.f32 %v6507_v4, %v7955_v6  ;;  %v8074_v34 = vpop.f32.mrf.mxu1 }
 0x17d   : > { %v1892_v42 = vpop.f32.mrf.mxu0  ;;  %9819 = vst [vmem:[#allocation11_spill] sm:$0xff] %v8074_v34 }
 0x17e   : > { %v8061_v35 = vadd.f32 %v1892_v42, %v7958_v12  ;;  %v8082_v10 = vpop.f32.mrf.mxu1 }
 0x17f   : > { %v6510_v13 = vpop.f32.mrf.mxu0  ;;  %9820 = vst [vmem:[#allocation12_spill] sm:$0xff] %v8082_v10 }
 0x180   : > { %v8064_v19 = vadd.f32 %v6510_v13, %v7961_v29  ;;  %v8090_v33 = vpop.f32.mrf.mxu1 }
 0x181   : > { %v1902_v31 = vpop.f32.mrf.mxu0  ;;  %9823 = vst [vmem:[#allocation15_spill] sm:$0xff] %v8090_v33 }
 0x182   : > { %v8069_v26 = vadd.f32 %v1902_v31, %v7964_v53  ;;  %v8098_v48 = vpop.f32.mrf.mxu1 }
 0x183   : > { %v6513_v62 = vpop.f32.mrf.mxu0  ;;  %9826 = vst [vmem:[#allocation18_spill] sm:$0xff] %v8098_v48 }
 0x184   : > { %v8072_v6 = vadd.f32 %v6513_v62, %v7967_v1  ;;  %v8106_v42 = vpop.f32.mrf.mxu1 }
 0x185   : > { %v1912_v40 = vpop.f32.mrf.mxu0  ;;  %9829 = vst [vmem:[#allocation21_spill] sm:$0xff] %v8106_v42 }
 0x186   : > { %v8077_v12 = vadd.f32 %v1912_v40, %v7972_v24  ;;  %v6609_v62 = vpop.f32.mrf.mxu1 }
 0x187   : > { %v6516_v14 = vpop.f32.mrf.mxu0 }
 0x188   : > { %v8080_v29 = vadd.f32 %v6516_v14, %v7977_v51 }
 0x189   : > { %v1922_v25 = vpop.f32.mrf.mxu0 }
 0x18a   : > { %v8085_v53 = vadd.f32 %v1922_v25, %v7982_v30  ;;  %v2616_v25 = vpop.f32.mrf.mxu1 }
 0x18b   : > { %v6519_v36 = vpop.f32.mrf.mxu0 }
 0x18c   : > { %9821 = vst [vmem:[#allocation13_spill] sm:$0xff] %v8085_v53  ;;  %v8088_v1 = vadd.f32 %v6519_v36, %v7987_v3 }
 0x18d   : > { %v1932_v49 = vpop.f32.mrf.mxu0 }
 0x18e   : > { %9822 = vst [vmem:[#allocation14_spill] sm:$0xff] %v8088_v1  ;;  %v8093_v24 = vadd.f32 %v1932_v49, %v7992_v38 }
 0x18f   : > { %v6522_v45 = vpop.f32.mrf.mxu0 }
 0x190   : > { %9824 = vst [vmem:[#allocation16_spill] sm:$0xff] %v8093_v24  ;;  %v8096_v51 = vadd.f32 %v6522_v45, %v7997_v44 }
 0x191   : > { %v1942_v47 = vpop.f32.mrf.mxu0 }
 0x192   : > { %9825 = vst [vmem:[#allocation17_spill] sm:$0xff] %v8096_v51  ;;  %v8101_v30 = vadd.f32 %v1942_v47, %v8002_v11 }
 0x193   : > { %v6525_v55 = vpop.f32.mrf.mxu0 }
 0x194   : > { %9827 = vst [vmem:[#allocation19_spill] sm:$0xff] %v8101_v30  ;;  %v8104_v3 = vadd.f32 %v6525_v55, %v8007_v9  ;;  %v6612_v9 = vpop.f32.mrf.mxu1 }
 0x195   : > { %v1952_v4 = vpop.f32.mrf.mxu0 }
 0x196   : > { %9828 = vst [vmem:[#allocation20_spill] sm:$0xff] %v8104_v3  ;;  %v8109_v38 = vadd.f32 %v1952_v4, %v8012_v20  ;;  %v2626_v47 = vpop.f32.mrf.mxu1 }
 0x197   : > { %v6528_v13 = vpop.f32.mrf.mxu0 }
 0x198   : > { %9830 = vst [vmem:[#allocation22_spill] sm:$0xff] %v8109_v38  ;;  %v8111_v31 = vadd.f32 %v6528_v13, %v1772_v7  ;;  %v6615_v48 = vpop.f32.mrf.mxu1 }
 0x199   : > { %v1962_v44 = vpop.f32.mrf.mxu0 }
 0x19a   : > { %9831 = vst [vmem:[#allocation23_spill] sm:$0xff] %v8111_v31  ;;  %v8113_v40 = vadd.f32 %v1962_v44, %v1771_v37  ;;  %v2636_v7 = vpop.f32.mrf.mxu1 }
 0x19b   : > { %v6571_v14 = vpop.f32.mrf.mxu0 }
 0x19c   : > { %9832 = vst [vmem:[#allocation24_spill] sm:$0xff] %v8113_v40  ;;  %v8123_v44 = vpop.f32.mrf.mxu1 }
 0x19d   : > { %v2395_v11 = vpop.f32.mrf.mxu0 }
 0x19e   : > { %v8129_v33 = vpop.f32.mrf.mxu1 }
 0x19f   : > { %v6574_v36 = vpop.f32.mrf.mxu0 }
 0x1a0   : > { %v8135_v3 = vpop.f32.mrf.mxu1 }
 0x1a1   : > { %v2405_v49 = vpop.f32.mrf.mxu0 }
 0x1a2   : > { %v8141_v22 = vpop.f32.mrf.mxu1 }
 0x1a3   : > { %v6577_v45 = vpop.f32.mrf.mxu0 }
 0x1a4   : > { %v8147_v24 = vpop.f32.mrf.mxu1 }
 0x1a5   : > { %v2415_v55 = vpop.f32.mrf.mxu0 }
 0x1a6   : > { %v8155_v50 = vpop.f32.mrf.mxu1 }
 0x1a7   : > { %v6580_v42 = vpop.f32.mrf.mxu0  ;;  %9841 = vst [vmem:[#allocation33_spill] sm:$0xff] %v8155_v50 }
 0x1a9   : > { %v8115_v20 = vpop.f32.mrf.mxu0 }
 0x1ab   : > { %v8117_v4 = vpop.f32.mrf.mxu0 }
 0x1ad   : > { %v8119_v13 = vpop.f32.mrf.mxu0 }
 0x1af   : > { %v8121_v37 = vpop.f32.mrf.mxu0 }
 0x1b1   : > { %v8125_v40 = vpop.f32.mrf.mxu0 }
 0x1b3   : > { %v8127_v31 = vpop.f32.mrf.mxu0 }
 0x1b5   : > { %v8131_v38 = vpop.f32.mrf.mxu0 }
 0x1b6   : > { %9833 = vst [vmem:[#allocation25_spill] sm:$0xff] %v8131_v38 }
 0x1b7   : > { %v8133_v10 = vpop.f32.mrf.mxu0 }
 0x1b8   : > { %9834 = vst [vmem:[#allocation26_spill] sm:$0xff] %v8133_v10  ;;  %v2194_v10 = vadd.f32 %v7969_v46, %v8020_v15  ;;  %v2195_v46 = vadd.f32 %v7984_v52, %v8035_v2 }
 0x1b9   : > { %v8137_v34 = vpop.f32.mrf.mxu0 }
 0x1ba   : > { %9835 = vst [vmem:[#allocation27_spill] sm:$0xff] %v8137_v34  ;;  %v2515_v53 = vadd.f32 %v6571_v14, %v2194_v10 }
 0x1bb   : > { %v8139_v30 = vpop.f32.mrf.mxu0 }
 0x1bc   : > { %9836 = vst [vmem:[#allocation28_spill] sm:$0xff] %v8139_v30  ;;  %v2193_v30 = vadd.f32 %v7974_v41, %v8025_v28  ;;  %v2736_v15 = vadd.f32 %v6609_v62, %v2515_v53  ;;  %v8176_v28 = vld [vmem:[%s9793_s4] ss:$0 sm:$0xff] }
 0x1bd   : > { %v8143_v51 = vpop.f32.mrf.mxu0 }
 0x1be   : > { %9837 = vst [vmem:[#allocation29_spill] sm:$0xff] %v8143_v51  ;;  %v2514_v38 = vadd.f32 %v2395_v11, %v2193_v30  ;;  %v2197_v30 = vadd.f32 %v7994_v39, %v8045_v27  ;;  %v2199_v39 = vadd.f32 %v8004_v5, %v8053_v17 }
 0x1bf   : > { %v8145_v58 = vpop.f32.mrf.mxu0 }
 0x1c0   : > { %9838 = vst [vmem:[#allocation30_spill] sm:$0xff] %v8145_v58  ;;  %v2196_v58 = vadd.f32 %v7979_v61, %v8030_v0  ;;  %v2735_v61 = vadd.f32 %v2616_v25, %v2514_v38  ;;  %v2516_v0 = vadd.f32 %v2405_v49, %v2195_v46  ;;  %v2518_v53 = vadd.f32 %v2415_v55, %v2197_v30 }
 0x1c1   : > { %v8149_v18 = vpop.f32.mrf.mxu0 }
 0x1c2   : > { %9839 = vst [vmem:[#allocation31_spill] sm:$0xff] %v8149_v18  ;;  %v8165_v18 = vpop.f32.mrf.mxu1  ;;  %v2517_v50 = vadd.f32 %v6574_v36, %v2196_v58  ;;  %v2737_v36 = vadd.f32 %v2626_v47, %v2516_v0  ;;  %v2202_v47 = vadd.f32 %v8009_v56, %v8056_v21  ;;  %v2739_v55 = vadd.f32 %v2636_v7, %v2518_v53 }
 0x1c3   : > { %v8151_v1 = vpop.f32.mrf.mxu0 }
 0x1c4   : > { %9840 = vst [vmem:[#allocation32_spill] sm:$0xff] %v8151_v1  ;;  %v8180_v11 = vpop.f32.mrf.mxu1  ;;  %v2738_v2 = vadd.f32 %v6612_v9, %v2517_v50 }
 0x1c5   : > { %v8157_v34 = vpop.f32.mrf.mxu0 }
 0x1c6   : > { %9842 = vst [vmem:[#allocation34_spill] sm:$0xff] %v8157_v34  ;;  %v2198_v34 = vadd.f32 %v7989_v59, %v8040_v32  ;;  %v2200_v32 = vadd.f32 %v7999_v60, %v8048_v63 }
 0x1c7   : > { %v8161_v51 = vpop.f32.mrf.mxu0 }
 0x1c8   : > { %v2519_v14 = vadd.f32 %v6577_v45, %v2198_v34  ;;  %v8188_v34 = vpop.f32.mrf.mxu1  ;;  %v2521_v9 = vadd.f32 %v6580_v42, %v2200_v32  ;;  %v2201_v42 = vadd.f32 %v8014_v16, %v8061_v35  ;;  %v2206_v32 = vadd.f32 %v8027_v43, %v8072_v6 }
 0x1c9   : > { %v8167_v1 = vpop.f32.mrf.mxu0 }
 0x1ca   : > { %v2740_v27 = vadd.f32 %v6615_v48, %v2519_v14  ;;  %v2742_v56 = vadd.f32 %v8123_v44, %v2521_v9  ;;  %v2522_v30 = vadd.f32 %v8119_v13, %v2201_v42  ;;  %v9848_v42 = vld [vmem:[#allocation14_spill] sm:$0xff] }
 0x1cb   : > { %v6647_v41 = vpop.f32.mrf.mxu0 }
 0x1cc   : > { %v2957_v10 = vadd.f32 %v6647_v41, %v2736_v15  ;;  %v2520_v15 = vadd.f32 %v8115_v20, %v2199_v39  ;;  %v2523_v41 = vadd.f32 %v8117_v4, %v2202_v47  ;;  %v2743_v53 = vadd.f32 %v8141_v22, %v2522_v30 }
 0x1cd   : > { %v2837_v52 = vpop.f32.mrf.mxu0  ;;  %v2208_v39 = vadd.f32 %v8037_v57, %v8080_v29 }
 0x1ce   : > { %v2988_v58 = vadd.f32 %v8176_v28, %v2957_v10  ;;  %v2956_v59 = vadd.f32 %v2837_v52, %v2735_v61  ;;  %v8200_v61 = vpop.f32.mrf.mxu1  ;;  %v2204_v10 = vadd.f32 %v8017_v8, %v8064_v19  ;;  %v2741_v16 = vadd.f32 %v8129_v33, %v2520_v15 }
 0x1cf   : > { %v6650_v62 = vpop.f32.mrf.mxu0  ;;  %v2203_v52 = vadd.f32 %v8022_v23, %v8069_v26 }
 0x1d0   : > { %v3012_v38 = vmax.f32 %v2988_v58, 0.0  ;;  %v2987_v25 = vadd.f32 %v8176_v28, %v2956_v59  ;;  %v2959_v49 = vadd.f32 %v6650_v62, %v2738_v2  ;;  %v2744_v2 = vadd.f32 %v8135_v3, %v2523_v41  ;;  %v8214_v58 = vpop.f32.mrf.mxu1  ;;  %v9849_v41 = vld [vmem:[#allocation8_spill] sm:$0xff] }
 0x1d1   : > { %v2847_v50 = vpop.f32.mrf.mxu0  ;;  %v2525_v8 = vadd.f32 %v8121_v37, %v2204_v10  ;;  %v2524_v23 = vadd.f32 %v8125_v40, %v2203_v52 }
 0x1d2   : > { %3036 = vst.msk [vmem:[#allocation2 + $0x9] sm:$0xff] %vm605_vm0, %v3012_v38  ;;  %v3011_v45 = vmax.f32 %v2987_v25, 0.0  ;;  %v2990_v60 = vadd.f32 %v8176_v28, %v2959_v49  ;;  %v2958_v63 = vadd.f32 %v2847_v50, %v2737_v36  ;;  %v2205_v36 = vadd.f32 %v8032_v54, %v8077_v12  ;;  %v2696_v25 = vpop.f32.mrf.mxu1 }
 0x1d3   : > { %v6653_v46 = vpop.f32.mrf.mxu0  ;;  %v2527_v38 = vadd.f32 %v8127_v31, %v2206_v32  ;;  %v2746_v43 = vadd.f32 %v8147_v24, %v2525_v8 }
 0x1d4   : > { %3035 = vst.msk [vmem:[#allocation2 + $0x1] sm:$0xff] %vm605_vm0, %v3011_v45  ;;  %v3014_v5 = vmax.f32 %v2990_v60, 0.0  ;;  %v2989_v17 = vadd.f32 %v8176_v28, %v2958_v63  ;;  %v2961_v48 = vadd.f32 %v6653_v46, %v2740_v27  ;;  %v9843_v27 = vld [vmem:[#allocation25_spill] sm:$0xff]  ;;  %v9846_v63 = vld [vmem:[#allocation7_spill] sm:$0xff]  ;;  %v6636_v46 = vpop.f32.mrf.mxu1 }
 0x1d5   : > { %v2857_v0 = vpop.f32.mrf.mxu0  ;;  %v2526_v50 = vadd.f32 %v9843_v27, %v2205_v36  ;;  %v9844_v45 = vld [vmem:[#allocation33_spill] sm:$0xff]  ;;  %v9857_v36 = vld [vmem:[#allocation19_spill] sm:$0xff] }
 0x1d6   : > { %3038 = vst.msk [vmem:[#allocation2 + $0x21] sm:$0xff] %vm605_vm0, %v3014_v5  ;;  %v3013_v21 = vmax.f32 %v2989_v17, 0.0  ;;  %v2992_v20 = vadd.f32 %v8176_v28, %v2961_v48  ;;  %v2960_v7 = vadd.f32 %v2857_v0, %v2739_v55  ;;  %v2745_v54 = vadd.f32 %v9844_v45, %v2524_v23  ;;  %v9845_v60 = vld [vmem:[#allocation13_spill] sm:$0xff]  ;;  %v9847_v5 = vld [vmem:[#allocation26_spill] sm:$0xff]  ;;  %v2706_v52 = vpop.f32.mrf.mxu1  ;;  %v9861_v45 = vld [vmem:[#allocation12_spill] sm:$0xff] }
 0x1d7   : > { %v6656_v14 = vpop.f32.mrf.mxu0  ;;  %v2207_v47 = vadd.f32 %v9846_v63, %v9845_v60  ;;  %v2748_v55 = vadd.f32 %v8165_v18, %v2527_v38  ;;  %v2529_v57 = vadd.f32 %v9847_v5, %v2208_v39  ;;  %v2210_v0 = vadd.f32 %v9849_v41, %v9848_v42  ;;  %v9858_v38 = vld [vmem:[#allocation11_spill] sm:$0xff] }
 0x1d8   : > { %3037 = vst.msk [vmem:[#allocation2 + $0x19] sm:$0xff] %vm605_vm0, %v3013_v21  ;;  %v3016_v35 = vmax.f32 %v2992_v20, 0.0  ;;  %v2991_v4 = vadd.f32 %v8176_v28, %v2960_v7  ;;  %v2963_v44 = vadd.f32 %v6656_v14, %v2742_v56  ;;  %v2747_v56 = vadd.f32 %v8180_v11, %v2526_v50  ;;  %v9850_v20 = vld [vmem:[#allocation27_spill] sm:$0xff]  ;;  %v9851_v14 = vld [vmem:[#allocation16_spill] sm:$0xff] }
 0x1d9   : > { %v2867_v59 = vpop.f32.mrf.mxu0  ;;  %v2528_v7 = vadd.f32 %v9850_v20, %v2207_v47 }
 0x1da   : > { %3040 = vst.msk [vmem:[#allocation2 + $0x39] sm:$0xff] %vm605_vm0, %v3016_v35  ;;  %v3015_v19 = vmax.f32 %v2991_v4, 0.0  ;;  %v2994_v33 = vadd.f32 %v8176_v28, %v2963_v44  ;;  %v2962_v13 = vadd.f32 %v2867_v59, %v2741_v16  ;;  %v9852_v16 = vld [vmem:[#allocation9_spill] sm:$0xff]  ;;  %v9853_v4 = vld [vmem:[#allocation28_spill] sm:$0xff]  ;;  %v2750_v59 = vadd.f32 %v8188_v34, %v2529_v57 }
 0x1db   : > { %v6659_v62 = vpop.f32.mrf.mxu0  ;;  %v2209_v35 = vadd.f32 %v9852_v16, %v9851_v14  ;;  %v2531_v44 = vadd.f32 %v9853_v4, %v2210_v0  ;;  %v9865_v57 = vld [vmem:[#allocation32_spill] sm:$0xff]  ;;  %v9870_v4 = vld [vmem:[#allocation21_spill] sm:$0xff] }
 0x1dc   : > { %3039 = vst.msk [vmem:[#allocation2 + $0x31] sm:$0xff] %vm605_vm0, %v3015_v19  ;;  %v3018_v26 = vmax.f32 %v2994_v33, 0.0  ;;  %v2993_v3 = vadd.f32 %v8176_v28, %v2962_v13  ;;  %v2965_v37 = vadd.f32 %v6659_v62, %v2744_v2  ;;  %v9854_v33 = vld [vmem:[#allocation17_spill] sm:$0xff]  ;;  %v9855_v13 = vld [vmem:[#allocation10_spill] sm:$0xff] }
 0x1dd   : > { %v2877_v49 = vpop.f32.mrf.mxu0  ;;  %v2212_v32 = vadd.f32 %v9855_v13, %v9854_v33 }
 0x1de   : > { %3042 = vst.msk [vmem:[#allocation2 + $0x51] sm:$0xff] %vm605_vm0, %v3018_v26  ;;  %v3017_v22 = vmax.f32 %v2993_v3, 0.0  ;;  %v2996_v6 = vadd.f32 %v8176_v28, %v2965_v37  ;;  %v2964_v40 = vadd.f32 %v2877_v49, %v2743_v53  ;;  %v9856_v53 = vld [vmem:[#allocation29_spill] sm:$0xff]  ;;  %v2749_v26 = vadd.f32 %v8200_v61, %v2528_v7  ;;  %v9868_v7 = vld [vmem:[#allocation34_spill] sm:$0xff] }
 0x1df   : > { %v6662_v9 = vpop.f32.mrf.mxu0  ;;  %v2530_v62 = vadd.f32 %v9856_v53, %v2209_v35  ;;  %v2211_v49 = vadd.f32 %v9858_v38, %v9857_v36 }
 0x1e0   : > { %3041 = vst.msk [vmem:[#allocation2 + $0x49] sm:$0xff] %vm605_vm0, %v3017_v22  ;;  %v3020_v12 = vmax.f32 %v2996_v6, 0.0  ;;  %v2995_v31 = vadd.f32 %v8176_v28, %v2964_v40  ;;  %v2967_v24 = vadd.f32 %v6662_v9, %v2746_v43  ;;  %v2752_v43 = vadd.f32 %v8214_v58, %v2531_v44  ;;  %v6639_v22 = vpop.f32.mrf.mxu1  ;;  %v9859_v40 = vld [vmem:[#allocation30_spill] sm:$0xff]  ;;  %v9860_v9 = vld [vmem:[#allocation20_spill] sm:$0xff] }
 0x1e1   : > { %v2887_v15 = vpop.f32.mrf.mxu0  ;;  %v2533_v39 = vadd.f32 %v9859_v40, %v2212_v32 }
 0x1e2   : > { %3044 = vst.msk [vmem:[#allocation2 + $0x69] sm:$0xff] %vm605_vm0, %v3020_v12  ;;  %v3019_v29 = vmax.f32 %v2995_v31, 0.0  ;;  %v2998_v17 = vadd.f32 %v8176_v28, %v2967_v24  ;;  %v2966_v48 = vadd.f32 %v2887_v15, %v2745_v54  ;;  %v2214_v54 = vadd.f32 %v9861_v45, %v9860_v9  ;;  %v9862_v24 = vld [vmem:[#allocation31_spill] sm:$0xff] }
 0x1e3   : > { %v6665_v21 = vpop.f32.mrf.mxu0  ;;  %v2751_v12 = vadd.f32 %v2696_v25, %v2530_v62  ;;  %v2532_v60 = vadd.f32 %v9862_v24, %v2211_v49  ;;  %v9864_v15 = vld [vmem:[#allocation15_spill] sm:$0xff]  ;;  %v2754_v42 = vadd.f32 %v6636_v46, %v2533_v39  ;;  %v9869_v46 = vld [vmem:[#allocation24_spill] sm:$0xff] }
 0x1e4   : > { %3043 = vst.msk [vmem:[#allocation2 + $0x61] sm:$0xff] %vm605_vm0, %v3019_v29  ;;  %v3022_v18 = vmax.f32 %v2998_v17, 0.0  ;;  %v2997_v10 = vadd.f32 %v8176_v28, %v2966_v48  ;;  %v2969_v30 = vadd.f32 %v6665_v21, %v2748_v55  ;;  %v9863_v55 = vld [vmem:[#allocation22_spill] sm:$0xff]  ;;  %v2535_v29 = vadd.f32 %v9865_v57, %v2214_v54  ;;  %v2716_v17 = vpop.f32.mrf.mxu1 }
 0x1e5   : > { %v2897_v2 = vpop.f32.mrf.mxu0  ;;  %v2213_v5 = vadd.f32 %v9864_v15, %v9863_v55  ;;  %v9867_v21 = vld [vmem:[#allocation18_spill] sm:$0xff]  ;;  %v2215_v44 = vadd.f32 %v9870_v4, %v9869_v46 }
 0x1e6   : > { %3046 = vst.msk [vmem:[#allocation2 + $0x81] sm:$0xff] %vm605_vm0, %v3022_v18  ;;  %v3021_v11 = vmax.f32 %v2997_v10, 0.0  ;;  %v3000_v8 = vadd.f32 %v8176_v28, %v2969_v30  ;;  %v2968_v19 = vadd.f32 %v2897_v2, %v2747_v56  ;;  %v9866_v56 = vld [vmem:[#allocation23_spill] sm:$0xff]  ;;  %v2753_v30 = vadd.f32 %v2706_v52, %v2532_v60 }
 0x1e7   : > { %v6668_v23 = vpop.f32.mrf.mxu0  ;;  %v2216_v20 = vadd.f32 %v9867_v21, %v9866_v56  ;;  %v2534_v18 = vadd.f32 %v9868_v7, %v2213_v5  ;;  %v2756_v2 = vadd.f32 %v6639_v22, %v2535_v29  ;;  %v2536_v53 = vadd.f32 %v8167_v1, %v2215_v44 }
 0x1e8   : > { %3045 = vst.msk [vmem:[#allocation2 + $0x79] sm:$0xff] %vm605_vm0, %v3021_v11  ;;  %v3024_v3 = vmax.f32 %v3000_v8, 0.0  ;;  %v2999_v37 = vadd.f32 %v8176_v28, %v2968_v19  ;;  %v2971_v34 = vadd.f32 %v6668_v23, %v2750_v59  ;;  %v6642_v59 = vpop.f32.mrf.mxu1 }
 0x1e9   : > { %v2907_v6 = vpop.f32.mrf.mxu0  ;;  %v2537_v8 = vadd.f32 %v8161_v51, %v2216_v20  ;;  %v2755_v13 = vadd.f32 %v2716_v17, %v2534_v18 }
 0x1ea   : > { %3048 = vst.msk [vmem:[#allocation2 + $0x99] sm:$0xff] %vm605_vm0, %v3024_v3  ;;  %v3023_v27 = vmax.f32 %v2999_v37, 0.0  ;;  %v3002_v61 = vadd.f32 %v8176_v28, %v2971_v34  ;;  %v2970_v50 = vadd.f32 %v2907_v6, %v2749_v26  ;;  %v2726_v3 = vpop.f32.mrf.mxu1 }
 0x1eb   : > { %v6671_v31 = vpop.f32.mrf.mxu0  ;;  %v2758_v34 = vadd.f32 %v6642_v59, %v2537_v8 }
 0x1ec   : > { %3047 = vst.msk [vmem:[#allocation2 + $0x91] sm:$0xff] %vm605_vm0, %v3023_v27  ;;  %v3026_v58 = vmax.f32 %v3002_v61, 0.0  ;;  %v3001_v63 = vadd.f32 %v8176_v28, %v2970_v50  ;;  %v2973_v47 = vadd.f32 %v6671_v31, %v2752_v43  ;;  %v2757_v43 = vadd.f32 %v2726_v3, %v2536_v53 }
 0x1ed   : > { %v2917_v48 = vpop.f32.mrf.mxu0 }
 0x1ee   : > { %3050 = vst.msk [vmem:[#allocation2 + $0xb1] sm:$0xff] %vm605_vm0, %v3026_v58  ;;  %v3025_v25 = vmax.f32 %v3001_v63, 0.0  ;;  %v3004_v41 = vadd.f32 %v8176_v28, %v2973_v47  ;;  %v2972_v0 = vadd.f32 %v2917_v48, %v2751_v12 }
 0x1ef   : > { %v6674_v10 = vpop.f32.mrf.mxu0 }
 0x1f0   : > { %3049 = vst.msk [vmem:[#allocation2 + $0xa9] sm:$0xff] %vm605_vm0, %v3025_v25  ;;  %v3028_v14 = vmax.f32 %v3004_v41, 0.0  ;;  %v3003_v16 = vadd.f32 %v8176_v28, %v2972_v0  ;;  %v2975_v35 = vadd.f32 %v6674_v10, %v2754_v42 }
 0x1f1   : > { %v2927_v11 = vpop.f32.mrf.mxu0 }
 0x1f2   : > { %3052 = vst.msk [vmem:[#allocation2 + $0xc9] sm:$0xff] %vm605_vm0, %v3028_v14  ;;  %v3027_v19 = vmax.f32 %v3003_v16, 0.0  ;;  %v3006_v33 = vadd.f32 %v8176_v28, %v2975_v35  ;;  %v2974_v52 = vadd.f32 %v2927_v11, %v2753_v30 }
 0x1f3   : > { %v6677_v32 = vpop.f32.mrf.mxu0 }
 0x1f4   : > { %3051 = vst.msk [vmem:[#allocation2 + $0xc1] sm:$0xff] %vm605_vm0, %v3027_v19  ;;  %v3030_v62 = vmax.f32 %v3006_v33, 0.0  ;;  %v3005_v23 = vadd.f32 %v8176_v28, %v2974_v52  ;;  %v2977_v26 = vadd.f32 %v6677_v32, %v2756_v2 }
 0x1f5   : > { %v2937_v37 = vpop.f32.mrf.mxu0 }
 0x1f6   : > { %3054 = vst.msk [vmem:[#allocation2 + $0xe1] sm:$0xff] %vm605_vm0, %v3030_v62  ;;  %v3029_v51 = vmax.f32 %v3005_v23, 0.0  ;;  %v3008_v36 = vadd.f32 %v8176_v28, %v2977_v26  ;;  %v2976_v38 = vadd.f32 %v2937_v37, %v2755_v13 }
 0x1f7   : > { %v6680_v49 = vpop.f32.mrf.mxu0 }
 0x1f8   : > { %3053 = vst.msk [vmem:[#allocation2 + $0xd9] sm:$0xff] %vm605_vm0, %v3029_v51  ;;  %v3032_v1 = vmax.f32 %v3008_v36, 0.0  ;;  %v3007_v22 = vadd.f32 %v8176_v28, %v2976_v38  ;;  %v2979_v6 = vadd.f32 %v6680_v49, %v2758_v34 }
 0x1f9   : > { %v2947_v40 = vpop.f32.mrf.mxu0 }
 0x1fa   : > { %3056 = vst.msk [vmem:[#allocation2 + $0xf9] sm:$0xff] %vm605_vm0, %v3032_v1  ;;  %v3031_v39 = vmax.f32 %v3007_v22, 0.0  ;;  %v3010_v27 = vadd.f32 %v8176_v28, %v2979_v6  ;;  %v2978_v61 = vadd.f32 %v2947_v40, %v2757_v43 }
 0x1fc   : > { %3055 = vst.msk [vmem:[#allocation2 + $0xf1] sm:$0xff] %vm605_vm0, %v3031_v39  ;;  %v3034_v50 = vmax.f32 %v3010_v27, 0.0  ;;  %v3009_v9 = vadd.f32 %v8176_v28, %v2978_v61  ;;  %3062 = sbr.rel (%p6026_p13) target bundleno = 516 (0x204), region = 84 }
 0x1fe   : > { %3058 = vst.msk [vmem:[#allocation2 + $0x111] sm:$0xff] %vm605_vm0, %v3034_v50  ;;  %v3033_v45 = vmax.f32 %v3009_v9, 0.0 }
 0x200   : > { %3057 = vst.msk [vmem:[#allocation2 + $0x109] sm:$0xff] %vm605_vm0, %v3033_v45 }
 0x201   : > { %v6831_v54 = vmov 0.0  }
 0x202   : > { %3063 = vst.msk [vmem:[#allocation2 + $0x1] sm:$0xff] %vm605_vm0, %v6831_v54  ;;  %3064 = vst.msk [vmem:[#allocation2 + $0x9] sm:$0xff] %vm605_vm0, %v6831_v54 }
 0x203   : > { %3065 = vst.msk [vmem:[#allocation2 + $0x19] sm:$0xff] %vm605_vm0, %v6831_v54  ;;  %3066 = vst.msk [vmem:[#allocation2 + $0x21] sm:$0xff] %vm605_vm0, %v6831_v54 }
 0x204 PF: > { %p6027_p0 = scmp.ne.s32.totalorder %s6812_s25, 1 }
 0x206   : > { %3070 = sbr.rel (%p6027_p0) target bundleno = 526 (0x20e), region = 88 }
 0x20b   : > { %v6832_v28 = vmov 0.0  }
 0x20c   : > { %3072 = vst.msk [vmem:[#allocation2 + $0xf1] sm:$0xff] %vm605_vm0, %v6832_v28  ;;  %3073 = vst.msk [vmem:[#allocation2 + $0xf9] sm:$0xff] %vm605_vm0, %v6832_v28 }
 0x20d   : > { %3074 = vst.msk [vmem:[#allocation2 + $0x109] sm:$0xff] %vm605_vm0, %v6832_v28  ;;  %3075 = vst.msk [vmem:[#allocation2 + $0x111] sm:$0xff] %vm605_vm0, %v6832_v28 }
 0x20e PF: > { %v4197_v12 = vld [vmem:[%s9796_s7] sm:$0xf]  ;;  %v3114_v31 = vlaneseq  ;;  %v8319_v24 = vld [vmem:[#allocation2 + $0x30] sm:$0xff]  ;;  %v8321_v60 = vld [vmem:[#allocation2 + $0x38] sm:$0xff] }
 0x20f   : > { %6681 = vmatprep.subr.msk.mxu1 %vm839_vm2, %v4197_v12  ;;  %v8326_v58 = vld [vmem:[%s9794_s5 + $0x8] ss:$0 sm:$0xff]  ;;  %v3112_v47 = vld [vmem:[%s9794_s5] sm:$0xff]  ;;  %v8345_v42 = vld [vmem:[#allocation2 + $0x18] sm:$0xff] }
 0x210   : > { %6682 = vmatpush3.msk.msra.mxu1 %vm839_vm2, %v4197_v12  ;;  %v8328_v63 = vshrl.u32 %v3114_v31, 7  ;;  %v8335_v55 = vmul.f32 %v8326_v58, %v8319_v24  ;;  %v8339_v15 = vmul.f32 %v8326_v58, %v8321_v60  ;;  %v3076_v48 = vld [vmem:[#allocation2] sm:$0xff]  ;;  %v3077_v21 = vld [vmem:[#allocation2 + $0x8] sm:$0xff]  ;;  %v3078_v27 = vld [vmem:[#allocation2 + $0x10] sm:$0x3] }
 0x211   : > { %v8383_v46 = vld [vmem:[#allocation2 + $0x20] sm:$0xff]  ;;  %v8410_v61 = vld [vmem:[#allocation2 + $0x28] sm:$0x3] }
 0x212   : > { %v3116_v5 = vsub.s32 0, %v8328_v63  ;;  %v3160_v57 = vsub.s32 3, %v8328_v63  ;;  %v3204_v29 = vsub.s32 6, %v8328_v63  ;;  %v3248_v17 = vsub.s32 1, %v8328_v63  ;;  %v8413_v54 = vld [vmem:[#allocation2 + $0x40] sm:$0x3] }
 0x213   : > { %v3402_v25 = vsub.s32 4, %v8328_v63  ;;  %v3556_v41 = vsub.s32 7, %v8328_v63  ;;  %v3710_v0 = vsub.s32 2, %v8328_v63  ;;  %v3864_v56 = vsub.s32 5, %v8328_v63 }
 0x214   : > { %v8353_v20 = vrot.slane %v3112_v47, %v3116_v5  ;;  %v8357_v7 = vrot.slane %v3112_v47, %v3160_v57  ;;  %v8361_v18 = vrot.slane %v3112_v47, %v3204_v29  ;;  %v8365_v10 = vrot.slane %v3112_v47, %v3248_v17 }
 0x215   : > { %v8369_v30 = vrot.slane %v3112_v47, %v3402_v25  ;;  %v8373_v14 = vrot.slane %v3112_v47, %v3556_v41  ;;  %v8377_v16 = vrot.slane %v3112_v47, %v3710_v0  ;;  %v8381_v35 = vrot.slane %v3112_v47, %v3864_v56 }
 0x216   : > { %v3118_v4 = vmul.f32 %v8353_v20, %v3076_v48  ;;  %v3162_v44 = vmul.f32 %v8357_v7, %v8345_v42  ;;  %v3206_v2 = vmul.f32 %v8361_v18, %v8319_v24  ;;  %v3250_v59 = vmul.f32 %v8365_v10, %v3076_v48 }
 0x217   : > { %v3251_v11 = vmul.f32 %v8365_v10, %v3077_v21  ;;  %v3404_v8 = vmul.f32 %v8369_v30, %v8345_v42  ;;  %v3405_v19 = vmul.f32 %v8369_v30, %v8383_v46  ;;  %v3558_v33 = vmul.f32 %v8373_v14, %v8319_v24 }
 0x218   : > { %v3182_v52 = vadd.f32 %v3162_v44, %v3118_v4  ;;  %v3310_v13 = vrot.slane %v3250_v59, 1  ;;  %v3559_v32 = vmul.f32 %v8373_v14, %v8321_v60  ;;  %v3712_v53 = vmul.f32 %v8377_v16, %v3076_v48 }
 0x219   : > { %v3311_v62 = vrot.slane %v3251_v11, 1  ;;  %v3464_v23 = vrot.slane %v3404_v8, 1  ;;  %v3465_v26 = vrot.slane %v3405_v19, 1  ;;  %v3618_v3 = vrot.slane %v3558_v33, 1 }
 0x21a   : > { %v3226_v37 = vadd.f32 %v3206_v2, %v3182_v52  ;;  %v3619_v34 = vrot.slane %v3559_v32, 1  ;;  %v3713_v51 = vmul.f32 %v8377_v16, %v3077_v21  ;;  %v3772_v36 = vrot.slane %v3712_v53, 2 }
 0x21b   : > { %v3312_v38 = vsel %vm1452_vm3, %v3310_v13, %v3311_v62  ;;  %v3466_v49 = vsel %vm1452_vm3, %v3464_v23, %v3465_v26  ;;  %v3866_v43 = vmul.f32 %v8381_v35, %v8345_v42  ;;  %v3867_v1 = vmul.f32 %v8381_v35, %v8383_v46 }
 0x21c   : > { %v3380_v22 = vadd.f32 %v3312_v38, %v3226_v37  ;;  %v3620_v6 = vsel %vm1452_vm3, %v3618_v3, %v3619_v34  ;;  %v3773_v40 = vrot.slane %v3713_v51, 2  ;;  %v4080_v39 = vrot.slane %v8335_v55, 2  ;;  %v8435_v38 = vld [vmem:[#allocation2 + $0x48] sm:$0xff] }
 0x21d   : > { %v3926_v50 = vrot.slane %v3866_v43, 2  ;;  %v3927_v9 = vrot.slane %v3867_v1, 2  ;;  %v4081_v45 = vrot.slane %v8339_v15, 2  ;;  %v3119_v28 = vmul.f32 %v8353_v20, %v3077_v21 }
 0x21e   : > { %v3534_v12 = vadd.f32 %v3466_v49, %v3380_v22  ;;  %v3774_v31 = vsel %vm2217_vm4, %v3772_v36, %v3773_v40  ;;  %v3163_v47 = vmul.f32 %v8357_v7, %v8383_v46  ;;  %v3207_v55 = vmul.f32 %v8361_v18, %v8321_v60 }
 0x21f   : > { %v3928_v48 = vsel %vm2217_vm4, %v3926_v50, %v3927_v9  ;;  %v4082_v4 = vsel %vm2217_vm4, %v4080_v39, %v4081_v45  ;;  %v3252_v44 = vmul.f32 %v8365_v10, %v3078_v27  ;;  %v3406_v15 = vmul.f32 %v8369_v30, %v8410_v61 }
 0x220   : > { %v3688_v2 = vadd.f32 %v3620_v6, %v3534_v12  ;;  %v3183_v21 = vadd.f32 %v3163_v47, %v3119_v28  ;;  %v3560_v59 = vmul.f32 %v8373_v14, %v8413_v54  ;;  %v3714_v11 = vmul.f32 %v8377_v16, %v3078_v27  ;;  %v8442_v6 = vld [vmem:[%s9795_s6] ss:$0 sm:$0xff] }
 0x221   : > { %v3313_v8 = vrot.slane %v3252_v44, 1  ;;  %v3467_v19 = vrot.slane %v3406_v15, 1  ;;  %v3868_v33 = vmul.f32 %v8381_v35, %v8410_v61  ;;  %v4022_v52 = vmul.f32 %v8326_v58, %v8413_v54  ;;  %v8463_v44 = vld [vmem:[#allocation2 + $0x50] sm:$0xff] }
 0x222   : > { %v3842_v13 = vadd.f32 %v3774_v31, %v3688_v2  ;;  %v3227_v32 = vadd.f32 %v3207_v55, %v3183_v21  ;;  %v3621_v53 = vrot.slane %v3560_v59, 1  ;;  %v3775_v23 = vrot.slane %v3714_v11, 2 }
 0x223   : > { %v3314_v3 = vsel %vm1452_vm3, %v3311_v62, %v3313_v8  ;;  %v3468_v37 = vsel %vm1452_vm3, %v3465_v26, %v3467_v19  ;;  %v3929_v51 = vrot.slane %v3868_v33, 2  ;;  %v4083_v36 = vrot.slane %v4022_v52, 2 }
 0x224   : > { %v3996_v49 = vadd.f32 %v3928_v48, %v3842_v13  ;;  %v3381_v43 = vadd.f32 %v3314_v3, %v3227_v32  ;;  %v3622_v1 = vsel %vm1452_vm3, %v3619_v34, %v3621_v53  ;;  %v3776_v22 = vsel %vm2217_vm4, %v3773_v40, %v3775_v23 }
 0x225   : > { %v3930_v39 = vsel %vm2217_vm4, %v3927_v9, %v3929_v51  ;;  %v4084_v62 = vsel %vm2217_vm4, %v4081_v45, %v4083_v36  ;;  %v3120_v26 = vmul.f32 %v8353_v20, %v8345_v42  ;;  %v3164_v27 = vmul.f32 %v8357_v7, %v8319_v24 }
 0x226   : > { %v4150_v50 = vadd.f32 %v4082_v4, %v3996_v49  ;;  %v3535_v28 = vadd.f32 %v3468_v37, %v3381_v43  ;;  %v3208_v34 = vmul.f32 %v8361_v18, %v8435_v38  ;;  %v3253_v40 = vmul.f32 %v8365_v10, %v8345_v42 }
 0x227   : > { %v3184_v12 = vadd.f32 %v3164_v27, %v3120_v26  ;;  %v3254_v9 = vmul.f32 %v8365_v10, %v8383_v46  ;;  %v3407_v45 = vmul.f32 %v8369_v30, %v8319_v24  ;;  %v3408_v31 = vmul.f32 %v8369_v30, %v8321_v60 }
 0x228   : > { %v4177_v47 = vadd.f32 %v8442_v6, %v4150_v50  ;;  %v3689_v55 = vadd.f32 %v3622_v1, %v3535_v28  ;;  %v3315_v48 = vrot.slane %v3253_v40, 1  ;;  %v3561_v4 = vmul.f32 %v8373_v14, %v8435_v38 }
 0x229   : > { %v3228_v15 = vadd.f32 %v3208_v34, %v3184_v12  ;;  %v3316_v2 = vrot.slane %v3254_v9, 1  ;;  %v3469_v21 = vrot.slane %v3407_v45, 1  ;;  %v3470_v59 = vrot.slane %v3408_v31, 1  ;;  %v8484_v34 = vld [vmem:[#allocation2 + $0x58] sm:$0x3] }
 0x22a   : > { %6683 = vmatprep.mubr.msk.f32.mxu1 %vm605_vm0, %v4177_v47  ;;  %v3843_v11 = vadd.f32 %v3776_v22, %v3689_v55  ;;  %v3562_v8 = vmul.f32 %v8373_v14, %v8463_v44  ;;  %v3623_v19 = vrot.slane %v3561_v4, 1  ;;  %v3715_v33 = vmul.f32 %v8377_v16, %v8345_v42 }
 0x22b   : > { %v3317_v52 = vsel %vm1452_vm3, %v3315_v48, %v3316_v2  ;;  %v3471_v13 = vsel %vm1452_vm3, %v3469_v21, %v3470_v59  ;;  %v3716_v32 = vmul.f32 %v8377_v16, %v8383_v46  ;;  %v3869_v53 = vmul.f32 %v8381_v35, %v8319_v24 }
 0x22c   : > { %v3997_v23 = vadd.f32 %v3930_v39, %v3843_v11  ;;  %v3382_v3 = vadd.f32 %v3317_v52, %v3228_v15  ;;  %v3624_v37 = vrot.slane %v3562_v8, 1  ;;  %v3777_v51 = vrot.slane %v3715_v33, 2 }
 0x22d   : > { %v3778_v36 = vrot.slane %v3716_v32, 2  ;;  %v3870_v49 = vmul.f32 %v8381_v35, %v8321_v60  ;;  %v3931_v43 = vrot.slane %v3869_v53, 2  ;;  %v4023_v42 = vmul.f32 %v8326_v58, %v8435_v38 }
 0x22e   : > { %v4151_v1 = vadd.f32 %v4084_v62, %v3997_v23  ;;  %v3536_v22 = vadd.f32 %v3471_v13, %v3382_v3  ;;  %v3625_v26 = vsel %vm1452_vm3, %v3623_v19, %v3624_v37  ;;  %v4024_v27 = vmul.f32 %v8326_v58, %v8463_v44 }
 0x22f   : > { %v3779_v39 = vsel %vm2217_vm4, %v3777_v51, %v3778_v36  ;;  %v3932_v50 = vrot.slane %v3870_v49, 2  ;;  %v4085_v28 = vrot.slane %v4023_v42, 2  ;;  %v3121_v40 = vmul.f32 %v8353_v20, %v8383_v46 }
 0x230   : > { %v4178_v12 = vadd.f32 %v8442_v6, %v4151_v1  ;;  %v3690_v9 = vadd.f32 %v3625_v26, %v3536_v22  ;;  %v4086_v45 = vrot.slane %v4024_v27, 2  ;;  %v3165_v62 = vmul.f32 %v8357_v7, %v8321_v60 }
 0x231   : > { %v3933_v31 = vsel %vm2217_vm4, %v3931_v43, %v3932_v50  ;;  %v3209_v47 = vmul.f32 %v8361_v18, %v8463_v44  ;;  %v3255_v55 = vmul.f32 %v8365_v10, %v8410_v61  ;;  %v3409_v48 = vmul.f32 %v8369_v30, %v8413_v54  ;;  %v8510_v43 = vld [vmem:[#allocation2 + $0x60] sm:$0xff] }
 0x232   : > { %6684 = vmatmul.mubr.msk.f32.vlgmr.msra.gmra.mxu1 %vm605_vm0, %v4178_v12  ;;  %v3844_v46 = vadd.f32 %v3779_v39, %v3690_v9  ;;  %v4087_v4 = vsel %vm2217_vm4, %v4085_v28, %v4086_v45  ;;  %v3185_v15 = vadd.f32 %v3165_v62, %v3121_v40  ;;  %v3563_v21 = vmul.f32 %v8373_v14, %v8484_v34 }
 0x233   : > { %v3318_v11 = vrot.slane %v3255_v55, 1  ;;  %v3472_v8 = vrot.slane %v3409_v48, 1  ;;  %v3717_v19 = vmul.f32 %v8377_v16, %v8410_v61  ;;  %v3871_v33 = vmul.f32 %v8381_v35, %v8413_v54 }
 0x234   : > { %v3998_v52 = vadd.f32 %v3933_v31, %v3844_v46  ;;  %v3229_v13 = vadd.f32 %v3209_v47, %v3185_v15  ;;  %v3626_v32 = vrot.slane %v3563_v21, 1  ;;  %v4025_v53 = vmul.f32 %v8326_v58, %v8484_v34 }
 0x235   : > { %v3319_v23 = vsel %vm1452_vm3, %v3316_v2, %v3318_v11  ;;  %v3473_v3 = vsel %vm1452_vm3, %v3470_v59, %v3472_v8  ;;  %v3780_v51 = vrot.slane %v3717_v19, 2  ;;  %v3934_v49 = vrot.slane %v3871_v33, 2 }
 0x236   : > { %v4152_v42 = vadd.f32 %v4087_v4, %v3998_v52  ;;  %v3383_v1 = vadd.f32 %v3319_v23, %v3229_v13  ;;  %v3627_v61 = vsel %vm1452_vm3, %v3624_v37, %v3626_v32  ;;  %v4088_v22 = vrot.slane %v4025_v53, 2  ;;  %v8523_v37 = vld [vmem:[#allocation2 + $0x68] sm:$0xff] }
 0x237   : > { %v3781_v26 = vsel %vm2217_vm4, %v3778_v36, %v3780_v51  ;;  %v3935_v27 = vsel %vm2217_vm4, %v3932_v50, %v3934_v49  ;;  %v3122_v39 = vmul.f32 %v8353_v20, %v8319_v24  ;;  %v3166_v2 = vmul.f32 %v8357_v7, %v8435_v38 }
 0x238   : > { %v4179_v59 = vadd.f32 %v8442_v6, %v4152_v42  ;;  %v3537_v28 = vadd.f32 %v3473_v3, %v3383_v1  ;;  %v4089_v40 = vsel %vm2217_vm4, %v4086_v45, %v4088_v22  ;;  %v3210_v12 = vmul.f32 %v8361_v18, %v8510_v43 }
 0x239   : > { %v3186_v9 = vadd.f32 %v3166_v2, %v3122_v39  ;;  %v3256_v36 = vmul.f32 %v8365_v10, %v8319_v24  ;;  %v3257_v50 = vmul.f32 %v8365_v10, %v8321_v60  ;;  %v3410_v62 = vmul.f32 %v8369_v30, %v8435_v38 }
 0x23a   : > { %6686 = vmatprep.mubr.msk.f32.mxu1 %vm605_vm0, %v4179_v59  ;;  %v3691_v31 = vadd.f32 %v3627_v61, %v3537_v28  ;;  %v3411_v45 = vmul.f32 %v8369_v30, %v8463_v44  ;;  %v3564_v47 = vmul.f32 %v8373_v14, %v8510_v43  ;;  %v3565_v55 = vmul.f32 %v8373_v14, %v8523_v37  ;;  %v8554_v59 = vld [vmem:[#allocation2 + $0x70] sm:$0x3] }
 0x23b   : > { %v3230_v48 = vadd.f32 %v3210_v12, %v3186_v9  ;;  %v3320_v46 = vrot.slane %v3256_v36, 1  ;;  %v3321_v4 = vrot.slane %v3257_v50, 1  ;;  %v3474_v15 = vrot.slane %v3410_v62, 1 }
 0x23c   : > { %v3845_v21 = vadd.f32 %v3781_v26, %v3691_v31  ;;  %v3475_v11 = vrot.slane %v3411_v45, 1  ;;  %v3628_v8 = vrot.slane %v3564_v47, 1  ;;  %v3629_v19 = vrot.slane %v3565_v55, 1 }
 0x23d   : > { %v3322_v33 = vsel %vm1452_vm3, %v3320_v46, %v3321_v4  ;;  %v3718_v52 = vmul.f32 %v8377_v16, %v8319_v24  ;;  %v3719_v13 = vmul.f32 %v8377_v16, %v8321_v60  ;;  %v3872_v32 = vmul.f32 %v8381_v35, %v8435_v38 }
 0x23e   : > { %v3999_v53 = vadd.f32 %v3935_v27, %v3845_v21  ;;  %v3384_v23 = vadd.f32 %v3322_v33, %v3230_v48  ;;  %v3476_v3 = vsel %vm1452_vm3, %v3474_v15, %v3475_v11  ;;  %v3630_v51 = vsel %vm1452_vm3, %v3628_v8, %v3629_v19 }
 0x23f   : > { %v3782_v49 = vrot.slane %v3718_v52, 2  ;;  %v3783_v42 = vrot.slane %v3719_v13, 2  ;;  %v3873_v1 = vmul.f32 %v8381_v35, %v8463_v44  ;;  %v3936_v61 = vrot.slane %v3872_v32, 2 }
 0x240   : > { %v4153_v22 = vadd.f32 %v4089_v40, %v3999_v53  ;;  %v3538_v24 = vadd.f32 %v3476_v3, %v3384_v23  ;;  %v4026_v26 = vmul.f32 %v8326_v58, %v8510_v43  ;;  %v4027_v39 = vmul.f32 %v8326_v58, %v8523_v37 }
 0x241   : > { %v3784_v27 = vsel %vm2217_vm4, %v3782_v49, %v3783_v42  ;;  %v3937_v2 = vrot.slane %v3873_v1, 2  ;;  %v3123_v28 = vmul.f32 %v8353_v20, %v8321_v60  ;;  %v3167_v12 = vmul.f32 %v8357_v7, %v8463_v44  ;;  %v8579_v49 = vld [vmem:[#allocation2 + $0x78] sm:$0xff] }
 0x242   : > { %v4180_v40 = vadd.f32 %v8442_v6, %v4153_v22  ;;  %v3692_v9 = vadd.f32 %v3630_v51, %v3538_v24  ;;  %v4090_v36 = vrot.slane %v4026_v26, 2  ;;  %v4091_v50 = vrot.slane %v4027_v39, 2 }
 0x243   : > { %v3938_v62 = vsel %vm2217_vm4, %v3936_v61, %v3937_v2  ;;  %v3187_v31 = vadd.f32 %v3167_v12, %v3123_v28  ;;  %v3211_v45 = vmul.f32 %v8361_v18, %v8523_v37  ;;  %v3258_v47 = vmul.f32 %v8365_v10, %v8413_v54 }
 0x244   : > { %6687 = vmatmul.mubr.msk.f32.gmra.mxu1 %vm605_vm0, %v4180_v40  ;;  %v3846_v60 = vadd.f32 %v3784_v27, %v3692_v9  ;;  %v4092_v55 = vsel %vm2217_vm4, %v4090_v36, %v4091_v50  ;;  %v3412_v48 = vmul.f32 %v8369_v30, %v8484_v34  ;;  %v3566_v46 = vmul.f32 %v8373_v14, %v8554_v59 }
 0x245   : > { %v3231_v15 = vadd.f32 %v3211_v45, %v3187_v31  ;;  %v3323_v21 = vrot.slane %v3258_v47, 1  ;;  %v3720_v8 = vmul.f32 %v8377_v16, %v8413_v54  ;;  %v3874_v33 = vmul.f32 %v8381_v35, %v8484_v34 }
 0x246   : > { %v4000_v52 = vadd.f32 %v3938_v62, %v3846_v60  ;;  %v3477_v13 = vrot.slane %v3412_v48, 1  ;;  %v3631_v32 = vrot.slane %v3566_v46, 1  ;;  %v4028_v53 = vmul.f32 %v8326_v58, %v8554_v59  ;;  %v8600_v62 = vld [vmem:[#allocation2 + $0x80] sm:$0xff] }
 0x247   : > { %v3324_v23 = vsel %vm1452_vm3, %v3321_v4, %v3323_v21  ;;  %v3785_v3 = vrot.slane %v3720_v8, 2  ;;  %v3939_v51 = vrot.slane %v3874_v33, 2  ;;  %v3124_v1 = vmul.f32 %v8353_v20, %v8435_v38 }
 0x248   : > { %v4154_v61 = vadd.f32 %v4092_v55, %v4000_v52  ;;  %v3385_v54 = vadd.f32 %v3324_v23, %v3231_v15  ;;  %v3478_v22 = vsel %vm1452_vm3, %v3475_v11, %v3477_v13  ;;  %v3632_v24 = vsel %vm1452_vm3, %v3629_v19, %v3631_v32 }
 0x249   : > { %v3786_v26 = vsel %vm2217_vm4, %v3783_v42, %v3785_v3  ;;  %v3940_v39 = vsel %vm2217_vm4, %v3937_v2, %v3939_v51  ;;  %v4093_v27 = vrot.slane %v4028_v53, 2  ;;  %v3168_v4 = vmul.f32 %v8357_v7, %v8510_v43 }
 0x24a   : > { %v4181_v28 = vadd.f32 %v8442_v6, %v4154_v61  ;;  %v3539_v12 = vadd.f32 %v3478_v22, %v3385_v54  ;;  %v3212_v40 = vmul.f32 %v8361_v18, %v8579_v49  ;;  %v3259_v9 = vmul.f32 %v8365_v10, %v8435_v38 }
 0x24b   : > { %v4094_v11 = vsel %vm2217_vm4, %v4091_v50, %v4093_v27  ;;  %v3188_v19 = vadd.f32 %v3168_v4, %v3124_v1  ;;  %v3260_v42 = vmul.f32 %v8365_v10, %v8463_v44  ;;  %v3413_v2 = vmul.f32 %v8369_v30, %v8510_v43 }
 0x24c   : > { %6689 = vmatprep.mubr.msk.f32.mxu1 %vm605_vm0, %v4181_v28  ;;  %v3693_v36 = vadd.f32 %v3632_v24, %v3539_v12  ;;  %v3325_v31 = vrot.slane %v3259_v9, 1  ;;  %v3414_v45 = vmul.f32 %v8369_v30, %v8523_v37  ;;  %v3567_v47 = vmul.f32 %v8373_v14, %v8579_v49  ;;  %v8624_v28 = vld [vmem:[#allocation2 + $0x88] sm:$0x3] }
 0x24d   : > { %v3232_v50 = vadd.f32 %v3212_v40, %v3188_v19  ;;  %v3326_v60 = vrot.slane %v3260_v42, 1  ;;  %v3479_v55 = vrot.slane %v3413_v2, 1  ;;  %v3568_v48 = vmul.f32 %v8373_v14, %v8600_v62 }
 0x24e   : > { %v3847_v46 = vadd.f32 %v3786_v26, %v3693_v36  ;;  %v3480_v15 = vrot.slane %v3414_v45, 1  ;;  %v3633_v21 = vrot.slane %v3567_v47, 1  ;;  %v3721_v8 = vmul.f32 %v8377_v16, %v8435_v38 }
 0x24f   : > { %v3327_v33 = vsel %vm1452_vm3, %v3325_v31, %v3326_v60  ;;  %v3634_v52 = vrot.slane %v3568_v48, 1  ;;  %v3722_v13 = vmul.f32 %v8377_v16, %v8463_v44  ;;  %v3875_v32 = vmul.f32 %v8381_v35, %v8510_v43 }
 0x250   : > { %v4001_v53 = vadd.f32 %v3940_v39, %v3847_v46  ;;  %v3386_v23 = vadd.f32 %v3327_v33, %v3232_v50  ;;  %v3481_v3 = vsel %vm1452_vm3, %v3479_v55, %v3480_v15  ;;  %v3787_v51 = vrot.slane %v3721_v8, 2 }
 0x251   : > { %v3635_v1 = vsel %vm1452_vm3, %v3633_v21, %v3634_v52  ;;  %v3788_v61 = vrot.slane %v3722_v13, 2  ;;  %v3876_v38 = vmul.f32 %v8381_v35, %v8523_v37  ;;  %v3941_v54 = vrot.slane %v3875_v32, 2 }
 0x252   : > { %v4155_v22 = vadd.f32 %v4094_v11, %v4001_v53  ;;  %v3540_v24 = vadd.f32 %v3481_v3, %v3386_v23  ;;  %v4029_v26 = vmul.f32 %v8326_v58, %v8579_v49  ;;  %v4030_v27 = vmul.f32 %v8326_v58, %v8600_v62 }
 0x253   : > { %v3789_v39 = vsel %vm2217_vm4, %v3787_v51, %v3788_v61  ;;  %v3942_v4 = vrot.slane %v3876_v38, 2  ;;  %v3125_v12 = vmul.f32 %v8353_v20, %v8463_v44  ;;  %v3169_v40 = vmul.f32 %v8357_v7, %v8523_v37 }
 0x254   : > { %v4182_v9 = vadd.f32 %v8442_v6, %v4155_v22  ;;  %v3694_v11 = vadd.f32 %v3635_v1, %v3540_v24  ;;  %v4095_v19 = vrot.slane %v4029_v26, 2  ;;  %v4096_v42 = vrot.slane %v4030_v27, 2  ;;  %v8649_v1 = vld [vmem:[#allocation2 + $0x90] sm:$0xff] }
 0x255   : > { %v3943_v2 = vsel %vm2217_vm4, %v3941_v54, %v3942_v4  ;;  %v3189_v36 = vadd.f32 %v3169_v40, %v3125_v12  ;;  %v3213_v31 = vmul.f32 %v8361_v18, %v8600_v62  ;;  %v3261_v45 = vmul.f32 %v8365_v10, %v8484_v34 }
 0x256   : > { %6690 = vmatmul.mubr.msk.f32.gmra.mxu1 %vm605_vm0, %v4182_v9  ;;  %v3848_v44 = vadd.f32 %v3789_v39, %v3694_v11  ;;  %v4097_v47 = vsel %vm2217_vm4, %v4095_v19, %v4096_v42  ;;  %v3415_v50 = vmul.f32 %v8369_v30, %v8554_v59  ;;  %v3569_v55 = vmul.f32 %v8373_v14, %v8624_v28 }
 0x257   : > { %v3233_v48 = vadd.f32 %v3213_v31, %v3189_v36  ;;  %v3328_v46 = vrot.slane %v3261_v45, 1  ;;  %v3723_v21 = vmul.f32 %v8377_v16, %v8484_v34  ;;  %v3877_v8 = vmul.f32 %v8381_v35, %v8554_v59 }
 0x258   : > { %v4002_v33 = vadd.f32 %v3943_v2, %v3848_v44  ;;  %v3482_v13 = vrot.slane %v3415_v50, 1  ;;  %v3636_v32 = vrot.slane %v3569_v55, 1  ;;  %v4031_v53 = vmul.f32 %v8326_v58, %v8624_v28  ;;  %v8670_v2 = vld [vmem:[#allocation2 + $0x98] sm:$0xff] }
 0x259   : > { %v3329_v23 = vsel %vm1452_vm3, %v3326_v60, %v3328_v46  ;;  %v3790_v3 = vrot.slane %v3723_v21, 2  ;;  %v3944_v51 = vrot.slane %v3877_v8, 2  ;;  %v3126_v38 = vmul.f32 %v8353_v20, %v8510_v43 }
 0x25a   : > { %v4156_v54 = vadd.f32 %v4097_v47, %v4002_v33  ;;  %v3387_v34 = vadd.f32 %v3329_v23, %v3233_v48  ;;  %v3483_v22 = vsel %vm1452_vm3, %v3480_v15, %v3482_v13  ;;  %v3637_v24 = vsel %vm1452_vm3, %v3634_v52, %v3636_v32 }
 0x25b   : > { %v3791_v26 = vsel %vm2217_vm4, %v3788_v61, %v3790_v3  ;;  %v3945_v27 = vsel %vm2217_vm4, %v3942_v4, %v3944_v51  ;;  %v4098_v39 = vrot.slane %v4031_v53, 2  ;;  %v3170_v60 = vmul.f32 %v8357_v7, %v8579_v49 }
 0x25c   : > { %v4183_v12 = vadd.f32 %v8442_v6, %v4156_v54  ;;  %v3541_v40 = vadd.f32 %v3483_v22, %v3387_v34  ;;  %v3214_v9 = vmul.f32 %v8361_v18, %v8649_v1  ;;  %v3262_v11 = vmul.f32 %v8365_v10, %v8510_v43 }
 0x25d   : > { %v4099_v15 = vsel %vm2217_vm4, %v4096_v42, %v4098_v39  ;;  %v3190_v52 = vadd.f32 %v3170_v60, %v3126_v38  ;;  %v3263_v61 = vmul.f32 %v8365_v10, %v8523_v37  ;;  %v3416_v4 = vmul.f32 %v8369_v30, %v8579_v49 }
 0x25e   : > { %6692 = vmatprep.mubr.msk.f32.mxu1 %vm605_vm0, %v4183_v12  ;;  %v3695_v19 = vadd.f32 %v3637_v24, %v3541_v40  ;;  %v3330_v36 = vrot.slane %v3262_v11, 1  ;;  %v3417_v31 = vmul.f32 %v8369_v30, %v8600_v62  ;;  %v3570_v45 = vmul.f32 %v8373_v14, %v8649_v1  ;;  %v8694_v12 = vld [vmem:[#allocation2 + $0xa0] sm:$0x3] }
 0x25f   : > { %v3234_v42 = vadd.f32 %v3214_v9, %v3190_v52  ;;  %v3331_v44 = vrot.slane %v3263_v61, 1  ;;  %v3484_v47 = vrot.slane %v3416_v4, 1  ;;  %v3571_v50 = vmul.f32 %v8373_v14, %v8670_v2 }
 0x260   : > { %v3849_v55 = vadd.f32 %v3791_v26, %v3695_v19  ;;  %v3485_v48 = vrot.slane %v3417_v31, 1  ;;  %v3638_v46 = vrot.slane %v3570_v45, 1  ;;  %v3724_v21 = vmul.f32 %v8377_v16, %v8510_v43 }
 0x261   : > { %v3332_v8 = vsel %vm1452_vm3, %v3330_v36, %v3331_v44  ;;  %v3639_v33 = vrot.slane %v3571_v50, 1  ;;  %v3725_v13 = vmul.f32 %v8377_v16, %v8523_v37  ;;  %v3878_v32 = vmul.f32 %v8381_v35, %v8579_v49 }
 0x262   : > { %v4003_v53 = vadd.f32 %v3945_v27, %v3849_v55  ;;  %v3388_v23 = vadd.f32 %v3332_v8, %v3234_v42  ;;  %v3486_v3 = vsel %vm1452_vm3, %v3484_v47, %v3485_v48  ;;  %v3792_v51 = vrot.slane %v3724_v21, 2 }
 0x263   : > { %v3640_v38 = vsel %vm1452_vm3, %v3638_v46, %v3639_v33  ;;  %v3793_v54 = vrot.slane %v3725_v13, 2  ;;  %v3879_v43 = vmul.f32 %v8381_v35, %v8600_v62  ;;  %v3946_v34 = vrot.slane %v3878_v32, 2 }
 0x264   : > { %v4157_v22 = vadd.f32 %v4099_v15, %v4003_v53  ;;  %v3542_v24 = vadd.f32 %v3486_v3, %v3388_v23  ;;  %v4032_v26 = vmul.f32 %v8326_v58, %v8649_v1  ;;  %v4033_v39 = vmul.f32 %v8326_v58, %v8670_v2 }
 0x265   : > { %v3794_v27 = vsel %vm2217_vm4, %v3792_v51, %v3793_v54  ;;  %v3947_v60 = vrot.slane %v3879_v43, 2  ;;  %v3127_v40 = vmul.f32 %v8353_v20, %v8523_v37  ;;  %v3171_v9 = vmul.f32 %v8357_v7, %v8600_v62 }
 0x266   : > { %v4184_v11 = vadd.f32 %v8442_v6, %v4157_v22  ;;  %v3696_v15 = vadd.f32 %v3640_v38, %v3542_v24  ;;  %v4100_v52 = vrot.slane %v4032_v26, 2  ;;  %v4101_v61 = vrot.slane %v4033_v39, 2  ;;  %v8719_v38 = vld [vmem:[#allocation2 + $0xa8] sm:$0xff] }
 0x267   : > { %v3948_v4 = vsel %vm2217_vm4, %v3946_v34, %v3947_v60  ;;  %v3191_v19 = vadd.f32 %v3171_v9, %v3127_v40  ;;  %v3215_v36 = vmul.f32 %v8361_v18, %v8670_v2  ;;  %v3264_v31 = vmul.f32 %v8365_v10, %v8554_v59 }
 0x268   : > { %6693 = vmatmul.mubr.msk.f32.gmra.mxu1 %vm605_vm0, %v4184_v11  ;;  %v3850_v37 = vadd.f32 %v3794_v27, %v3696_v15  ;;  %v4102_v45 = vsel %vm2217_vm4, %v4100_v52, %v4101_v61  ;;  %v3418_v42 = vmul.f32 %v8369_v30, %v8624_v28  ;;  %v3572_v47 = vmul.f32 %v8373_v14, %v8694_v12 }
 0x269   : > { %v3235_v50 = vadd.f32 %v3215_v36, %v3191_v19  ;;  %v3333_v55 = vrot.slane %v3264_v31, 1  ;;  %v3726_v46 = vmul.f32 %v8377_v16, %v8554_v59  ;;  %v3880_v21 = vmul.f32 %v8381_v35, %v8624_v28 }
 0x26a   : > { %v4004_v8 = vadd.f32 %v3948_v4, %v3850_v37  ;;  %v3487_v13 = vrot.slane %v3418_v42, 1  ;;  %v3641_v32 = vrot.slane %v3572_v47, 1  ;;  %v4034_v53 = vmul.f32 %v8326_v58, %v8694_v12  ;;  %v8740_v4 = vld [vmem:[#allocation2 + $0xb0] sm:$0xff] }
 0x26b   : > { %v3334_v23 = vsel %vm1452_vm3, %v3331_v44, %v3333_v55  ;;  %v3795_v3 = vrot.slane %v3726_v46, 2  ;;  %v3949_v51 = vrot.slane %v3880_v21, 2  ;;  %v3128_v43 = vmul.f32 %v8353_v20, %v8579_v49 }
 0x26c   : > { %v4158_v34 = vadd.f32 %v4102_v45, %v4004_v8  ;;  %v3389_v59 = vadd.f32 %v3334_v23, %v3235_v50  ;;  %v3488_v22 = vsel %vm1452_vm3, %v3485_v48, %v3487_v13  ;;  %v3642_v24 = vsel %vm1452_vm3, %v3639_v33, %v3641_v32 }
 0x26d   : > { %v3796_v26 = vsel %vm2217_vm4, %v3793_v54, %v3795_v3  ;;  %v3950_v39 = vsel %vm2217_vm4, %v3947_v60, %v3949_v51  ;;  %v4103_v27 = vrot.slane %v4034_v53, 2  ;;  %v3172_v44 = vmul.f32 %v8357_v7, %v8649_v1 }
 0x26e   : > { %v4185_v40 = vadd.f32 %v8442_v6, %v4158_v34  ;;  %v3543_v9 = vadd.f32 %v3488_v22, %v3389_v59  ;;  %v3216_v11 = vmul.f32 %v8361_v18, %v8719_v38  ;;  %v3265_v15 = vmul.f32 %v8365_v10, %v8579_v49 }
 0x26f   : > { %v4104_v48 = vsel %vm2217_vm4, %v4101_v61, %v4103_v27  ;;  %v3192_v33 = vadd.f32 %v3172_v44, %v3128_v43  ;;  %v3266_v54 = vmul.f32 %v8365_v10, %v8600_v62  ;;  %v3419_v60 = vmul.f32 %v8369_v30, %v8649_v1 }
 0x270   : > { %6695 = vmatprep.mubr.msk.f32.mxu1 %vm605_vm0, %v4185_v40  ;;  %v3697_v52 = vadd.f32 %v3642_v24, %v3543_v9  ;;  %v3335_v19 = vrot.slane %v3265_v15, 1  ;;  %v3420_v36 = vmul.f32 %v8369_v30, %v8670_v2  ;;  %v3573_v31 = vmul.f32 %v8373_v14, %v8719_v38  ;;  %v8764_v40 = vld [vmem:[#allocation2 + $0xb8] sm:$0x3] }
 0x271   : > { %v3236_v61 = vadd.f32 %v3216_v11, %v3192_v33  ;;  %v3336_v37 = vrot.slane %v3266_v54, 1  ;;  %v3489_v45 = vrot.slane %v3419_v60, 1  ;;  %v3574_v42 = vmul.f32 %v8373_v14, %v8740_v4 }
 0x272   : > { %v3851_v47 = vadd.f32 %v3796_v26, %v3697_v52  ;;  %v3490_v50 = vrot.slane %v3420_v36, 1  ;;  %v3643_v55 = vrot.slane %v3573_v31, 1  ;;  %v3727_v46 = vmul.f32 %v8377_v16, %v8579_v49 }
 0x273   : > { %v3337_v21 = vsel %vm1452_vm3, %v3335_v19, %v3336_v37  ;;  %v3644_v8 = vrot.slane %v3574_v42, 1  ;;  %v3728_v13 = vmul.f32 %v8377_v16, %v8600_v62  ;;  %v3881_v32 = vmul.f32 %v8381_v35, %v8649_v1 }
 0x274   : > { %v4005_v53 = vadd.f32 %v3950_v39, %v3851_v47  ;;  %v3390_v23 = vadd.f32 %v3337_v21, %v3236_v61  ;;  %v3491_v3 = vsel %vm1452_vm3, %v3489_v45, %v3490_v50  ;;  %v3797_v51 = vrot.slane %v3727_v46, 2 }
 0x275   : > { %v3645_v43 = vsel %vm1452_vm3, %v3643_v55, %v3644_v8  ;;  %v3798_v34 = vrot.slane %v3728_v13, 2  ;;  %v3882_v49 = vmul.f32 %v8381_v35, %v8670_v2  ;;  %v3951_v59 = vrot.slane %v3881_v32, 2 }
 0x276   : > { %v4159_v22 = vadd.f32 %v4104_v48, %v4005_v53  ;;  %v3544_v24 = vadd.f32 %v3491_v3, %v3390_v23  ;;  %v4035_v26 = vmul.f32 %v8326_v58, %v8719_v38  ;;  %v4036_v27 = vmul.f32 %v8326_v58, %v8740_v4 }
 0x277   : > { %v3799_v39 = vsel %vm2217_vm4, %v3797_v51, %v3798_v34  ;;  %v3952_v44 = vrot.slane %v3882_v49, 2  ;;  %v3129_v9 = vmul.f32 %v8353_v20, %v8600_v62  ;;  %v3173_v11 = vmul.f32 %v8357_v7, %v8670_v2 }
 0x278   : > { %v4186_v15 = vadd.f32 %v8442_v6, %v4159_v22  ;;  %v3698_v48 = vadd.f32 %v3645_v43, %v3544_v24  ;;  %v4105_v33 = vrot.slane %v4035_v26, 2  ;;  %v4106_v54 = vrot.slane %v4036_v27, 2  ;;  %v8789_v43 = vld [vmem:[#allocation2 + $0xc0] sm:$0xff] }
 0x279   : > { %v3953_v60 = vsel %vm2217_vm4, %v3951_v59, %v3952_v44  ;;  %v3193_v52 = vadd.f32 %v3173_v11, %v3129_v9  ;;  %v3217_v19 = vmul.f32 %v8361_v18, %v8740_v4  ;;  %v3267_v36 = vmul.f32 %v8365_v10, %v8624_v28 }
 0x27a   : > { %6696 = vmatmul.mubr.msk.f32.gmra.mxu1 %vm605_vm0, %v4186_v15  ;;  %v3852_v62 = vadd.f32 %v3799_v39, %v3698_v48  ;;  %v4107_v31 = vsel %vm2217_vm4, %v4105_v33, %v4106_v54  ;;  %v3421_v61 = vmul.f32 %v8369_v30, %v8694_v12  ;;  %v3575_v45 = vmul.f32 %v8373_v14, %v8764_v40  ;;  %v8810_v33 = vld [vmem:[#allocation2 + $0xc8] sm:$0xff] }
 0x27b   : > { %v3237_v42 = vadd.f32 %v3217_v19, %v3193_v52  ;;  %v3338_v47 = vrot.slane %v3267_v36, 1  ;;  %v3729_v55 = vmul.f32 %v8377_v16, %v8624_v28  ;;  %v3883_v46 = vmul.f32 %v8381_v35, %v8694_v12 }
 0x27c   : > { %v4006_v21 = vadd.f32 %v3953_v60, %v3852_v62  ;;  %v3492_v13 = vrot.slane %v3421_v61, 1  ;;  %v3646_v32 = vrot.slane %v3575_v45, 1  ;;  %v4037_v53 = vmul.f32 %v8326_v58, %v8764_v40 }
 0x27d   : > { %v3339_v23 = vsel %vm1452_vm3, %v3336_v37, %v3338_v47  ;;  %v3800_v3 = vrot.slane %v3729_v55, 2  ;;  %v3954_v51 = vrot.slane %v3883_v46, 2  ;;  %v3130_v49 = vmul.f32 %v8353_v20, %v8649_v1 }
 0x27e   : > { %v4160_v59 = vadd.f32 %v4107_v31, %v4006_v21  ;;  %v3391_v28 = vadd.f32 %v3339_v23, %v3237_v42  ;;  %v3493_v22 = vsel %vm1452_vm3, %v3490_v50, %v3492_v13  ;;  %v3647_v24 = vsel %vm1452_vm3, %v3644_v8, %v3646_v32 }
 0x27f   : > { %v3801_v26 = vsel %vm2217_vm4, %v3798_v34, %v3800_v3  ;;  %v3955_v27 = vsel %vm2217_vm4, %v3952_v44, %v3954_v51  ;;  %v4108_v58 = vrot.slane %v4037_v53, 2  ;;  %v3174_v37 = vmul.f32 %v8357_v7, %v8719_v38 }
 0x280   : > { %v4187_v39 = vadd.f32 %v8442_v6, %v4160_v59  ;;  %v3545_v9 = vadd.f32 %v3493_v22, %v3391_v28  ;;  %v3218_v11 = vmul.f32 %v8361_v18, %v8789_v43  ;;  %v3268_v15 = vmul.f32 %v8365_v10, %v8649_v1 }
 0x281   : > { %v4109_v50 = vsel %vm2217_vm4, %v4106_v54, %v4108_v58  ;;  %v3194_v8 = vadd.f32 %v3174_v37, %v3130_v49  ;;  %v3269_v34 = vmul.f32 %v8365_v10, %v8670_v2  ;;  %v3422_v44 = vmul.f32 %v8369_v30, %v8719_v38 }
 0x282   : > { %6698 = vmatprep.mubr.msk.f32.mxu1 %vm605_vm0, %v4187_v39  ;;  %v3699_v48 = vadd.f32 %v3647_v24, %v3545_v9  ;;  %v3340_v60 = vrot.slane %v3268_v15, 1  ;;  %v3423_v52 = vmul.f32 %v8369_v30, %v8740_v4  ;;  %v3576_v19 = vmul.f32 %v8373_v14, %v8789_v43  ;;  %v8832_v24 = vld [vmem:[%s9794_s5 + $0x8] ss:$0 sm:$0xff]  ;;  %v8839_v39 = vld [vmem:[#allocation2 + $0xd0] sm:$0x3] }
 0x283   : > { %v3238_v54 = vadd.f32 %v3218_v11, %v3194_v8  ;;  %v3341_v36 = vrot.slane %v3269_v34, 1  ;;  %v3494_v62 = vrot.slane %v3422_v44, 1  ;;  %v3577_v31 = vmul.f32 %v8373_v14, %v8810_v33 }
 0x284   : > { %v3853_v61 = vadd.f32 %v3801_v26, %v3699_v48  ;;  %v3495_v45 = vrot.slane %v3423_v52, 1  ;;  %v3648_v42 = vrot.slane %v3576_v19, 1  ;;  %v3730_v47 = vmul.f32 %v8377_v16, %v8649_v1 }
 0x285   : > { %v3342_v55 = vsel %vm1452_vm3, %v3340_v60, %v3341_v36  ;;  %v3649_v46 = vrot.slane %v3577_v31, 1  ;;  %v3731_v21 = vmul.f32 %v8377_v16, %v8670_v2  ;;  %v3884_v13 = vmul.f32 %v8381_v35, %v8719_v38 }
 0x286   : > { %v4007_v32 = vadd.f32 %v3955_v27, %v3853_v61  ;;  %v3392_v53 = vadd.f32 %v3342_v55, %v3238_v54  ;;  %v3496_v23 = vsel %vm1452_vm3, %v3494_v62, %v3495_v45  ;;  %v3802_v3 = vrot.slane %v3730_v47, 2 }
 0x287   : > { %v3650_v51 = vsel %vm1452_vm3, %v3648_v42, %v3649_v46  ;;  %v3803_v49 = vrot.slane %v3731_v21, 2  ;;  %v3885_v1 = vmul.f32 %v8381_v35, %v8740_v4  ;;  %v3956_v59 = vrot.slane %v3884_v13, 2 }
 0x288   : > { %v4161_v28 = vadd.f32 %v4109_v50, %v4007_v32  ;;  %v3546_v22 = vadd.f32 %v3496_v23, %v3392_v53  ;;  %v4038_v26 = vmul.f32 %v8832_v24, %v8789_v43  ;;  %v4039_v27 = vmul.f32 %v8832_v24, %v8810_v33 }
 0x289   : > { %v3804_v58 = vsel %vm2217_vm4, %v3802_v3, %v3803_v49  ;;  %v3957_v37 = vrot.slane %v3885_v1, 2  ;;  %v3131_v9 = vmul.f32 %v8353_v20, %v8670_v2  ;;  %v3175_v11 = vmul.f32 %v8357_v7, %v8740_v4 }
 0x28a   : > { %v4188_v15 = vadd.f32 %v8442_v6, %v4161_v28  ;;  %v3700_v50 = vadd.f32 %v3650_v51, %v3546_v22  ;;  %v4110_v8 = vrot.slane %v4038_v26, 2  ;;  %v4111_v34 = vrot.slane %v4039_v27, 2  ;;  %v8864_v51 = vld [vmem:[#allocation2 + $0xd8] sm:$0xff] }
 0x28b   : > { %v3958_v44 = vsel %vm2217_vm4, %v3956_v59, %v3957_v37  ;;  %v3195_v48 = vadd.f32 %v3175_v11, %v3131_v9  ;;  %v3219_v60 = vmul.f32 %v8361_v18, %v8810_v33  ;;  %v3270_v52 = vmul.f32 %v8365_v10, %v8694_v12 }
 0x28c   : > { %6699 = vmatmul.mubr.msk.f32.gmra.mxu1 %vm605_vm0, %v4188_v15  ;;  %v3854_v2 = vadd.f32 %v3804_v58, %v3700_v50  ;;  %v4112_v19 = vsel %vm2217_vm4, %v4110_v8, %v4111_v34  ;;  %v3424_v54 = vmul.f32 %v8369_v30, %v8764_v40  ;;  %v3578_v62 = vmul.f32 %v8373_v14, %v8839_v39 }
 0x28d   : > { %v3239_v31 = vadd.f32 %v3219_v60, %v3195_v48  ;;  %v3343_v61 = vrot.slane %v3270_v52, 1  ;;  %v3732_v42 = vmul.f32 %v8377_v16, %v8694_v12  ;;  %v3886_v47 = vmul.f32 %v8381_v35, %v8764_v40 }
 0x28e   : > { %v4008_v55 = vadd.f32 %v3958_v44, %v3854_v2  ;;  %v3497_v21 = vrot.slane %v3424_v54, 1  ;;  %v3651_v13 = vrot.slane %v3578_v62, 1  ;;  %v4040_v32 = vmul.f32 %v8832_v24, %v8839_v39  ;;  %v8885_v44 = vld [vmem:[#allocation2 + $0xe0] sm:$0xff] }
 0x28f   : > { %v3344_v53 = vsel %vm1452_vm3, %v3341_v36, %v3343_v61  ;;  %v3805_v23 = vrot.slane %v3732_v42, 2  ;;  %v3959_v3 = vrot.slane %v3886_v47, 2  ;;  %v3132_v1 = vmul.f32 %v8353_v20, %v8719_v38 }
 0x290   : > { %v4162_v59 = vadd.f32 %v4112_v19, %v4008_v55  ;;  %v3393_v12 = vadd.f32 %v3344_v53, %v3239_v31  ;;  %v3498_v28 = vsel %vm1452_vm3, %v3495_v45, %v3497_v21  ;;  %v3652_v22 = vsel %vm1452_vm3, %v3649_v46, %v3651_v13 }
 0x291   : > { %v3806_v26 = vsel %vm2217_vm4, %v3803_v49, %v3805_v23  ;;  %v3960_v27 = vsel %vm2217_vm4, %v3957_v37, %v3959_v3  ;;  %v4113_v58 = vrot.slane %v4040_v32, 2  ;;  %v3176_v36 = vmul.f32 %v8357_v7, %v8789_v43 }
 0x292   : > { %v4189_v9 = vadd.f32 %v8442_v6, %v4162_v59  ;;  %v3547_v11 = vadd.f32 %v3498_v28, %v3393_v12  ;;  %v3220_v15 = vmul.f32 %v8361_v18, %v8864_v51  ;;  %v3271_v50 = vmul.f32 %v8365_v10, %v8719_v38 }
 0x293   : > { %v4114_v45 = vsel %vm2217_vm4, %v4111_v34, %v4113_v58  ;;  %v3196_v46 = vadd.f32 %v3176_v36, %v3132_v1  ;;  %v3272_v49 = vmul.f32 %v8365_v10, %v8740_v4  ;;  %v3425_v37 = vmul.f32 %v8369_v30, %v8789_v43 }
 0x294   : > { %6701 = vmatprep.mubr.msk.f32.mxu1 %vm605_vm0, %v4189_v9  ;;  %v3701_v8 = vadd.f32 %v3652_v22, %v3547_v11  ;;  %v3345_v48 = vrot.slane %v3271_v50, 1  ;;  %v3426_v60 = vmul.f32 %v8369_v30, %v8810_v33  ;;  %v3579_v52 = vmul.f32 %v8373_v14, %v8864_v51  ;;  %v8909_v9 = vld [vmem:[#allocation2 + $0xe8] sm:$0x3] }
 0x295   : > { %v3240_v34 = vadd.f32 %v3220_v15, %v3196_v46  ;;  %v3346_v2 = vrot.slane %v3272_v49, 1  ;;  %v3499_v19 = vrot.slane %v3425_v37, 1  ;;  %v3580_v54 = vmul.f32 %v8373_v14, %v8885_v44 }
 0x296   : > { %v3855_v62 = vadd.f32 %v3806_v26, %v3701_v8  ;;  %v3500_v31 = vrot.slane %v3426_v60, 1  ;;  %v3653_v61 = vrot.slane %v3579_v52, 1  ;;  %v3733_v42 = vmul.f32 %v8377_v16, %v8719_v38 }
 0x297   : > { %v3347_v47 = vsel %vm1452_vm3, %v3345_v48, %v3346_v2  ;;  %v3654_v55 = vrot.slane %v3580_v54, 1  ;;  %v3734_v21 = vmul.f32 %v8377_v16, %v8740_v4  ;;  %v3887_v13 = vmul.f32 %v8381_v35, %v8789_v43 }
 0x298   : > { %v4009_v32 = vadd.f32 %v3960_v27, %v3855_v62  ;;  %v3394_v53 = vadd.f32 %v3347_v47, %v3240_v34  ;;  %v3501_v23 = vsel %vm1452_vm3, %v3499_v19, %v3500_v31  ;;  %v3807_v3 = vrot.slane %v3733_v42, 2 }
 0x299   : > { %v3655_v1 = vsel %vm1452_vm3, %v3653_v61, %v3654_v55  ;;  %v3808_v59 = vrot.slane %v3734_v21, 2  ;;  %v3888_v38 = vmul.f32 %v8381_v35, %v8810_v33  ;;  %v3961_v12 = vrot.slane %v3887_v13, 2 }
 0x29a   : > { %v4163_v28 = vadd.f32 %v4114_v45, %v4009_v32  ;;  %v3548_v22 = vadd.f32 %v3501_v23, %v3394_v53  ;;  %v4041_v26 = vmul.f32 %v8832_v24, %v8864_v51  ;;  %v4042_v58 = vmul.f32 %v8832_v24, %v8885_v44 }
 0x29b   : > { %v3809_v27 = vsel %vm2217_vm4, %v3807_v3, %v3808_v59  ;;  %v3962_v36 = vrot.slane %v3888_v38, 2  ;;  %v3133_v11 = vmul.f32 %v8353_v20, %v8740_v4  ;;  %v3177_v15 = vmul.f32 %v8357_v7, %v8810_v33  ;;  %v8934_v3 = vld [vmem:[#allocation2 + $0xf0] sm:$0xff] }
 0x29c   : > { %v4190_v50 = vadd.f32 %v8442_v6, %v4163_v28  ;;  %v3702_v45 = vadd.f32 %v3655_v1, %v3548_v22  ;;  %v4115_v46 = vrot.slane %v4041_v26, 2  ;;  %v4116_v49 = vrot.slane %v4042_v58, 2 }
 0x29d   : > { %v3963_v37 = vsel %vm2217_vm4, %v3961_v12, %v3962_v36  ;;  %v3197_v8 = vadd.f32 %v3177_v15, %v3133_v11  ;;  %v3221_v48 = vmul.f32 %v8361_v18, %v8885_v44  ;;  %v3273_v60 = vmul.f32 %v8365_v10, %v8764_v40 }
 0x29e   : > { %6702 = vmatmul.mubr.msk.f32.gmra.mxu1 %vm605_vm0, %v4190_v50  ;;  %v3856_v4 = vadd.f32 %v3809_v27, %v3702_v45  ;;  %v4117_v52 = vsel %vm2217_vm4, %v4115_v46, %v4116_v49  ;;  %v3427_v6 = vmul.f32 %v8369_v30, %v8839_v39  ;;  %v3581_v34 = vmul.f32 %v8373_v14, %v8909_v9  ;;  %v8947_v27 = vld [vmem:[%s9795_s6] ss:$0 sm:$0xff] }
 0x29f   : > { %v3241_v19 = vadd.f32 %v3221_v48, %v3197_v8  ;;  %v3348_v54 = vrot.slane %v3273_v60, 1  ;;  %v3735_v62 = vmul.f32 %v8377_v16, %v8764_v40  ;;  %v3889_v61 = vmul.f32 %v8381_v35, %v8839_v39 }
 0x2a0   : > { %v4010_v42 = vadd.f32 %v3963_v37, %v3856_v4  ;;  %v3502_v47 = vrot.slane %v3427_v6, 1  ;;  %v3656_v21 = vrot.slane %v3581_v34, 1  ;;  %v4043_v13 = vmul.f32 %v8832_v24, %v8909_v9  ;;  %v8960_v37 = vld [vmem:[#allocation2 + $0xf8] sm:$0xff] }
 0x2a1   : > { %v3349_v32 = vsel %vm1452_vm3, %v3346_v2, %v3348_v54  ;;  %v3810_v53 = vrot.slane %v3735_v62, 2  ;;  %v3964_v23 = vrot.slane %v3889_v61, 2  ;;  %v3134_v1 = vmul.f32 %v8353_v20, %v8789_v43 }
 0x2a2   : > { %v4164_v38 = vadd.f32 %v4117_v52, %v4010_v42  ;;  %v3395_v40 = vadd.f32 %v3349_v32, %v3241_v19  ;;  %v3503_v12 = vsel %vm1452_vm3, %v3500_v31, %v3502_v47  ;;  %v3657_v28 = vsel %vm1452_vm3, %v3654_v55, %v3656_v21 }
 0x2a3   : > { %v3811_v22 = vsel %vm2217_vm4, %v3808_v59, %v3810_v53  ;;  %v3965_v26 = vsel %vm2217_vm4, %v3962_v36, %v3964_v23  ;;  %v4118_v58 = vrot.slane %v4043_v13, 2  ;;  %v3178_v2 = vmul.f32 %v8357_v7, %v8864_v51 }
 0x2a4   : > { %v4191_v11 = vadd.f32 %v8947_v27, %v4164_v38  ;;  %v3549_v15 = vadd.f32 %v3503_v12, %v3395_v40  ;;  %v3222_v31 = vmul.f32 %v8361_v18, %v8934_v3  ;;  %v3274_v55 = vmul.f32 %v8365_v10, %v8789_v43 }
 0x2a5   : > { %v4119_v59 = vsel %vm2217_vm4, %v4116_v49, %v4118_v58  ;;  %v3198_v36 = vadd.f32 %v3178_v2, %v3134_v1  ;;  %v3275_v50 = vmul.f32 %v8365_v10, %v8810_v33  ;;  %v3428_v45 = vmul.f32 %v8369_v30, %v8864_v51 }
 0x2a6   : > { %6704 = vmatprep.mubr.msk.f32.mxu1 %vm605_vm0, %v4191_v11  ;;  %v3703_v46 = vadd.f32 %v3657_v28, %v3549_v15  ;;  %v3350_v8 = vrot.slane %v3274_v55, 1  ;;  %v3429_v48 = vmul.f32 %v8369_v30, %v8885_v44  ;;  %v3582_v60 = vmul.f32 %v8373_v14, %v8934_v3  ;;  %v8984_v11 = vld [vmem:[#allocation2 + $0x100] sm:$0x3] }
 0x2a7   : > { %v3242_v49 = vadd.f32 %v3222_v31, %v3198_v36  ;;  %v3351_v4 = vrot.slane %v3275_v50, 1  ;;  %v3504_v52 = vrot.slane %v3428_v45, 1  ;;  %v3583_v6 = vmul.f32 %v8373_v14, %v8960_v37 }
 0x2a8   : > { %v3857_v34 = vadd.f32 %v3811_v22, %v3703_v46  ;;  %v3505_v19 = vrot.slane %v3429_v48, 1  ;;  %v3658_v54 = vrot.slane %v3582_v60, 1  ;;  %v3736_v62 = vmul.f32 %v8377_v16, %v8789_v43 }
 0x2a9   : > { %v3352_v61 = vsel %vm1452_vm3, %v3350_v8, %v3351_v4  ;;  %v3659_v42 = vrot.slane %v3583_v6, 1  ;;  %v3737_v47 = vmul.f32 %v8377_v16, %v8810_v33  ;;  %v3890_v21 = vmul.f32 %v8381_v35, %v8864_v51 }
 0x2aa   : > { %v4011_v13 = vadd.f32 %v3965_v26, %v3857_v34  ;;  %v3396_v32 = vadd.f32 %v3352_v61, %v3242_v49  ;;  %v3506_v53 = vsel %vm1452_vm3, %v3504_v52, %v3505_v19  ;;  %v3812_v23 = vrot.slane %v3736_v62, 2 }
 0x2ab   : > { %v3660_v1 = vsel %vm1452_vm3, %v3658_v54, %v3659_v42  ;;  %v3813_v38 = vrot.slane %v3737_v47, 2  ;;  %v3891_v43 = vmul.f32 %v8381_v35, %v8885_v44  ;;  %v3966_v40 = vrot.slane %v3890_v21, 2 }
 0x2ac   : > { %v4165_v12 = vadd.f32 %v4119_v59, %v4011_v13  ;;  %v3550_v28 = vadd.f32 %v3506_v53, %v3396_v32  ;;  %v4044_v22 = vmul.f32 %v8832_v24, %v8934_v3  ;;  %v4045_v58 = vmul.f32 %v8832_v24, %v8960_v37 }
 0x2ad   : > { %v3814_v26 = vsel %vm2217_vm4, %v3812_v23, %v3813_v38  ;;  %v3967_v2 = vrot.slane %v3891_v43, 2  ;;  %v3135_v15 = vmul.f32 %v8353_v20, %v8810_v33  ;;  %v3179_v31 = vmul.f32 %v8357_v7, %v8885_v44 }
 0x2ae   : > { %v4192_v55 = vadd.f32 %v8947_v27, %v4165_v12  ;;  %v3704_v59 = vadd.f32 %v3660_v1, %v3550_v28  ;;  %v4120_v36 = vrot.slane %v4044_v22, 2  ;;  %v4121_v50 = vrot.slane %v4045_v58, 2  ;;  %v3109_v28 = vld [vmem:[#allocation2 + $0x108] sm:$0xff]  ;;  %v3110_v22 = vld [vmem:[#allocation2 + $0x110] sm:$0xff] }
 0x2af   : > { %v3968_v45 = vsel %vm2217_vm4, %v3966_v40, %v3967_v2  ;;  %v3199_v46 = vadd.f32 %v3179_v31, %v3135_v15  ;;  %v3223_v8 = vmul.f32 %v8361_v18, %v8960_v37  ;;  %v3276_v48 = vmul.f32 %v8365_v10, %v8839_v39 }
 0x2b0   : > { %6705 = vmatmul.mubr.msk.f32.gmra.mxu1 %vm605_vm0, %v4192_v55  ;;  %v3858_v33 = vadd.f32 %v3814_v26, %v3704_v59  ;;  %v4122_v60 = vsel %vm2217_vm4, %v4120_v36, %v4121_v50  ;;  %v3430_v49 = vmul.f32 %v8369_v30, %v8909_v9  ;;  %v3584_v52 = vmul.f32 %v8373_v14, %v8984_v11 }
 0x2b1   : > { %v3243_v6 = vadd.f32 %v3223_v8, %v3199_v46  ;;  %v3353_v34 = vrot.slane %v3276_v48, 1  ;;  %v3738_v54 = vmul.f32 %v8377_v16, %v8839_v39  ;;  %v3892_v62 = vmul.f32 %v8381_v35, %v8909_v9 }
 0x2b2   : > { %v4012_v61 = vadd.f32 %v3968_v45, %v3858_v33  ;;  %v3507_v47 = vrot.slane %v3430_v49, 1  ;;  %v3661_v21 = vrot.slane %v3584_v52, 1  ;;  %v4046_v13 = vmul.f32 %v8832_v24, %v8984_v11 }
 0x2b3   : > { %v3354_v32 = vsel %vm1452_vm3, %v3351_v4, %v3353_v34  ;;  %v3815_v53 = vrot.slane %v3738_v54, 2  ;;  %v3969_v23 = vrot.slane %v3892_v62, 2  ;;  %v3136_v1 = vmul.f32 %v8353_v20, %v8864_v51 }
 0x2b4   : > { %v4166_v43 = vadd.f32 %v4122_v60, %v4012_v61  ;;  %v3397_v40 = vadd.f32 %v3354_v32, %v3243_v6  ;;  %v3508_v39 = vsel %vm1452_vm3, %v3505_v19, %v3507_v47  ;;  %v3662_v12 = vsel %vm1452_vm3, %v3659_v42, %v3661_v21 }
 0x2b5   : > { %v3816_v58 = vsel %vm2217_vm4, %v3813_v38, %v3815_v53  ;;  %v3970_v26 = vsel %vm2217_vm4, %v3967_v2, %v3969_v23  ;;  %v4123_v15 = vrot.slane %v4046_v13, 2  ;;  %v3137_v4 = vmul.f32 %v8353_v20, %v8885_v44 }
 0x2b6   : > { %v4193_v31 = vadd.f32 %v8947_v27, %v4166_v43  ;;  %v3551_v55 = vadd.f32 %v3508_v39, %v3397_v40  ;;  %v3180_v59 = vmul.f32 %v8357_v7, %v8934_v3  ;;  %v3181_v19 = vmul.f32 %v8357_v7, %v8960_v37 }
 0x2b7   : > { %v4124_v42 = vsel %vm2217_vm4, %v4121_v50, %v4123_v15  ;;  %v3224_v36 = vmul.f32 %v8361_v18, %v3109_v28  ;;  %v3225_v38 = vmul.f32 %v8361_v18, %v3110_v22  ;;  %v3277_v2 = vmul.f32 %v8365_v10, %v8864_v51 }
 0x2b8   : > { %6707 = vmatprep.mubr.msk.f32.mxu1 %vm605_vm0, %v4193_v31  ;;  %v3705_v20 = vadd.f32 %v3662_v12, %v3551_v55  ;;  %v3200_v45 = vadd.f32 %v3180_v59, %v3136_v1  ;;  %v3201_v46 = vadd.f32 %v3181_v19, %v3137_v4  ;;  %v3278_v8 = vmul.f32 %v8365_v10, %v8885_v44 }
 0x2b9   : > { %v3355_v48 = vrot.slane %v3277_v2, 1  ;;  %v3431_v7 = vmul.f32 %v8369_v30, %v8934_v3  ;;  %v3432_v50 = vmul.f32 %v8369_v30, %v8960_v37  ;;  %v3585_v18 = vmul.f32 %v8373_v14, %v3109_v28 }
 0x2ba   : > { %v3859_v33 = vadd.f32 %v3816_v58, %v3705_v20  ;;  %v3244_v60 = vadd.f32 %v3224_v36, %v3200_v45  ;;  %v3245_v49 = vadd.f32 %v3225_v38, %v3201_v46  ;;  %v3356_v52 = vrot.slane %v3278_v8, 1 }
 0x2bb   : > { %v3509_v6 = vrot.slane %v3431_v7, 1  ;;  %v3510_v34 = vrot.slane %v3432_v50, 1  ;;  %v3586_v54 = vmul.f32 %v8373_v14, %v3110_v22  ;;  %v3663_v62 = vrot.slane %v3585_v18, 1 }
 0x2bc   : > { %v4013_v61 = vadd.f32 %v3970_v26, %v3859_v33  ;;  %v3357_v47 = vsel %vm1452_vm3, %v3355_v48, %v3356_v52  ;;  %v3739_v21 = vmul.f32 %v8377_v16, %v8864_v51  ;;  %v3740_v13 = vmul.f32 %v8377_v16, %v8885_v44  ;;  %v3111_v44 = vld [vmem:[#allocation2 + $0x118] sm:$0x3] }
 0x2bd   : > { %v3398_v32 = vadd.f32 %v3357_v47, %v3244_v60  ;;  %v3511_v53 = vsel %vm1452_vm3, %v3509_v6, %v3510_v34  ;;  %v3664_v23 = vrot.slane %v3586_v54, 1  ;;  %v3893_v1 = vmul.f32 %v8381_v35, %v8934_v3  ;;  %v9077_v47 = vld [vmem:[%s9797_s8] ss:$0 sm:$0xff] }
 0x2be   : > { %v4167_v43 = vadd.f32 %v4124_v42, %v4013_v61  ;;  %v3817_v40 = vrot.slane %v3739_v21, 2  ;;  %v3818_v39 = vrot.slane %v3740_v13, 2  ;;  %v3894_v12 = vmul.f32 %v8381_v35, %v8960_v37 }
 0x2bf   : > { %v3552_v58 = vadd.f32 %v3511_v53, %v3398_v32  ;;  %v3665_v26 = vsel %vm1452_vm3, %v3663_v62, %v3664_v23  ;;  %v3971_v51 = vrot.slane %v3893_v1, 2  ;;  %v4047_v15 = vmul.f32 %v8832_v24, %v3109_v28 }
 0x2c0   : > { %v4194_v4 = vadd.f32 %v8947_v27, %v4167_v43  ;;  %v3819_v31 = vsel %vm2217_vm4, %v3817_v40, %v3818_v39  ;;  %v3972_v55 = vrot.slane %v3894_v12, 2  ;;  %v4048_v3 = vmul.f32 %v8832_v24, %v3110_v22 }
 0x2c1   : > { %v3706_v59 = vadd.f32 %v3665_v26, %v3552_v58  ;;  %v4125_v19 = vrot.slane %v4047_v15, 2  ;;  %v3279_v42 = vmul.f32 %v8365_v10, %v8909_v9  ;;  %v3433_v37 = vmul.f32 %v8369_v30, %v8984_v11 }
 0x2c2   : > { %6708 = vmatmul.mubr.msk.f32.gmra.mxu1 %vm605_vm0, %v4194_v4  ;;  %v3973_v28 = vsel %vm2217_vm4, %v3971_v51, %v3972_v55  ;;  %v4126_v36 = vrot.slane %v4048_v3, 2  ;;  %v3587_v38 = vmul.f32 %v8373_v14, %v3111_v44  ;;  %v3741_v2 = vmul.f32 %v8377_v16, %v8909_v9 }
 0x2c3   : > { %v3860_v20 = vadd.f32 %v3819_v31, %v3706_v59  ;;  %v3358_v22 = vrot.slane %v3279_v42, 1  ;;  %v3512_v45 = vrot.slane %v3433_v37, 1  ;;  %v3895_v46 = vmul.f32 %v8381_v35, %v8984_v11 }
 0x2c4   : > { %v4127_v10 = vsel %vm2217_vm4, %v4125_v19, %v4126_v36  ;;  %v3666_v8 = vrot.slane %v3587_v38, 1  ;;  %v3820_v30 = vrot.slane %v3741_v2, 2  ;;  %v4049_v14 = vmul.f32 %v8832_v24, %v3111_v44 }
 0x2c5   : > { %v4014_v48 = vadd.f32 %v3973_v28, %v3860_v20  ;;  %v3359_v7 = vsel %vm1452_vm3, %v3356_v52, %v3358_v22  ;;  %v3513_v50 = vsel %vm1452_vm3, %v3510_v34, %v3512_v45  ;;  %v3974_v9 = vrot.slane %v3895_v46, 2 }
 0x2c6   : > { %v3399_v18 = vadd.f32 %v3359_v7, %v3245_v49  ;;  %v3667_v16 = vsel %vm1452_vm3, %v3664_v23, %v3666_v8  ;;  %v3821_v35 = vsel %vm2217_vm4, %v3818_v39, %v3820_v30  ;;  %v4128_v11 = vrot.slane %v4049_v14, 2 }
 0x2c7   : > { %v4168_v33 = vadd.f32 %v4127_v10, %v4014_v48  ;;  %v3975_v52 = vsel %vm2217_vm4, %v3972_v55, %v3974_v9 }
 0x2c8   : > { %v3553_v60 = vadd.f32 %v3513_v50, %v3399_v18  ;;  %v4129_v34 = vsel %vm2217_vm4, %v4126_v36, %v4128_v11 }
 0x2c9   : > { %v4195_v6 = vadd.f32 %v8947_v27, %v4168_v33 }
 0x2ca   : > { %v3707_v54 = vadd.f32 %v3667_v16, %v3553_v60 }
 0x2cb   : > { %6710 = vmatprep.mubr.msk.f32.mxu1 %vm605_vm0, %v4195_v6 }
 0x2cc   : > { %v3861_v62 = vadd.f32 %v3821_v35, %v3707_v54 }
 0x2ce   : > { %v4015_v24 = vadd.f32 %v3975_v52, %v3861_v62 }
 0x2d0   : > { %v4169_v49 = vadd.f32 %v4129_v34, %v4015_v24 }
 0x2d2   : > { %v4196_v61 = vadd.f32 %v8947_v27, %v4169_v49 }
 0x2d4   : > { %6711 = vmatmul.mubr.msk.f32.gmra.mxu1 %vm605_vm0, %v4196_v61 }
 0x2f2   : > { %v6685_v21 = vpop.f32.mrf.mxu1 }
 0x2f3   : > { %v4340_v13 = vadd.f32 %v6685_v21, %v9077_v47 }
 0x2f4   : > { %v4334_v32 = vpop.f32.mrf.mxu1 }
 0x2f5   : > { %v4434_v53 = vmax.f32 %v4340_v13, 0.0  ;;  %v4335_v23 = vadd.f32 %v9077_v47, %v4334_v32 }
 0x2f7   : > { %4454 = vst.msk [vmem:[#allocation2 + $0x9] sm:$0xff] %vm605_vm0, %v4434_v53  ;;  %v4433_v1 = vmax.f32 %v4335_v23, 0.0 }
 0x2f9   : > { %4453 = vst.msk [vmem:[#allocation2 + $0x1] sm:$0xff] %vm605_vm0, %v4433_v1 }
 0x304   : > { %v6688_v27 = vpop.f32.mrf.mxu1 }
 0x305   : > { %v4350_v43 = vadd.f32 %v6688_v27, %v9077_v47 }
 0x306   : > { %v4344_v40 = vpop.f32.mrf.mxu1 }
 0x307   : > { %v4436_v39 = vmax.f32 %v4350_v43, 0.0  ;;  %v4345_v12 = vadd.f32 %v9077_v47, %v4344_v40 }
 0x309   : > { %4456 = vst.msk [vmem:[#allocation2 + $0x21] sm:$0xff] %vm605_vm0, %v4436_v39  ;;  %v4435_v58 = vmax.f32 %v4345_v12, 0.0 }
 0x30b   : > { %4455 = vst.msk [vmem:[#allocation2 + $0x19] sm:$0xff] %vm605_vm0, %v4435_v58 }
 0x316   : > { %v6691_v26 = vpop.f32.mrf.mxu1 }
 0x317   : > { %v4360_v51 = vadd.f32 %v6691_v26, %v9077_v47 }
 0x318   : > { %v4354_v15 = vpop.f32.mrf.mxu1 }
 0x319   : > { %v4438_v44 = vmax.f32 %v4360_v51, 0.0  ;;  %v4355_v4 = vadd.f32 %v9077_v47, %v4354_v15 }
 0x31b   : > { %4458 = vst.msk [vmem:[#allocation2 + $0x39] sm:$0xff] %vm605_vm0, %v4438_v44  ;;  %v4437_v31 = vmax.f32 %v4355_v4, 0.0 }
 0x31d   : > { %4457 = vst.msk [vmem:[#allocation2 + $0x31] sm:$0xff] %vm605_vm0, %v4437_v31 }
 0x328   : > { %v6694_v55 = vpop.f32.mrf.mxu1 }
 0x329   : > { %v4370_v3 = vadd.f32 %v6694_v55, %v9077_v47 }
 0x32a   : > { %v4364_v59 = vpop.f32.mrf.mxu1 }
 0x32b   : > { %v4440_v19 = vmax.f32 %v4370_v3, 0.0  ;;  %v4365_v42 = vadd.f32 %v9077_v47, %v4364_v59 }
 0x32d   : > { %4460 = vst.msk [vmem:[#allocation2 + $0x51] sm:$0xff] %vm605_vm0, %v4440_v19  ;;  %v4439_v37 = vmax.f32 %v4365_v42, 0.0 }
 0x32f   : > { %4459 = vst.msk [vmem:[#allocation2 + $0x49] sm:$0xff] %vm605_vm0, %v4439_v37 }
 0x33a   : > { %v6697_v28 = vpop.f32.mrf.mxu1 }
 0x33b   : > { %v4380_v36 = vadd.f32 %v6697_v28, %v9077_v47 }
 0x33c   : > { %v4374_v38 = vpop.f32.mrf.mxu1 }
 0x33d   : > { %v4442_v2 = vmax.f32 %v4380_v36, 0.0  ;;  %v4375_v20 = vadd.f32 %v9077_v47, %v4374_v38 }
 0x33f   : > { %4462 = vst.msk [vmem:[#allocation2 + $0x69] sm:$0xff] %vm605_vm0, %v4442_v2  ;;  %v4441_v22 = vmax.f32 %v4375_v20, 0.0 }
 0x341   : > { %4461 = vst.msk [vmem:[#allocation2 + $0x61] sm:$0xff] %vm605_vm0, %v4441_v22 }
 0x34c   : > { %v6700_v45 = vpop.f32.mrf.mxu1 }
 0x34d   : > { %v4390_v46 = vadd.f32 %v6700_v45, %v9077_v47 }
 0x34e   : > { %v4384_v10 = vpop.f32.mrf.mxu1 }
 0x34f   : > { %v4444_v8 = vmax.f32 %v4390_v46, 0.0  ;;  %v4385_v30 = vadd.f32 %v9077_v47, %v4384_v10 }
 0x351   : > { %4464 = vst.msk [vmem:[#allocation2 + $0x81] sm:$0xff] %vm605_vm0, %v4444_v8  ;;  %v4443_v48 = vmax.f32 %v4385_v30, 0.0 }
 0x353   : > { %4463 = vst.msk [vmem:[#allocation2 + $0x79] sm:$0xff] %vm605_vm0, %v4443_v48 }
 0x35e   : > { %v6703_v7 = vpop.f32.mrf.mxu1 }
 0x35f   : > { %v4400_v50 = vadd.f32 %v6703_v7, %v9077_v47 }
 0x360   : > { %v4394_v14 = vpop.f32.mrf.mxu1 }
 0x361   : > { %v4446_v18 = vmax.f32 %v4400_v50, 0.0  ;;  %v4395_v33 = vadd.f32 %v9077_v47, %v4394_v14 }
 0x363   : > { %4466 = vst.msk [vmem:[#allocation2 + $0x99] sm:$0xff] %vm605_vm0, %v4446_v18  ;;  %v4445_v16 = vmax.f32 %v4395_v33, 0.0 }
 0x365   : > { %4465 = vst.msk [vmem:[#allocation2 + $0x91] sm:$0xff] %vm605_vm0, %v4445_v16 }
 0x370   : > { %v6706_v9 = vpop.f32.mrf.mxu1 }
 0x371   : > { %v4410_v60 = vadd.f32 %v6706_v9, %v9077_v47 }
 0x372   : > { %v4404_v6 = vpop.f32.mrf.mxu1 }
 0x373   : > { %v4448_v35 = vmax.f32 %v4410_v60, 0.0  ;;  %v4405_v11 = vadd.f32 %v9077_v47, %v4404_v6 }
 0x375   : > { %4468 = vst.msk [vmem:[#allocation2 + $0xb1] sm:$0xff] %vm605_vm0, %v4448_v35  ;;  %v4447_v54 = vmax.f32 %v4405_v11, 0.0 }
 0x377   : > { %4467 = vst.msk [vmem:[#allocation2 + $0xa9] sm:$0xff] %vm605_vm0, %v4447_v54 }
 0x382   : > { %v6709_v52 = vpop.f32.mrf.mxu1 }
 0x383   : > { %v4420_v62 = vadd.f32 %v6709_v52, %v9077_v47 }
 0x384   : > { %v4414_v34 = vpop.f32.mrf.mxu1 }
 0x385   : > { %v4450_v24 = vmax.f32 %v4420_v62, 0.0  ;;  %v4415_v49 = vadd.f32 %v9077_v47, %v4414_v34 }
 0x387   : > { %4470 = vst.msk [vmem:[#allocation2 + $0xc9] sm:$0xff] %vm605_vm0, %v4450_v24  ;;  %v4449_v61 = vmax.f32 %v4415_v49, 0.0 }
 0x389   : > { %4469 = vst.msk [vmem:[#allocation2 + $0xc1] sm:$0xff] %vm605_vm0, %v4449_v61 }
 0x394   : > { %v6712_v21 = vpop.f32.mrf.mxu1 }
 0x395   : > { %v4430_v13 = vadd.f32 %v6712_v21, %v9077_v47 }
 0x396   : > { %v4424_v32 = vpop.f32.mrf.mxu1 }
 0x397   : > { %v4452_v53 = vmax.f32 %v4430_v13, 0.0  ;;  %v4425_v23 = vadd.f32 %v9077_v47, %v4424_v32  ;;  %4475 = sbr.rel (%p6026_p13) target bundleno = 926 (0x39e), region = 92 }
 0x399   : > { %4472 = vst.msk [vmem:[#allocation2 + $0xe1] sm:$0xff] %vm605_vm0, %v4452_v53  ;;  %v4451_v1 = vmax.f32 %v4425_v23, 0.0 }
 0x39b   : > { %4471 = vst.msk [vmem:[#allocation2 + $0xd9] sm:$0xff] %vm605_vm0, %v4451_v1 }
 0x39c   : > { %v6833_v27 = vmov 0.0  }
 0x39d   : > { %4476 = vst.msk [vmem:[#allocation2 + $0x1] sm:$0xff] %vm605_vm0, %v6833_v27  ;;  %4477 = vst.msk [vmem:[#allocation2 + $0x9] sm:$0xff] %vm605_vm0, %v6833_v27 }
 0x39e PF: > { %4480 = sbr.rel (%p6027_p0) target bundleno = 933 (0x3a5), region = 96 }
 0x3a3   : > { %v6834_v43 = vmov 0.0  }
 0x3a4   : > { %4482 = vst.msk [vmem:[#allocation2 + $0xd9] sm:$0xff] %vm605_vm0, %v6834_v43  ;;  %4483 = vst.msk [vmem:[#allocation2 + $0xe1] sm:$0xff] %vm605_vm0, %v6834_v43 }
 0x3a5 PF: > { %v5391_v47 = vld [vmem:[%s9800_s11] sm:$0xf]  ;;  %v9132_v12 = vld [vmem:[#allocation2 + $0x18] sm:$0xff]  ;;  %v9139_v51 = vld [vmem:[#allocation2 + $0x30] sm:$0xff] }
 0x3a6   : > { %6713 = vmatprep.subr.msk.mxu1 %vm839_vm2, %v5391_v47  ;;  %v4484_v40 = vld [vmem:[#allocation2] sm:$0xff]  ;;  %v4485_v39 = vld [vmem:[#allocation2 + $0x8] sm:$0xff]  ;;  %v4486_v60 = vld [vmem:[#allocation2 + $0x10] sm:$0x3] }
 0x3a7   : > { %6714 = vmatpush3.msk.msra.mxu1 %vm839_vm2, %v5391_v47  ;;  %v9134_v58 = vld [vmem:[#allocation2 + $0x20] sm:$0xff]  ;;  %v9196_v45 = vld [vmem:[%s9798_s9 + $0x8] ss:$0 sm:$0xff] }
 0x3a8   : > { %v4514_v26 = vld [vmem:[%s9798_s9] sm:$0xff]  ;;  %v9206_v6 = vld [vmem:[#allocation2 + $0x28] sm:$0x3]  ;;  %v5248_v52 = vmul.f32 %v9196_v45, %v9139_v51 }
 0x3a9   : > { %v9143_v15 = vrot.slane %v4514_v26, %v3116_v5  ;;  %v9147_v44 = vrot.slane %v4514_v26, %v3160_v57  ;;  %v9151_v4 = vrot.slane %v4514_v26, %v3204_v29  ;;  %v9155_v31 = vrot.slane %v4514_v26, %v3248_v17  ;;  %v9213_v49 = vld [vmem:[#allocation2 + $0x40] sm:$0x3] }
 0x3aa   : > { %v9159_v55 = vrot.slane %v4514_v26, %v3402_v25  ;;  %v9163_v5 = vrot.slane %v4514_v26, %v3556_v41  ;;  %v9167_v57 = vrot.slane %v4514_v26, %v3710_v0  ;;  %v9171_v29 = vrot.slane %v4514_v26, %v3864_v56  ;;  %v9185_v56 = vld [vmem:[#allocation2 + $0x38] sm:$0xff] }
 0x3ab   : > { %v4520_v3 = vmul.f32 %v9143_v15, %v4484_v40  ;;  %v4521_v17 = vmul.f32 %v9143_v15, %v4485_v39  ;;  %v4556_v25 = vmul.f32 %v9147_v44, %v9132_v12  ;;  %v4557_v59 = vmul.f32 %v9147_v44, %v9134_v58 }
 0x3ac   : > { %v4592_v41 = vmul.f32 %v9151_v4, %v9139_v51  ;;  %v4628_v0 = vmul.f32 %v9155_v31, %v4484_v40  ;;  %v4629_v19 = vmul.f32 %v9155_v31, %v4485_v39  ;;  %v4752_v63 = vmul.f32 %v9159_v55, %v9132_v12 }
 0x3ad   : > { %v4572_v42 = vadd.f32 %v4556_v25, %v4520_v3  ;;  %v4573_v37 = vadd.f32 %v4557_v59, %v4521_v17  ;;  %v4753_v28 = vmul.f32 %v9159_v55, %v9134_v58  ;;  %v4876_v36 = vmul.f32 %v9163_v5, %v9139_v51 }
 0x3ae   : > { %v4676_v38 = vrot.slane %v4628_v0, 1  ;;  %v4677_v2 = vrot.slane %v4629_v19, 1  ;;  %v4800_v20 = vrot.slane %v4752_v63, 1  ;;  %v4877_v22 = vmul.f32 %v9163_v5, %v9185_v56 }
 0x3af   : > { %v4608_v46 = vadd.f32 %v4592_v41, %v4572_v42  ;;  %v4801_v10 = vrot.slane %v4753_v28, 1  ;;  %v4924_v8 = vrot.slane %v4876_v36, 1  ;;  %v5000_v30 = vmul.f32 %v9167_v57, %v4484_v40 }
 0x3b0   : > { %v4678_v48 = vsel %vm1452_vm3, %v4676_v38, %v4677_v2  ;;  %v4925_v7 = vrot.slane %v4877_v22, 1  ;;  %v5001_v50 = vmul.f32 %v9167_v57, %v4485_v39  ;;  %v5124_v14 = vmul.f32 %v9171_v29, %v9132_v12  ;;  %v9232_v38 = vld [vmem:[#allocation2 + $0x48] sm:$0xff] }
 0x3b1   : > { %v4732_v18 = vadd.f32 %v4678_v48, %v4608_v46  ;;  %v4802_v33 = vsel %vm1452_vm3, %v4800_v20, %v4801_v10  ;;  %v5048_v16 = vrot.slane %v5000_v30, 2  ;;  %v5125_v9 = vmul.f32 %v9171_v29, %v9134_v58  ;;  %v9237_v20 = vld [vmem:[%s9799_s10] ss:$0 sm:$0xff] }
 0x3b2   : > { %v4926_v35 = vsel %vm1452_vm3, %v4924_v8, %v4925_v7  ;;  %v5049_v11 = vrot.slane %v5001_v50, 2  ;;  %v5172_v54 = vrot.slane %v5124_v14, 2  ;;  %v5249_v24 = vmul.f32 %v9196_v45, %v9185_v56 }
 0x3b3   : > { %v4856_v62 = vadd.f32 %v4802_v33, %v4732_v18  ;;  %v5173_v34 = vrot.slane %v5125_v9, 2  ;;  %v4593_v61 = vmul.f32 %v9151_v4, %v9185_v56  ;;  %v5296_v13 = vrot.slane %v5248_v52, 2 }
 0x3b4   : > { %v5050_v21 = vsel %vm2217_vm4, %v5048_v16, %v5049_v11  ;;  %v4630_v32 = vmul.f32 %v9155_v31, %v4486_v60  ;;  %v4754_v53 = vmul.f32 %v9159_v55, %v9206_v6  ;;  %v5297_v27 = vrot.slane %v5249_v24, 2 }
 0x3b5   : > { %v4980_v23 = vadd.f32 %v4926_v35, %v4856_v62  ;;  %v5174_v1 = vsel %vm2217_vm4, %v5172_v54, %v5173_v34  ;;  %v4609_v43 = vadd.f32 %v4593_v61, %v4573_v37  ;;  %v4878_v39 = vmul.f32 %v9163_v5, %v9213_v49 }
 0x3b6   : > { %v4679_v47 = vrot.slane %v4630_v32, 1  ;;  %v4803_v40 = vrot.slane %v4754_v53, 1  ;;  %v5002_v26 = vmul.f32 %v9167_v57, %v4486_v60  ;;  %v5298_v17 = vsel %vm2217_vm4, %v5296_v13, %v5297_v27 }
 0x3b7   : > { %v5104_v3 = vadd.f32 %v5050_v21, %v4980_v23  ;;  %v5126_v25 = vmul.f32 %v9171_v29, %v9206_v6  ;;  %v5250_v59 = vmul.f32 %v9196_v45, %v9213_v49  ;;  %v4927_v19 = vrot.slane %v4878_v39, 1 }
 0x3b8   : > { %v4680_v41 = vsel %vm1452_vm3, %v4677_v2, %v4679_v47  ;;  %v4804_v0 = vsel %vm1452_vm3, %v4801_v10, %v4803_v40  ;;  %v5051_v63 = vrot.slane %v5002_v26, 2  ;;  %v4522_v2 = vmul.f32 %v9143_v15, %v9132_v12 }
 0x3b9   : > { %v5228_v42 = vadd.f32 %v5174_v1, %v5104_v3  ;;  %v4733_v37 = vadd.f32 %v4680_v41, %v4609_v43  ;;  %v5175_v28 = vrot.slane %v5126_v25, 2  ;;  %v5299_v36 = vrot.slane %v5250_v59, 2 }
 0x3ba   : > { %v4928_v22 = vsel %vm1452_vm3, %v4925_v7, %v4927_v19  ;;  %v5052_v46 = vsel %vm2217_vm4, %v5049_v11, %v5051_v63  ;;  %v4558_v10 = vmul.f32 %v9147_v44, %v9139_v51  ;;  %v4594_v18 = vmul.f32 %v9151_v4, %v9232_v38  ;;  %v9260_v11 = vld [vmem:[#allocation2 + $0x50] sm:$0xff] }
 0x3bb   : > { %v5352_v8 = vadd.f32 %v5298_v17, %v5228_v42  ;;  %v4857_v30 = vadd.f32 %v4804_v0, %v4733_v37  ;;  %v5176_v48 = vsel %vm2217_vm4, %v5173_v34, %v5175_v28  ;;  %v5300_v50 = vsel %vm2217_vm4, %v5297_v27, %v5299_v36  ;;  %v9284_v37 = vld [vmem:[#allocation2 + $0x58] sm:$0x3] }
 0x3bc   : > { %v4574_v14 = vadd.f32 %v4558_v10, %v4522_v2  ;;  %v4631_v7 = vmul.f32 %v9155_v31, %v9132_v12  ;;  %v9253_v33 = vmul.f32 %v9155_v31, %v9134_v58  ;;  %v4755_v60 = vmul.f32 %v9159_v55, %v9139_v51 }
 0x3bd   : > { %v5375_v16 = vadd.f32 %v9237_v20, %v5352_v8  ;;  %v4981_v9 = vadd.f32 %v4928_v22, %v4857_v30  ;;  %v4756_v35 = vmul.f32 %v9159_v55, %v9185_v56  ;;  %v4879_v34 = vmul.f32 %v9163_v5, %v9232_v38 }
 0x3be   : > { %v4610_v54 = vadd.f32 %v4594_v18, %v4574_v14  ;;  %v4681_v52 = vrot.slane %v4631_v7, 1  ;;  %v4682_v62 = vrot.slane %v9253_v33, 1  ;;  %v4805_v61 = vrot.slane %v4755_v60, 1 }
 0x3bf   : > { %6715 = vmatprep.mubr.msk.f32.mxu1 %vm605_vm0, %v5375_v16  ;;  %v5105_v24 = vadd.f32 %v5052_v46, %v4981_v9  ;;  %v4806_v21 = vrot.slane %v4756_v35, 1  ;;  %v4880_v13 = vmul.f32 %v9163_v5, %v9260_v11  ;;  %v4929_v53 = vrot.slane %v4879_v34, 1 }
 0x3c0   : > { %v4683_v32 = vsel %vm1452_vm3, %v4681_v52, %v4682_v62  ;;  %v5003_v23 = vmul.f32 %v9167_v57, %v9132_v12  ;;  %v5004_v1 = vmul.f32 %v9167_v57, %v9134_v58  ;;  %v5127_v3 = vmul.f32 %v9171_v29, %v9139_v51 }
 0x3c1   : > { %v5229_v27 = vadd.f32 %v5176_v48, %v5105_v24  ;;  %v4734_v43 = vadd.f32 %v4683_v32, %v4610_v54  ;;  %v4807_v47 = vsel %vm1452_vm3, %v4805_v61, %v4806_v21  ;;  %v4930_v40 = vrot.slane %v4880_v13, 1  ;;  %v9308_v13 = vld [vmem:[#allocation2 + $0x60] sm:$0xff] }
 0x3c2   : > { %v5053_v39 = vrot.slane %v5003_v23, 2  ;;  %v5054_v26 = vrot.slane %v5004_v1, 2  ;;  %v5128_v17 = vmul.f32 %v9171_v29, %v9185_v56  ;;  %v5251_v41 = vmul.f32 %v9196_v45, %v9232_v38 }
 0x3c3   : > { %v5353_v25 = vadd.f32 %v5300_v50, %v5229_v27  ;;  %v4858_v59 = vadd.f32 %v4807_v47, %v4734_v43  ;;  %v4931_v12 = vsel %vm1452_vm3, %v4929_v53, %v4930_v40  ;;  %v5177_v19 = vrot.slane %v5127_v3, 2 }
 0x3c4   : > { %v5055_v0 = vsel %vm2217_vm4, %v5053_v39, %v5054_v26  ;;  %v5178_v63 = vrot.slane %v5128_v17, 2  ;;  %v5252_v42 = vmul.f32 %v9196_v45, %v9260_v11  ;;  %v5301_v22 = vrot.slane %v5251_v41, 2 }
 0x3c5   : > { %v5376_v28 = vadd.f32 %v9237_v20, %v5353_v25  ;;  %v4982_v36 = vadd.f32 %v4931_v12, %v4858_v59  ;;  %v4523_v46 = vmul.f32 %v9143_v15, %v9134_v58  ;;  %v4559_v8 = vmul.f32 %v9147_v44, %v9185_v56  ;;  %v9330_v59 = vld [vmem:[#allocation2 + $0x68] sm:$0xff] }
 0x3c6   : > { %v5179_v2 = vsel %vm2217_vm4, %v5177_v19, %v5178_v63  ;;  %v5302_v10 = vrot.slane %v5252_v42, 2  ;;  %v4595_v30 = vmul.f32 %v9151_v4, %v9260_v11  ;;  %v4633_v50 = vmul.f32 %v9155_v31, %v9206_v6 }
 0x3c7   : > { %6716 = vmatmul.mubr.msk.f32.vlgmr.msra.gmra.mxu1 %vm605_vm0, %v5376_v28  ;;  %v5106_v48 = vadd.f32 %v5055_v0, %v4982_v36  ;;  %v4757_v14 = vmul.f32 %v9159_v55, %v9213_v49  ;;  %v4881_v58 = vmul.f32 %v9163_v5, %v9284_v37  ;;  %v4575_v7 = vadd.f32 %v4559_v8, %v4523_v46 }
 0x3c8   : > { %v5303_v18 = vsel %vm2217_vm4, %v5301_v22, %v5302_v10  ;;  %v5005_v33 = vmul.f32 %v9167_v57, %v9206_v6  ;;  %v5129_v16 = vmul.f32 %v9171_v29, %v9213_v49  ;;  %v4684_v60 = vrot.slane %v4633_v50, 1 }
 0x3c9   : > { %v5230_v9 = vadd.f32 %v5179_v2, %v5106_v48  ;;  %v4808_v35 = vrot.slane %v4757_v14, 1  ;;  %v4932_v54 = vrot.slane %v4881_v58, 1  ;;  %v4611_v52 = vadd.f32 %v4595_v30, %v4575_v7 }
 0x3ca   : > { %v5056_v34 = vrot.slane %v5005_v33, 2  ;;  %v5180_v24 = vrot.slane %v5129_v16, 2  ;;  %v5253_v61 = vmul.f32 %v9196_v45, %v9284_v37  ;;  %v4685_v53 = vsel %vm1452_vm3, %v4682_v62, %v4684_v60 }
 0x3cb   : > { %v5354_v32 = vadd.f32 %v5303_v18, %v5230_v9  ;;  %v4809_v6 = vsel %vm1452_vm3, %v4806_v21, %v4808_v35  ;;  %v4933_v23 = vsel %vm1452_vm3, %v4930_v40, %v4932_v54  ;;  %v4735_v1 = vadd.f32 %v4685_v53, %v4611_v52 }
 0x3cc   : > { %v5057_v27 = vsel %vm2217_vm4, %v5054_v26, %v5056_v34  ;;  %v5181_v43 = vsel %vm2217_vm4, %v5178_v63, %v5180_v24  ;;  %v5304_v47 = vrot.slane %v5253_v61, 2  ;;  %v4524_v3 = vmul.f32 %v9143_v15, %v9139_v51 }
 0x3cd   : > { %v5377_v39 = vadd.f32 %v9237_v20, %v5354_v32  ;;  %v4560_v17 = vmul.f32 %v9147_v44, %v9232_v38  ;;  %v4596_v62 = vmul.f32 %v9151_v4, %v9308_v13  ;;  %v4859_v21 = vadd.f32 %v4809_v6, %v4735_v1  ;;  %v9359_v1 = vld [vmem:[#allocation2 + $0x70] sm:$0x3] }
 0x3ce   : > { %v5305_v40 = vsel %vm2217_vm4, %v5302_v10, %v5304_v47  ;;  %v4634_v26 = vmul.f32 %v9155_v31, %v9139_v51  ;;  %v9327_v25 = vmul.f32 %v9155_v31, %v9185_v56  ;;  %v4758_v41 = vmul.f32 %v9159_v55, %v9232_v38 }
 0x3cf   : > { %6718 = vmatprep.mubr.msk.f32.mxu1 %vm605_vm0, %v5377_v39  ;;  %v4576_v12 = vadd.f32 %v4560_v17, %v4524_v3  ;;  %v4759_v0 = vmul.f32 %v9159_v55, %v9260_v11  ;;  %v4882_v19 = vmul.f32 %v9163_v5, %v9308_v13  ;;  %v4983_v63 = vadd.f32 %v4933_v23, %v4859_v21 }
 0x3d0   : > { %v4686_v42 = vrot.slane %v4634_v26, 1  ;;  %v4687_v28 = vrot.slane %v9327_v25, 1  ;;  %v4883_v36 = vmul.f32 %v9163_v5, %v9330_v59  ;;  %v4810_v46 = vrot.slane %v4758_v41, 1 }
 0x3d1   : > { %v4612_v22 = vadd.f32 %v4596_v62, %v4576_v12  ;;  %v4811_v2 = vrot.slane %v4759_v0, 1  ;;  %v4934_v10 = vrot.slane %v4882_v19, 1  ;;  %v5107_v8 = vadd.f32 %v5057_v27, %v4983_v63 }
 0x3d2   : > { %v4688_v30 = vsel %vm1452_vm3, %v4686_v42, %v4687_v28  ;;  %v4935_v48 = vrot.slane %v4883_v36, 1  ;;  %v5006_v50 = vmul.f32 %v9167_v57, %v9139_v51  ;;  %v5007_v18 = vmul.f32 %v9167_v57, %v9185_v56 }
 0x3d3   : > { %v4736_v14 = vadd.f32 %v4688_v30, %v4612_v22  ;;  %v4812_v58 = vsel %vm1452_vm3, %v4810_v46, %v4811_v2  ;;  %v5130_v7 = vmul.f32 %v9171_v29, %v9232_v38  ;;  %v5231_v33 = vadd.f32 %v5181_v43, %v5107_v8 }
 0x3d4   : > { %v4936_v16 = vsel %vm1452_vm3, %v4934_v10, %v4935_v48  ;;  %v5058_v9 = vrot.slane %v5006_v50, 2  ;;  %v5131_v60 = vmul.f32 %v9171_v29, %v9260_v11  ;;  %v5059_v54 = vrot.slane %v5007_v18, 2  ;;  %v9381_v10 = vld [vmem:[#allocation2 + $0x78] sm:$0xff] }
 0x3d5   : > { %v4860_v35 = vadd.f32 %v4812_v58, %v4736_v14  ;;  %v5182_v52 = vrot.slane %v5130_v7, 2  ;;  %v5254_v51 = vmul.f32 %v9196_v45, %v9308_v13  ;;  %v5355_v34 = vadd.f32 %v5305_v40, %v5231_v33 }
 0x3d6   : > { %v5183_v24 = vrot.slane %v5131_v60, 2  ;;  %v5255_v61 = vmul.f32 %v9196_v45, %v9330_v59  ;;  %v4525_v32 = vmul.f32 %v9143_v15, %v9185_v56  ;;  %v5060_v6 = vsel %vm2217_vm4, %v5058_v9, %v5059_v54 }
 0x3d7   : > { %v4984_v53 = vadd.f32 %v4936_v16, %v4860_v35  ;;  %v5306_v23 = vrot.slane %v5254_v51, 2  ;;  %v4561_v27 = vmul.f32 %v9147_v44, %v9260_v11  ;;  %v5378_v43 = vadd.f32 %v9237_v20, %v5355_v34 }
 0x3d8   : > { %v5184_v47 = vsel %vm2217_vm4, %v5182_v52, %v5183_v24  ;;  %v5307_v39 = vrot.slane %v5255_v61, 2  ;;  %v4597_v3 = vmul.f32 %v9151_v4, %v9330_v59  ;;  %v4636_v56 = vmul.f32 %v9155_v31, %v9213_v49  ;;  %v9409_v61 = vld [vmem:[#allocation2 + $0x80] sm:$0xff] }
 0x3d9   : > { %v5108_v17 = vadd.f32 %v5060_v6, %v4984_v53  ;;  %v4577_v62 = vadd.f32 %v4561_v27, %v4525_v32  ;;  %v4760_v21 = vmul.f32 %v9159_v55, %v9284_v37  ;;  %6719 = vmatmul.mubr.msk.f32.gmra.mxu1 %vm605_vm0, %v5378_v43  ;;  %v4884_v26 = vmul.f32 %v9163_v5, %v9359_v1 }
 0x3da   : > { %v5308_v40 = vsel %vm2217_vm4, %v5306_v23, %v5307_v39  ;;  %v5008_v25 = vmul.f32 %v9167_v57, %v9213_v49  ;;  %v5132_v12 = vmul.f32 %v9171_v29, %v9284_v37  ;;  %v4689_v19 = vrot.slane %v4636_v56, 1 }
 0x3db   : > { %v5232_v41 = vadd.f32 %v5184_v47, %v5108_v17  ;;  %v4613_v0 = vadd.f32 %v4597_v3, %v4577_v62  ;;  %v4813_v63 = vrot.slane %v4760_v21, 1  ;;  %v4937_v42 = vrot.slane %v4884_v26, 1 }
 0x3dc   : > { %v5061_v36 = vrot.slane %v5008_v25, 2  ;;  %v5185_v22 = vrot.slane %v5132_v12, 2  ;;  %v5256_v46 = vmul.f32 %v9196_v45, %v9359_v1  ;;  %v4690_v30 = vsel %vm1452_vm3, %v4687_v28, %v4689_v19 }
 0x3dd   : > { %v5356_v8 = vadd.f32 %v5308_v40, %v5232_v41  ;;  %v4814_v49 = vsel %vm1452_vm3, %v4811_v2, %v4813_v63  ;;  %v4526_v50 = vmul.f32 %v9143_v15, %v9232_v38  ;;  %v4737_v14 = vadd.f32 %v4690_v30, %v4613_v0 }
 0x3de   : > { %v4938_v58 = vsel %vm1452_vm3, %v4935_v48, %v4937_v42  ;;  %v5062_v18 = vsel %vm2217_vm4, %v5059_v54, %v5061_v36  ;;  %v5186_v7 = vsel %vm2217_vm4, %v5183_v24, %v5185_v22  ;;  %v5309_v16 = vrot.slane %v5256_v46, 2 }
 0x3df   : > { %v5379_v33 = vadd.f32 %v9237_v20, %v5356_v8  ;;  %v4562_v9 = vmul.f32 %v9147_v44, %v9308_v13  ;;  %v4598_v28 = vmul.f32 %v9151_v4, %v9381_v10  ;;  %v4861_v2 = vadd.f32 %v4814_v49, %v4737_v14 }
 0x3e0   : > { %v4637_v60 = vmul.f32 %v9155_v31, %v9232_v38  ;;  %v9399_v48 = vmul.f32 %v9155_v31, %v9260_v11  ;;  %v4761_v35 = vmul.f32 %v9159_v55, %v9308_v13  ;;  %v5310_v54 = vsel %vm2217_vm4, %v5307_v39, %v5309_v16 }
 0x3e1   : > { %6721 = vmatprep.mubr.msk.f32.mxu1 %vm605_vm0, %v5379_v33  ;;  %v4578_v52 = vadd.f32 %v4562_v9, %v4526_v50  ;;  %v4762_v51 = vmul.f32 %v9159_v55, %v9330_v59  ;;  %v4885_v34 = vmul.f32 %v9163_v5, %v9381_v10  ;;  %v4985_v24 = vadd.f32 %v4938_v58, %v4861_v2  ;;  %v9430_v50 = vld [vmem:[#allocation2 + $0x88] sm:$0x3] }
 0x3e2   : > { %v4691_v32 = vrot.slane %v4637_v60, 1  ;;  %v4692_v53 = vrot.slane %v9399_v48, 1  ;;  %v4815_v6 = vrot.slane %v4761_v35, 1  ;;  %v4886_v43 = vmul.f32 %v9163_v5, %v9409_v61 }
 0x3e3   : > { %v4614_v23 = vadd.f32 %v4598_v28, %v4578_v52  ;;  %v4816_v27 = vrot.slane %v4762_v51, 1  ;;  %v4939_v47 = vrot.slane %v4885_v34, 1  ;;  %v5109_v39 = vadd.f32 %v5062_v18, %v4985_v24 }
 0x3e4   : > { %v4693_v3 = vsel %vm1452_vm3, %v4691_v32, %v4692_v53  ;;  %v5009_v17 = vmul.f32 %v9167_v57, %v9232_v38  ;;  %v5010_v62 = vmul.f32 %v9167_v57, %v9260_v11  ;;  %v4940_v40 = vrot.slane %v4886_v43, 1 }
 0x3e5   : > { %v4738_v56 = vadd.f32 %v4693_v3, %v4614_v23  ;;  %v4817_v21 = vsel %vm1452_vm3, %v4815_v6, %v4816_v27  ;;  %v5133_v26 = vmul.f32 %v9171_v29, %v9308_v13  ;;  %v5233_v25 = vadd.f32 %v5186_v7, %v5109_v39 }
 0x3e6   : > { %v5063_v12 = vrot.slane %v5009_v17, 2  ;;  %v5064_v41 = vrot.slane %v5010_v62, 2  ;;  %v5134_v0 = vmul.f32 %v9171_v29, %v9330_v59  ;;  %v4941_v63 = vsel %vm1452_vm3, %v4939_v47, %v4940_v40  ;;  %v9454_v47 = vld [vmem:[#allocation2 + $0x90] sm:$0xff] }
 0x3e7   : > { %v4862_v19 = vadd.f32 %v4817_v21, %v4738_v56  ;;  %v5187_v38 = vrot.slane %v5133_v26, 2  ;;  %v5257_v42 = vmul.f32 %v9196_v45, %v9381_v10  ;;  %v5357_v36 = vadd.f32 %v5310_v54, %v5233_v25 }
 0x3e8   : > { %v5065_v22 = vsel %vm2217_vm4, %v5063_v12, %v5064_v41  ;;  %v5188_v46 = vrot.slane %v5134_v0, 2  ;;  %v5258_v8 = vmul.f32 %v9196_v45, %v9409_v61  ;;  %v4527_v14 = vmul.f32 %v9143_v15, %v9260_v11 }
 0x3e9   : > { %v4986_v30 = vadd.f32 %v4941_v63, %v4862_v19  ;;  %v5311_v49 = vrot.slane %v5257_v42, 2  ;;  %v4563_v58 = vmul.f32 %v9147_v44, %v9330_v59  ;;  %v5380_v18 = vadd.f32 %v9237_v20, %v5357_v36 }
 0x3ea   : > { %v5189_v7 = vsel %vm2217_vm4, %v5187_v38, %v5188_v46  ;;  %v5312_v33 = vrot.slane %v5258_v8, 2  ;;  %v4599_v16 = vmul.f32 %v9151_v4, %v9409_v61  ;;  %v4639_v2 = vmul.f32 %v9155_v31, %v9284_v37 }
 0x3eb   : > { %v5110_v9 = vadd.f32 %v5065_v22, %v4986_v30  ;;  %v4579_v28 = vadd.f32 %v4563_v58, %v4527_v14  ;;  %v4763_v60 = vmul.f32 %v9159_v55, %v9359_v1  ;;  %6722 = vmatmul.mubr.msk.f32.gmra.mxu1 %vm605_vm0, %v5380_v18  ;;  %v4887_v48 = vmul.f32 %v9163_v5, %v9430_v50 }
 0x3ec   : > { %v5313_v11 = vsel %vm2217_vm4, %v5311_v49, %v5312_v33  ;;  %v5011_v35 = vmul.f32 %v9167_v57, %v9284_v37  ;;  %v5135_v54 = vmul.f32 %v9171_v29, %v9359_v1  ;;  %v4694_v34 = vrot.slane %v4639_v2, 1 }
 0x3ed   : > { %v5234_v52 = vadd.f32 %v5189_v7, %v5110_v9  ;;  %v4615_v51 = vadd.f32 %v4599_v16, %v4579_v28  ;;  %v4818_v24 = vrot.slane %v4763_v60, 1  ;;  %v4942_v32 = vrot.slane %v4887_v48, 1 }
 0x3ee   : > { %v5066_v6 = vrot.slane %v5011_v35, 2  ;;  %v5190_v23 = vrot.slane %v5135_v54, 2  ;;  %v5259_v43 = vmul.f32 %v9196_v45, %v9430_v50  ;;  %v4695_v3 = vsel %vm1452_vm3, %v4692_v53, %v4694_v34 }
 0x3ef   : > { %v5358_v39 = vadd.f32 %v5313_v11, %v5234_v52  ;;  %v4819_v37 = vsel %vm1452_vm3, %v4816_v27, %v4818_v24  ;;  %v4528_v17 = vmul.f32 %v9143_v15, %v9308_v13  ;;  %v4739_v62 = vadd.f32 %v4695_v3, %v4615_v51 }
 0x3f0   : > { %v4943_v56 = vsel %vm1452_vm3, %v4940_v40, %v4942_v32  ;;  %v5067_v21 = vsel %vm2217_vm4, %v5064_v41, %v5066_v6  ;;  %v5191_v26 = vsel %vm2217_vm4, %v5188_v46, %v5190_v23  ;;  %v5314_v12 = vrot.slane %v5259_v43, 2  ;;  %v9482_v46 = vld [vmem:[#allocation2 + $0x98] sm:$0xff] }
 0x3f1   : > { %v5381_v25 = vadd.f32 %v9237_v20, %v5358_v39  ;;  %v4564_v0 = vmul.f32 %v9147_v44, %v9381_v10  ;;  %v4600_v53 = vmul.f32 %v9151_v4, %v9454_v47  ;;  %v4863_v27 = vadd.f32 %v4819_v37, %v4739_v62 }
 0x3f2   : > { %v4640_v19 = vmul.f32 %v9155_v31, %v9308_v13  ;;  %v9472_v40 = vmul.f32 %v9155_v31, %v9330_v59  ;;  %v4764_v41 = vmul.f32 %v9159_v55, %v9381_v10  ;;  %v5315_v63 = vsel %vm2217_vm4, %v5312_v33, %v5314_v12 }
 0x3f3   : > { %6724 = vmatprep.mubr.msk.f32.mxu1 %vm605_vm0, %v5381_v25  ;;  %v4580_v38 = vadd.f32 %v4564_v0, %v4528_v17  ;;  %v4765_v42 = vmul.f32 %v9159_v55, %v9409_v61  ;;  %v4888_v36 = vmul.f32 %v9163_v5, %v9454_v47  ;;  %v4987_v22 = vadd.f32 %v4943_v56, %v4863_v27  ;;  %v9503_v17 = vld [vmem:[#allocation2 + $0xa0] sm:$0x3] }
 0x3f4   : > { %v4696_v8 = vrot.slane %v4640_v19, 1  ;;  %v4697_v30 = vrot.slane %v9472_v40, 1  ;;  %v4820_v49 = vrot.slane %v4764_v41, 1  ;;  %v4889_v18 = vmul.f32 %v9163_v5, %v9482_v46 }
 0x3f5   : > { %v4616_v14 = vadd.f32 %v4600_v53, %v4580_v38  ;;  %v4821_v58 = vrot.slane %v4765_v42, 1  ;;  %v4944_v7 = vrot.slane %v4888_v36, 1  ;;  %v5111_v33 = vadd.f32 %v5067_v21, %v4987_v22 }
 0x3f6   : > { %v4698_v16 = vsel %vm1452_vm3, %v4696_v8, %v4697_v30  ;;  %v5012_v9 = vmul.f32 %v9167_v57, %v9308_v13  ;;  %v5013_v28 = vmul.f32 %v9167_v57, %v9330_v59  ;;  %v4945_v11 = vrot.slane %v4889_v18, 1 }
 0x3f7   : > { %v4740_v2 = vadd.f32 %v4698_v16, %v4616_v14  ;;  %v4822_v60 = vsel %vm1452_vm3, %v4820_v49, %v4821_v58  ;;  %v5136_v48 = vmul.f32 %v9171_v29, %v9381_v10  ;;  %v5235_v35 = vadd.f32 %v5191_v26, %v5111_v33 }
 0x3f8   : > { %v5068_v54 = vrot.slane %v5012_v9, 2  ;;  %v5069_v52 = vrot.slane %v5013_v28, 2  ;;  %v5137_v51 = vmul.f32 %v9171_v29, %v9409_v61  ;;  %v4946_v24 = vsel %vm1452_vm3, %v4944_v7, %v4945_v11  ;;  %v9527_v7 = vld [vmem:[#allocation2 + $0xa8] sm:$0xff] }
 0x3f9   : > { %v4864_v34 = vadd.f32 %v4822_v60, %v4740_v2  ;;  %v5192_v13 = vrot.slane %v5136_v48, 2  ;;  %v5260_v32 = vmul.f32 %v9196_v45, %v9454_v47  ;;  %v5359_v6 = vadd.f32 %v5315_v63, %v5235_v35 }
 0x3fa   : > { %v5070_v23 = vsel %vm2217_vm4, %v5068_v54, %v5069_v52  ;;  %v5193_v43 = vrot.slane %v5137_v51, 2  ;;  %v5261_v39 = vmul.f32 %v9196_v45, %v9482_v46  ;;  %v4529_v62 = vmul.f32 %v9143_v15, %v9330_v59 }
 0x3fb   : > { %v4988_v3 = vadd.f32 %v4946_v24, %v4864_v34  ;;  %v5316_v37 = vrot.slane %v5260_v32, 2  ;;  %v4565_v56 = vmul.f32 %v9147_v44, %v9409_v61  ;;  %v5382_v21 = vadd.f32 %v9237_v20, %v5359_v6 }
 0x3fc   : > { %v5194_v26 = vsel %vm2217_vm4, %v5192_v13, %v5193_v43  ;;  %v5317_v25 = vrot.slane %v5261_v39, 2  ;;  %v4601_v12 = vmul.f32 %v9151_v4, %v9482_v46  ;;  %v4642_v27 = vmul.f32 %v9155_v31, %v9359_v1 }
 0x3fd   : > { %v5112_v0 = vadd.f32 %v5070_v23, %v4988_v3  ;;  %v4581_v53 = vadd.f32 %v4565_v56, %v4529_v62  ;;  %v4766_v19 = vmul.f32 %v9159_v55, %v9430_v50  ;;  %6725 = vmatmul.mubr.msk.f32.gmra.mxu1 %vm605_vm0, %v5382_v21  ;;  %v4890_v40 = vmul.f32 %v9163_v5, %v9503_v17 }
 0x3fe   : > { %v5318_v59 = vsel %vm2217_vm4, %v5316_v37, %v5317_v25  ;;  %v5014_v41 = vmul.f32 %v9167_v57, %v9359_v1  ;;  %v5138_v63 = vmul.f32 %v9171_v29, %v9430_v50  ;;  %v4699_v36 = vrot.slane %v4642_v27, 1 }
 0x3ff   : > { %v5236_v38 = vadd.f32 %v5194_v26, %v5112_v0  ;;  %v4617_v42 = vadd.f32 %v4601_v12, %v4581_v53  ;;  %v4823_v22 = vrot.slane %v4766_v19, 1  ;;  %v4947_v8 = vrot.slane %v4890_v40, 1 }
 0x400   : > { %v5071_v49 = vrot.slane %v5014_v41, 2  ;;  %v5195_v14 = vrot.slane %v5138_v63, 2  ;;  %v5262_v18 = vmul.f32 %v9196_v45, %v9503_v17  ;;  %v4700_v16 = vsel %vm1452_vm3, %v4697_v30, %v4699_v36 }
 0x401   : > { %v5360_v33 = vadd.f32 %v5318_v59, %v5236_v38  ;;  %v4824_v1 = vsel %vm1452_vm3, %v4821_v58, %v4823_v22  ;;  %v4530_v9 = vmul.f32 %v9143_v15, %v9381_v10  ;;  %v4741_v28 = vadd.f32 %v4700_v16, %v4617_v42 }
 0x402   : > { %v4948_v2 = vsel %vm1452_vm3, %v4945_v11, %v4947_v8  ;;  %v5072_v60 = vsel %vm2217_vm4, %v5069_v52, %v5071_v49  ;;  %v5196_v48 = vsel %vm2217_vm4, %v5193_v43, %v5195_v14  ;;  %v5319_v54 = vrot.slane %v5262_v18, 2  ;;  %v9555_v43 = vld [vmem:[#allocation2 + $0xb0] sm:$0xff] }
 0x403   : > { %v5383_v35 = vadd.f32 %v9237_v20, %v5360_v33  ;;  %v4566_v51 = vmul.f32 %v9147_v44, %v9454_v47  ;;  %v4602_v30 = vmul.f32 %v9151_v4, %v9527_v7  ;;  %v4865_v58 = vadd.f32 %v4824_v1, %v4741_v28 }
 0x404   : > { %v4643_v34 = vmul.f32 %v9155_v31, %v9381_v10  ;;  %v9545_v11 = vmul.f32 %v9155_v31, %v9409_v61  ;;  %v4767_v52 = vmul.f32 %v9159_v55, %v9454_v47  ;;  %v5320_v24 = vsel %vm2217_vm4, %v5317_v25, %v5319_v54 }
 0x405   : > { %6727 = vmatprep.mubr.msk.f32.mxu1 %vm605_vm0, %v5383_v35  ;;  %v4582_v13 = vadd.f32 %v4566_v51, %v4530_v9  ;;  %v4768_v32 = vmul.f32 %v9159_v55, %v9482_v46  ;;  %v4891_v6 = vmul.f32 %v9163_v5, %v9527_v7  ;;  %v4989_v23 = vadd.f32 %v4948_v2, %v4865_v58  ;;  %v9576_v9 = vld [vmem:[#allocation2 + $0xb8] sm:$0x3] }
 0x406   : > { %v4701_v39 = vrot.slane %v4643_v34, 1  ;;  %v4702_v3 = vrot.slane %v9545_v11, 1  ;;  %v4825_v37 = vrot.slane %v4767_v52, 1  ;;  %v4892_v21 = vmul.f32 %v9163_v5, %v9555_v43 }
 0x407   : > { %v4618_v62 = vadd.f32 %v4602_v30, %v4582_v13  ;;  %v4826_v56 = vrot.slane %v4768_v32, 1  ;;  %v4949_v26 = vrot.slane %v4891_v6, 1  ;;  %v5113_v25 = vadd.f32 %v5072_v60, %v4989_v23 }
 0x408   : > { %v4703_v12 = vsel %vm1452_vm3, %v4701_v39, %v4702_v3  ;;  %v5015_v0 = vmul.f32 %v9167_v57, %v9381_v10  ;;  %v5016_v53 = vmul.f32 %v9167_v57, %v9409_v61  ;;  %v4950_v59 = vrot.slane %v4892_v21, 1 }
 0x409   : > { %v4742_v27 = vadd.f32 %v4703_v12, %v4618_v62  ;;  %v4827_v19 = vsel %vm1452_vm3, %v4825_v37, %v4826_v56  ;;  %v5139_v40 = vmul.f32 %v9171_v29, %v9454_v47  ;;  %v5237_v41 = vadd.f32 %v5196_v48, %v5113_v25 }
 0x40a   : > { %v5073_v63 = vrot.slane %v5015_v0, 2  ;;  %v5074_v38 = vrot.slane %v5016_v53, 2  ;;  %v5140_v42 = vmul.f32 %v9171_v29, %v9482_v46  ;;  %v4951_v22 = vsel %vm1452_vm3, %v4949_v26, %v4950_v59  ;;  %v9600_v26 = vld [vmem:[#allocation2 + $0xc0] sm:$0xff] }
 0x40b   : > { %v4866_v36 = vadd.f32 %v4827_v19, %v4742_v27  ;;  %v5197_v10 = vrot.slane %v5139_v40, 2  ;;  %v5263_v8 = vmul.f32 %v9196_v45, %v9527_v7  ;;  %v5361_v49 = vadd.f32 %v5320_v24, %v5237_v41 }
 0x40c   : > { %v5075_v14 = vsel %vm2217_vm4, %v5073_v63, %v5074_v38  ;;  %v5198_v18 = vrot.slane %v5140_v42, 2  ;;  %v5264_v33 = vmul.f32 %v9196_v45, %v9555_v43  ;;  %v4531_v28 = vmul.f32 %v9143_v15, %v9409_v61 }
 0x40d   : > { %v4990_v16 = vadd.f32 %v4951_v22, %v4866_v36  ;;  %v5321_v1 = vrot.slane %v5263_v8, 2  ;;  %v4567_v2 = vmul.f32 %v9147_v44, %v9482_v46  ;;  %v5384_v60 = vadd.f32 %v9237_v20, %v5361_v49 }
 0x40e   : > { %v5199_v48 = vsel %vm2217_vm4, %v5197_v10, %v5198_v18  ;;  %v5322_v35 = vrot.slane %v5264_v33, 2  ;;  %v4603_v54 = vmul.f32 %v9151_v4, %v9555_v43  ;;  %v4645_v58 = vmul.f32 %v9155_v31, %v9430_v50 }
 0x40f   : > { %v5114_v51 = vadd.f32 %v5075_v14, %v4990_v16  ;;  %v4583_v30 = vadd.f32 %v4567_v2, %v4531_v28  ;;  %v4769_v34 = vmul.f32 %v9159_v55, %v9503_v17  ;;  %6728 = vmatmul.mubr.msk.f32.gmra.mxu1 %vm605_vm0, %v5384_v60  ;;  %v4893_v11 = vmul.f32 %v9163_v5, %v9576_v9 }
 0x410   : > { %v5323_v61 = vsel %vm2217_vm4, %v5321_v1, %v5322_v35  ;;  %v5017_v52 = vmul.f32 %v9167_v57, %v9430_v50  ;;  %v5141_v24 = vmul.f32 %v9171_v29, %v9503_v17  ;;  %v4704_v6 = vrot.slane %v4645_v58, 1 }
 0x411   : > { %v5238_v13 = vadd.f32 %v5199_v48, %v5114_v51  ;;  %v4619_v32 = vadd.f32 %v4603_v54, %v4583_v30  ;;  %v4828_v23 = vrot.slane %v4769_v34, 1  ;;  %v4952_v39 = vrot.slane %v4893_v11, 1 }
 0x412   : > { %v5076_v37 = vrot.slane %v5017_v52, 2  ;;  %v5200_v62 = vrot.slane %v5141_v24, 2  ;;  %v5265_v21 = vmul.f32 %v9196_v45, %v9576_v9  ;;  %v4705_v12 = vsel %vm1452_vm3, %v4702_v3, %v4704_v6 }
 0x413   : > { %v5362_v25 = vadd.f32 %v5323_v61, %v5238_v13  ;;  %v4829_v50 = vsel %vm1452_vm3, %v4826_v56, %v4828_v23  ;;  %v4532_v0 = vmul.f32 %v9143_v15, %v9454_v47  ;;  %v4743_v53 = vadd.f32 %v4705_v12, %v4619_v32 }
 0x414   : > { %v4953_v27 = vsel %vm1452_vm3, %v4950_v59, %v4952_v39  ;;  %v5077_v19 = vsel %vm2217_vm4, %v5074_v38, %v5076_v37  ;;  %v5201_v40 = vsel %vm2217_vm4, %v5198_v18, %v5200_v62  ;;  %v5324_v63 = vrot.slane %v5265_v21, 2  ;;  %v9628_v18 = vld [vmem:[#allocation2 + $0xc8] sm:$0xff] }
 0x415   : > { %v5385_v41 = vadd.f32 %v9237_v20, %v5362_v25  ;;  %v4568_v42 = vmul.f32 %v9147_v44, %v9527_v7  ;;  %v4604_v3 = vmul.f32 %v9151_v4, %v9600_v26  ;;  %v4867_v56 = vadd.f32 %v4829_v50, %v4743_v53 }
 0x416   : > { %v4646_v36 = vmul.f32 %v9155_v31, %v9454_v47  ;;  %v9618_v59 = vmul.f32 %v9155_v31, %v9482_v46  ;;  %v4770_v38 = vmul.f32 %v9159_v55, %v9527_v7  ;;  %v5325_v22 = vsel %vm2217_vm4, %v5322_v35, %v5324_v63 }
 0x417   : > { %6730 = vmatprep.mubr.msk.f32.mxu1 %vm605_vm0, %v5385_v41  ;;  %v4584_v10 = vadd.f32 %v4568_v42, %v4532_v0  ;;  %v4771_v8 = vmul.f32 %v9159_v55, %v9555_v43  ;;  %v4894_v49 = vmul.f32 %v9163_v5, %v9600_v26  ;;  %v4991_v14 = vadd.f32 %v4953_v27, %v4867_v56  ;;  %v9649_v0 = vld [vmem:[#allocation2 + $0xd0] sm:$0x3] }
 0x418   : > { %v4706_v33 = vrot.slane %v4646_v36, 1  ;;  %v4707_v16 = vrot.slane %v9618_v59, 1  ;;  %v4830_v1 = vrot.slane %v4770_v38, 1  ;;  %v4895_v60 = vmul.f32 %v9163_v5, %v9628_v18 }
 0x419   : > { %v4620_v28 = vadd.f32 %v4604_v3, %v4584_v10  ;;  %v4831_v2 = vrot.slane %v4771_v8, 1  ;;  %v4954_v48 = vrot.slane %v4894_v49, 1  ;;  %v5115_v35 = vadd.f32 %v5077_v19, %v4991_v14 }
 0x41a   : > { %v4708_v54 = vsel %vm1452_vm3, %v4706_v33, %v4707_v16  ;;  %v5018_v51 = vmul.f32 %v9167_v57, %v9454_v47  ;;  %v5019_v30 = vmul.f32 %v9167_v57, %v9482_v46  ;;  %v4955_v61 = vrot.slane %v4895_v60, 1 }
 0x41b   : > { %v4744_v58 = vadd.f32 %v4708_v54, %v4620_v28  ;;  %v4832_v34 = vsel %vm1452_vm3, %v4830_v1, %v4831_v2  ;;  %v5142_v11 = vmul.f32 %v9171_v29, %v9527_v7  ;;  %v5239_v52 = vadd.f32 %v5201_v40, %v5115_v35 }
 0x41c   : > { %v5078_v24 = vrot.slane %v5018_v51, 2  ;;  %v5079_v13 = vrot.slane %v5019_v30, 2  ;;  %v5143_v32 = vmul.f32 %v9171_v29, %v9555_v43  ;;  %v4956_v23 = vsel %vm1452_vm3, %v4954_v48, %v4955_v61  ;;  %v4511_v51 = vld [vmem:[#allocation2 + $0xd8] sm:$0xff] }
 0x41d   : > { %v4868_v6 = vadd.f32 %v4832_v34, %v4744_v58  ;;  %v5202_v47 = vrot.slane %v5142_v11, 2  ;;  %v5266_v39 = vmul.f32 %v9196_v45, %v9600_v26  ;;  %v5363_v37 = vadd.f32 %v5325_v22, %v5239_v52  ;;  %v4512_v11 = vld [vmem:[#allocation2 + $0xe0] sm:$0xff] }
 0x41e   : > { %v5080_v62 = vsel %vm2217_vm4, %v5078_v24, %v5079_v13  ;;  %v5203_v21 = vrot.slane %v5143_v32, 2  ;;  %v5267_v25 = vmul.f32 %v9196_v45, %v9628_v18  ;;  %v4533_v53 = vmul.f32 %v9143_v15, %v9482_v46 }
 0x41f   : > { %v4992_v12 = vadd.f32 %v4956_v23, %v4868_v6  ;;  %v5326_v50 = vrot.slane %v5266_v39, 2  ;;  %v4569_v27 = vmul.f32 %v9147_v44, %v9555_v43  ;;  %v5386_v19 = vadd.f32 %v9237_v20, %v5363_v37 }
 0x420   : > { %v5204_v40 = vsel %vm2217_vm4, %v5202_v47, %v5203_v21  ;;  %v5327_v41 = vrot.slane %v5267_v25, 2  ;;  %v4605_v63 = vmul.f32 %v9151_v4, %v9628_v18  ;;  %v4648_v56 = vmul.f32 %v9155_v31, %v9503_v17 }
 0x421   : > { %v5116_v42 = vadd.f32 %v5080_v62, %v4992_v12  ;;  %v4585_v3 = vadd.f32 %v4569_v27, %v4533_v53  ;;  %v4772_v36 = vmul.f32 %v9159_v55, %v9576_v9  ;;  %6731 = vmatmul.mubr.msk.f32.gmra.mxu1 %vm605_vm0, %v5386_v19  ;;  %v4896_v59 = vmul.f32 %v9163_v5, %v9649_v0 }
 0x422   : > { %v5328_v46 = vsel %vm2217_vm4, %v5326_v50, %v5327_v41  ;;  %v5020_v38 = vmul.f32 %v9167_v57, %v9503_v17  ;;  %v5144_v22 = vmul.f32 %v9171_v29, %v9576_v9  ;;  %v4709_v49 = vrot.slane %v4648_v56, 1 }
 0x423   : > { %v5240_v10 = vadd.f32 %v5204_v40, %v5116_v42  ;;  %v4621_v8 = vadd.f32 %v4605_v63, %v4585_v3  ;;  %v4833_v14 = vrot.slane %v4772_v36, 1  ;;  %v4957_v33 = vrot.slane %v4896_v59, 1 }
 0x424   : > { %v5081_v1 = vrot.slane %v5020_v38, 2  ;;  %v5205_v28 = vrot.slane %v5144_v22, 2  ;;  %v5268_v60 = vmul.f32 %v9196_v45, %v9649_v0  ;;  %v4710_v35 = vsel %vm1452_vm3, %v4707_v16, %v4709_v49 }
 0x425   : > { %v5364_v48 = vadd.f32 %v5328_v46, %v5240_v10  ;;  %v4834_v54 = vsel %vm1452_vm3, %v4831_v2, %v4833_v14  ;;  %v4534_v17 = vmul.f32 %v9143_v15, %v9527_v7  ;;  %v4745_v30 = vadd.f32 %v4710_v35, %v4621_v8 }
 0x426   : > { %v4958_v58 = vsel %vm1452_vm3, %v4955_v61, %v4957_v33  ;;  %v5082_v34 = vsel %vm2217_vm4, %v5079_v13, %v5081_v1  ;;  %v5206_v24 = vsel %vm2217_vm4, %v5203_v21, %v5205_v28  ;;  %v5329_v45 = vrot.slane %v5268_v60, 2  ;;  %v4513_v60 = vld [vmem:[#allocation2 + $0xe8] sm:$0x3] }
 0x427   : > { %v5387_v52 = vadd.f32 %v9237_v20, %v5364_v48  ;;  %v4570_v16 = vmul.f32 %v9147_v44, %v9600_v26  ;;  %v4869_v32 = vadd.f32 %v4834_v54, %v4745_v30  ;;  %v4535_v2 = vmul.f32 %v9143_v15, %v9555_v43 }
 0x428   : > { %v4571_v6 = vmul.f32 %v9147_v44, %v9628_v18  ;;  %v4606_v61 = vmul.f32 %v9151_v4, %v4511_v51  ;;  %v4607_v20 = vmul.f32 %v9151_v4, %v4512_v11  ;;  %v4649_v23 = vmul.f32 %v9155_v31, %v9527_v7 }
 0x429   : > { %6733 = vmatprep.mubr.msk.f32.mxu1 %vm605_vm0, %v5387_v52  ;;  %v4586_v13 = vadd.f32 %v4570_v16, %v4534_v17  ;;  %v4650_v47 = vmul.f32 %v9155_v31, %v9555_v43  ;;  %v4993_v39 = vadd.f32 %v4958_v58, %v4869_v32  ;;  %v5330_v37 = vsel %vm2217_vm4, %v5327_v41, %v5329_v45 }
 0x42a   : > { %v4773_v15 = vmul.f32 %v9159_v55, %v9600_v26  ;;  %v4774_v44 = vmul.f32 %v9159_v55, %v9628_v18  ;;  %v4711_v21 = vrot.slane %v4649_v23, 1  ;;  %v4897_v4 = vmul.f32 %v9163_v5, %v4511_v51 }
 0x42b   : > { %v4622_v62 = vadd.f32 %v4606_v61, %v4586_v13  ;;  %v4712_v25 = vrot.slane %v4650_v47, 1  ;;  %v5117_v12 = vadd.f32 %v5082_v34, %v4993_v39  ;;  %v4587_v50 = vadd.f32 %v4571_v6, %v4535_v2 }
 0x42c   : > { %v4835_v53 = vrot.slane %v4773_v15, 1  ;;  %v4836_v27 = vrot.slane %v4774_v44, 1  ;;  %v4898_v40 = vmul.f32 %v9163_v5, %v4512_v11  ;;  %v4959_v41 = vrot.slane %v4897_v4, 1 }
 0x42d   : > { %v4713_v19 = vsel %vm1452_vm3, %v4711_v21, %v4712_v25  ;;  %v5021_v63 = vmul.f32 %v9167_v57, %v9527_v7  ;;  %v5241_v42 = vadd.f32 %v5206_v24, %v5117_v12  ;;  %v5022_v36 = vmul.f32 %v9167_v57, %v9555_v43  ;;  %v6788_v7 = vld [vmem:[%s9798_s9 + $0x8] ss:$0 sm:$0xff]  ;;  %v6056_v12 = vld [vmem:[%s9801_s12] ss:$0 sm:$0xff] }
 0x42e   : > { %v4746_v3 = vadd.f32 %v4713_v19, %v4622_v62  ;;  %v4837_v56 = vsel %vm1452_vm3, %v4835_v53, %v4836_v27  ;;  %v4960_v46 = vrot.slane %v4898_v40, 1  ;;  %v5145_v38 = vmul.f32 %v9171_v29, %v9600_v26  ;;  %v6789_v26 = vld [vmem:[%s9799_s10] ss:$0 sm:$0xff] }
 0x42f   : > { %v5083_v59 = vrot.slane %v5021_v63, 2  ;;  %v5146_v22 = vmul.f32 %v9171_v29, %v9628_v18  ;;  %v5365_v10 = vadd.f32 %v5330_v37, %v5241_v42  ;;  %v5084_v49 = vrot.slane %v5022_v36, 2 }
 0x430   : > { %v4870_v8 = vadd.f32 %v4837_v56, %v4746_v3  ;;  %v5269_v14 = vmul.f32 %v6788_v7, %v4511_v51  ;;  %v4961_v33 = vsel %vm1452_vm3, %v4959_v41, %v4960_v46  ;;  %v5207_v1 = vrot.slane %v5145_v38, 2 }
 0x431   : > { %v5208_v43 = vrot.slane %v5146_v22, 2  ;;  %v5270_v28 = vmul.f32 %v6788_v7, %v4512_v11  ;;  %v5388_v48 = vadd.f32 %v6789_v26, %v5365_v10  ;;  %v5085_v35 = vsel %vm2217_vm4, %v5083_v59, %v5084_v49 }
 0x432   : > { %v4994_v18 = vadd.f32 %v4961_v33, %v4870_v8  ;;  %v5331_v54 = vrot.slane %v5269_v14, 2  ;;  %v4651_v51 = vmul.f32 %v9155_v31, %v9576_v9  ;;  %v4775_v58 = vmul.f32 %v9159_v55, %v9649_v0 }
 0x433   : > { %v5209_v17 = vsel %vm2217_vm4, %v5207_v1, %v5208_v43  ;;  %v5332_v30 = vrot.slane %v5270_v28, 2  ;;  %6734 = vmatmul.mubr.msk.f32.gmra.mxu1 %vm605_vm0, %v5388_v48  ;;  %v4623_v34 = vadd.f32 %v4607_v20, %v4587_v50  ;;  %v4899_v52 = vmul.f32 %v9163_v5, %v4513_v60 }
 0x434   : > { %v5118_v11 = vadd.f32 %v5085_v35, %v4994_v18  ;;  %v5023_v24 = vmul.f32 %v9167_v57, %v9576_v9  ;;  %v4714_v16 = vrot.slane %v4651_v51, 1  ;;  %v4838_v32 = vrot.slane %v4775_v58, 1 }
 0x435   : > { %v5333_v45 = vsel %vm2217_vm4, %v5331_v54, %v5332_v30  ;;  %v5147_v2 = vmul.f32 %v9171_v29, %v9649_v0  ;;  %v4962_v6 = vrot.slane %v4899_v52, 1  ;;  %v5271_v20 = vmul.f32 %v6788_v7, %v4513_v60 }
 0x436   : > { %v5242_v31 = vadd.f32 %v5209_v17, %v5118_v11  ;;  %v4715_v55 = vsel %vm1452_vm3, %v4712_v25, %v4714_v16  ;;  %v4839_v61 = vsel %vm1452_vm3, %v4836_v27, %v4838_v32  ;;  %v5086_v13 = vrot.slane %v5023_v24, 2 }
 0x437   : > { %v4747_v5 = vadd.f32 %v4715_v55, %v4623_v34  ;;  %v4963_v47 = vsel %vm1452_vm3, %v4960_v46, %v4962_v6  ;;  %v5210_v57 = vrot.slane %v5147_v2, 2  ;;  %v5334_v15 = vrot.slane %v5271_v20, 2 }
 0x438   : > { %v5366_v23 = vadd.f32 %v5333_v45, %v5242_v31  ;;  %v5087_v37 = vsel %vm2217_vm4, %v5084_v49, %v5086_v13 }
 0x439   : > { %v4871_v39 = vadd.f32 %v4839_v61, %v4747_v5  ;;  %v5211_v0 = vsel %vm2217_vm4, %v5208_v43, %v5210_v57  ;;  %v5335_v62 = vsel %vm2217_vm4, %v5332_v30, %v5334_v15 }
 0x43a   : > { %v5389_v9 = vadd.f32 %v6789_v26, %v5366_v23 }
 0x43b   : > { %v4995_v29 = vadd.f32 %v4963_v47, %v4871_v39 }
 0x43c   : > { %6736 = vmatprep.mubr.msk.f32.mxu1 %vm605_vm0, %v5389_v9 }
 0x43d   : > { %v5119_v44 = vadd.f32 %v5087_v37, %v4995_v29 }
 0x43f   : > { %v5243_v21 = vadd.f32 %v5211_v0, %v5119_v44 }
 0x441   : > { %v5367_v25 = vadd.f32 %v5335_v62, %v5243_v21 }
 0x443   : > { %v5390_v4 = vadd.f32 %v6789_v26, %v5367_v25 }
 0x445   : > { %6737 = vmatmul.mubr.msk.f32.gmra.mxu1 %vm605_vm0, %v5390_v4 }
 0x487   : > { %v6717_v50 = vpop.f32.mrf.mxu1 }
 0x488   : > { %v5522_v53 = vadd.f32 %v6717_v50, %v6056_v12 }
 0x489   : > { %v5516_v27 = vpop.f32.mrf.mxu1 }
 0x48a   : > { %v5596_v19 = vmax.f32 %v5522_v53, 0.0  ;;  %v5517_v40 = vadd.f32 %v6056_v12, %v5516_v27 }
 0x48c   : > { %5612 = vst.msk [vmem:[%s7009_s21 + $0x8] sm:$0xff] %vm605_vm0, %v5596_v19  ;;  %v5595_v41 = vmax.f32 %v5517_v40, 0.0 }
 0x48e   : > { %5611 = vst.msk [vmem:[%s7009_s21] sm:$0xff] %vm605_vm0, %v5595_v41 }
 0x499   : > { %v6720_v63 = vpop.f32.mrf.mxu1 }
 0x49a   : > { %v5532_v42 = vadd.f32 %v6720_v63, %v6056_v12 }
 0x49b   : > { %v5526_v3 = vpop.f32.mrf.mxu1 }
 0x49c   : > { %v5598_v56 = vmax.f32 %v5532_v42, 0.0  ;;  %v5527_v36 = vadd.f32 %v6056_v12, %v5526_v3 }
 0x49e   : > { %5614 = vst.msk [vmem:[%s7009_s21 + $0x18] sm:$0xff] %vm605_vm0, %v5598_v56  ;;  %v5597_v46 = vmax.f32 %v5527_v36, 0.0 }
 0x4a0   : > { %5613 = vst.msk [vmem:[%s7009_s21 + $0x10] sm:$0xff] %vm605_vm0, %v5597_v46 }
 0x4ab   : > { %v6723_v59 = vpop.f32.mrf.mxu1 }
 0x4ac   : > { %v5542_v38 = vadd.f32 %v6723_v59, %v6056_v12 }
 0x4ad   : > { %v5536_v22 = vpop.f32.mrf.mxu1 }
 0x4ae   : > { %v5600_v10 = vmax.f32 %v5542_v38, 0.0  ;;  %v5537_v8 = vadd.f32 %v6056_v12, %v5536_v22 }
 0x4b0   : > { %5616 = vst.msk [vmem:[%s7009_s21 + $0x28] sm:$0xff] %vm605_vm0, %v5600_v10  ;;  %v5599_v49 = vmax.f32 %v5537_v8, 0.0 }
 0x4b2   : > { %5615 = vst.msk [vmem:[%s7009_s21 + $0x20] sm:$0xff] %vm605_vm0, %v5599_v49 }
 0x4bd   : > { %v6726_v7 = vpop.f32.mrf.mxu1 }
 0x4be   : > { %v5552_v14 = vadd.f32 %v6726_v7, %v6056_v12 }
 0x4bf   : > { %v5546_v33 = vpop.f32.mrf.mxu1 }
 0x4c0   : > { %v5602_v1 = vmax.f32 %v5552_v14, 0.0  ;;  %v5547_v43 = vadd.f32 %v6056_v12, %v5546_v33 }
 0x4c2   : > { %5618 = vst.msk [vmem:[%s7009_s21 + $0x38] sm:$0xff] %vm605_vm0, %v5602_v1  ;;  %v5601_v28 = vmax.f32 %v5547_v43, 0.0 }
 0x4c4   : > { %5617 = vst.msk [vmem:[%s7009_s21 + $0x30] sm:$0xff] %vm605_vm0, %v5601_v28 }
 0x4cf   : > { %v6729_v60 = vpop.f32.mrf.mxu1 }
 0x4d0   : > { %v5562_v26 = vadd.f32 %v6729_v60, %v6056_v12 }
 0x4d1   : > { %v5556_v48 = vpop.f32.mrf.mxu1 }
 0x4d2   : > { %v5604_v18 = vmax.f32 %v5562_v26, 0.0  ;;  %v5557_v35 = vadd.f32 %v6056_v12, %v5556_v48 }
 0x4d4   : > { %5620 = vst.msk [vmem:[%s7009_s21 + $0x48] sm:$0xff] %vm605_vm0, %v5604_v18  ;;  %v5603_v54 = vmax.f32 %v5557_v35, 0.0 }
 0x4d6   : > { %5619 = vst.msk [vmem:[%s7009_s21 + $0x40] sm:$0xff] %vm605_vm0, %v5603_v54 }
 0x4e1   : > { %v6732_v17 = vpop.f32.mrf.mxu1 }
 0x4e2   : > { %v5572_v30 = vadd.f32 %v6732_v17, %v6056_v12 }
 0x4e3   : > { %v5566_v51 = vpop.f32.mrf.mxu1 }
 0x4e4   : > { %v5606_v58 = vmax.f32 %v5572_v30, 0.0  ;;  %v5567_v34 = vadd.f32 %v6056_v12, %v5566_v51 }
 0x4e6   : > { %5622 = vst.msk [vmem:[%s7009_s21 + $0x58] sm:$0xff] %vm605_vm0, %v5606_v58  ;;  %v5605_v11 = vmax.f32 %v5567_v34, 0.0 }
 0x4e8   : > { %5621 = vst.msk [vmem:[%s7009_s21 + $0x50] sm:$0xff] %vm605_vm0, %v5605_v11 }
 0x4f3   : > { %v6735_v52 = vpop.f32.mrf.mxu1 }
 0x4f4   : > { %v5582_v24 = vadd.f32 %v6735_v52, %v6056_v12 }
 0x4f5   : > { %v5576_v45 = vpop.f32.mrf.mxu1 }
 0x4f6   : > { %v5608_v16 = vmax.f32 %v5582_v24, 0.0  ;;  %v5577_v32 = vadd.f32 %v6056_v12, %v5576_v45 }
 0x4f8   : > { %5624 = vst.msk [vmem:[%s7009_s21 + $0x68] sm:$0xff] %vm605_vm0, %v5608_v16  ;;  %v5607_v2 = vmax.f32 %v5577_v32, 0.0 }
 0x4fa   : > { %5623 = vst.msk [vmem:[%s7009_s21 + $0x60] sm:$0xff] %vm605_vm0, %v5607_v2 }
 0x505   : > { %v6738_v31 = vpop.f32.mrf.mxu1 }
 0x506   : > { %v5592_v6 = vadd.f32 %v6738_v31, %v6056_v12 }
 0x507   : > { %v5586_v55 = vpop.f32.mrf.mxu1 }
 0x508   : > { %v5610_v61 = vmax.f32 %v5592_v6, 0.0  ;;  %v5587_v13 = vadd.f32 %v6056_v12, %v5586_v55 }
 0x50a   : > { %5626 = vst.msk [vmem:[%s7009_s21 + $0x78] sm:$0xff] %vm605_vm0, %v5610_v61  ;;  %v5609_v20 = vmax.f32 %v5587_v13, 0.0 }
 0x50c   : > { %5625 = vst.msk [vmem:[%s7009_s21 + $0x70] sm:$0xff] %vm605_vm0, %v5609_v20 }
 0x50d PF: > { %s23_s29 = sadd.s32 1, %s6828_s29   ;;  %s9871_s25 = sld [smem:[#allocation3_spill]] }
 0x50e   : > { %p20_p1 = scmp.ge.s32.totalorder %s23_s29, 6   ;;  %s9872_s26 = sld [smem:[#allocation4_spill]] }
 0x50f   : > { %s9873_s27 = sld [smem:[#allocation5_spill]] }
 0x510   : > { %s9874_s28 = sld [smem:[#allocation6_spill]]  ;;  %22 = sbr.rel (!%p20_p1) target bundleno = 3 (0x3), region = 137 }

</bundles_post_ra>
